<compile_context>
chip_gen: v6e
topology: v6e:2x2x1
jax: 0.10.0
libtpu: 0.0.40
codegen_flags: <defaults>
</compile_context>

<pallas_src>
import functools

import numpy as np
import jax
import jax.numpy as jnp
from jax import lax
from jax.experimental import pallas as pl
from jax.experimental.pallas import tpu as pltpu

LANE = 128
SUBLANE = 8
NEG_SLOPE = 0.2
KSIZE = 4
STRIDE = 2


def _round_up(x, m):
    return ((x + m - 1) // m) * m


def _conv_out(n):
    return (n - KSIZE) // STRIDE + 1


# ------------------------------ fused kernel -------------------------------- #
def _critic_fused_kernel(a0_ref, w0_ref, b0_ref, p1_ref, w1_ref, b1_ref,
                         w2_ref, b2_ref, o_ref, *, l2_taps):
    """Whole 3-layer critic for one batch element.

    a0_ref: (1, M0P, K0P) bf16  layer-0 im2col patches (explicit zero pad)
    w0_ref: (K0P, C0P)    bf16  layer-0 weight matrix (zero padded)
    p1_ref: (T, M1P, M0P) bf16  0/1 tap-gather matrices for layer-1 im2col
    w1_ref: (T, C0P, C1P) bf16  per-tap layer-1 weights (zero padded)
    w2_ref: (T, C1P, C2P) bf16  per-tap layer-2 weights (zero padded)
    b*_ref: (1, C*P)      f32   biases (zero padded)
    o_ref : (1, 8, C2P)   f32   critic score broadcast over the tile; [0,0,0] real
    """
    n_taps = p1_ref.shape[0]
    m1p = p1_ref.shape[1]
    c1p = w1_ref.shape[2]
    c2p = w2_ref.shape[2]

    # ---- layer 0: patches @ W0 + b0, LeakyReLU(0.2) ------------------------
    y0 = jnp.dot(a0_ref[0], w0_ref[...], preferred_element_type=jnp.float32)
    y0 = y0 + b0_ref[...]
    y0 = jnp.where(y0 >= 0, y0, NEG_SLOPE * y0).astype(jnp.bfloat16)  # (M0P, C0P)

    # ---- layer 1: sum over taps of (tap-gather @ y0) @ W1_tap --------------
    acc1 = jnp.zeros((m1p, c1p), jnp.float32)
    for kk in range(n_taps):
        g = jnp.dot(p1_ref[kk], y0, preferred_element_type=jnp.float32)
        acc1 = acc1 + jnp.dot(g.astype(jnp.bfloat16), w1_ref[kk],
                              preferred_element_type=jnp.float32)
    y1 = acc1 + b1_ref[...]
    y1 = jnp.where(y1 >= 0, y1, NEG_SLOPE * y1).astype(jnp.bfloat16)  # (M1P, C1P)

    # ---- layer 2: 1x1 spatial output; tap kk reads y1 row l2_taps[kk] ------
    acc2 = jnp.zeros((o_ref.shape[1], c2p), jnp.float32)
    for kk in range(n_taps):
        t = jnp.dot(y1, w2_ref[kk], preferred_element_type=jnp.float32)  # (M1P, C2P)
        acc2 = acc2 + t[l2_taps[kk]:l2_taps[kk] + 1, :]  # broadcast over rows
    o_ref[0] = acc2 + b2_ref[...]


# ------------------------------- JAX glue ------------------------------------ #
def _tap_gather_mats(h_in, w_in, h_out, w_out, m_in_pad, m_out_pad):
    """(KSIZE*KSIZE, m_out_pad, m_in_pad) 0/1 bf16 selection matrices (constants)."""
    p = np.zeros((KSIZE * KSIZE, m_out_pad, m_in_pad), np.float32)
    for kh in range(KSIZE):
        for kw in range(KSIZE):
            kk = kh * KSIZE + kw
            for ho in range(h_out):
                for wo in range(w_out):
                    q_in = (STRIDE * ho + kh) * w_in + (STRIDE * wo + kw)
                    p[kk, ho * w_out + wo, q_in] = 1.0
    return jnp.asarray(p, jnp.bfloat16)


def _im2col_layer0(image):
    """NCHW f32 image -> (B, Ho*Wo, 16*Cin) bf16 patches in (kh, kw, c) order."""
    B, C, H, W = image.shape
    Ho, Wo = _conv_out(H), _conv_out(W)
    x = jnp.transpose(image, (0, 2, 3, 1)).astype(jnp.bfloat16)  # cast before pad
    cols = []
    for kh in range(KSIZE):
        for kw in range(KSIZE):
            cols.append(x[:, kh:kh + STRIDE * Ho:STRIDE,
                          kw:kw + STRIDE * Wo:STRIDE, :])
    p = jnp.stack(cols, axis=3)                        # (B, Ho, Wo, 16, C)
    return p.reshape(B, Ho * Wo, KSIZE * KSIZE * C), Ho, Wo


def spectral_normalize(w, u0, n_power_iterations=1, eps=1e-12):
    """Mimics torch.nn.utils.spectral_norm: one power iteration, W / sigma."""
    cout = w.shape[0]
    w_mat = w.reshape(cout, -1)
    u = u0 / (jnp.linalg.norm(u0) + eps)
    v = None
    for _ in range(n_power_iterations):
        v = w_mat.T @ u
        v = v / (jnp.linalg.norm(v) + eps)
        u = w_mat @ v
        u = u / (jnp.linalg.norm(u) + eps)
    sigma = u @ (w_mat @ v)
    return w / sigma


def init_params(key, im_chan, hidden_dim):
    layer_shapes = [
        (hidden_dim, im_chan, KSIZE, KSIZE),
        (hidden_dim * 2, hidden_dim, KSIZE, KSIZE),
        (1, hidden_dim * 2, KSIZE, KSIZE),
    ]
    params = []
    for shp in layer_shapes:
        key, kw, kb, ku = jax.random.split(key, 4)
        fan_in = shp[1] * shp[2] * shp[3]
        bound = 1.0 / jnp.sqrt(jnp.float32(fan_in))
        w = jax.random.uniform(kw, shp, jnp.float32, -bound, bound)
        b = jax.random.uniform(kb, (shp[0],), jnp.float32, -bound, bound)
        u = jax.random.normal(ku, (shp[0],), jnp.float32)  # spectral-norm u
        params.append((w, b, u))
    return params


def critic_spec_forward(image, params):
    """image: (B, im_chan, H, W) f32 NCHW -> (B, 1) critic scores."""
    B, cin0, H, W = image.shape
    (w0, b0, u0), (w1, b1, u1), (w2, b2, u2) = params
    hd = w0.shape[0]
    c1, c2 = w1.shape[0], w2.shape[0]            # 2*hd, 1

    w0_sn = spectral_normalize(w0, u0)
    w1_sn = spectral_normalize(w1, u1)
    w2_sn = spectral_normalize(w2, u2)

    ho0, wo0 = _conv_out(H), _conv_out(W)
    ho1, wo1 = _conv_out(ho0), _conv_out(wo0)
    ho2, wo2 = _conv_out(ho1), _conv_out(wo1)
    assert ho2 == 1 and wo2 == 1, (ho2, wo2)     # see TODO(synk) above

    m0, m1 = ho0 * wo0, ho1 * wo1
    k0 = KSIZE * KSIZE * cin0
    m0p = _round_up(m0, LANE)        # also the layer-1 gather contraction dim
    m1p = _round_up(m1, SUBLANE)
    k0p = _round_up(k0, LANE)
    c0p = _round_up(hd, LANE)
    c1p = _round_up(c1, LANE)
    c2p = _round_up(c2, LANE)
    n_taps = KSIZE * KSIZE

    # layer-0 patches: built in bf16, zero-padded in bf16 (fused pad + cast).
    a0, _, _ = _im2col_layer0(image)
    a0 = jnp.pad(a0, ((0, 0), (0, m0p - m0), (0, k0p - k0)))

    # weights in (kh, kw, cin, cout) order, explicitly zero-padded (the MXU
    # accumulation relies on these pad regions being exact zeros).
    w0_p = jnp.pad(
        w0_sn.transpose(2, 3, 1, 0).reshape(k0, hd).astype(jnp.bfloat16),
        ((0, k0p - k0), (0, c0p - hd)))
    w1_p = jnp.pad(
        w1_sn.transpose(2, 3, 1, 0).reshape(n_taps, hd, c1).astype(jnp.bfloat16),
        ((0, 0), (0, c0p - hd), (0, c1p - c1)))
    w2_p = jnp.pad(
        w2_sn.transpose(2, 3, 1, 0).reshape(n_taps, c1, c2).astype(jnp.bfloat16),
        ((0, 0), (0, c1p - c1), (0, c2p - c2)))
    b0_p = jnp.pad(b0.reshape(1, hd), ((0, 0), (0, c0p - hd)))
    b1_p = jnp.pad(b1.reshape(1, c1), ((0, 0), (0, c1p - c1)))
    b2_p = jnp.pad(b2.reshape(1, c2), ((0, 0), (0, c2p - c2)))

    # trace-time constant 0/1 tap-gather matrices for the in-kernel im2col.
    p1 = _tap_gather_mats(ho0, wo0, ho1, wo1, m0p, m1p)
    l2_taps = tuple(kh * wo1 + kw for kh in range(KSIZE) for kw in range(KSIZE))

    kernel = functools.partial(_critic_fused_kernel, l2_taps=l2_taps)

    flops_per_b = (2 * m0p * k0p * c0p
                   + n_taps * (2 * m1p * m0p * c0p + 2 * m1p * c0p * c1p)
                   + n_taps * 2 * m1p * c1p * c2p)
    bytes_accessed = int(a0.size * 2 + w0_p.size * 2 + p1.size * 2
                         + w1_p.size * 2 + w2_p.size * 2
                         + (b0_p.size + b1_p.size + b2_p.size) * 4
                         + B * SUBLANE * c2p * 4)
    cost = pl.CostEstimate(flops=B * flops_per_b, transcendentals=0,
                           bytes_accessed=bytes_accessed)

    out = pl.pallas_call(
        kernel,
        out_shape=jax.ShapeDtypeStruct((B, SUBLANE, c2p), jnp.float32),
        grid_spec=pltpu.PrefetchScalarGridSpec(
            num_scalar_prefetch=0,
            grid=(B,),
            in_specs=[
                pl.BlockSpec((1, m0p, k0p), lambda b: (b, 0, 0)),        # patches
                pl.BlockSpec((k0p, c0p), lambda b: (0, 0)),              # W0
                pl.BlockSpec((1, c0p), lambda b: (0, 0)),                # b0
                pl.BlockSpec((n_taps, m1p, m0p), lambda b: (0, 0, 0)),   # gathers
                pl.BlockSpec((n_taps, c0p, c1p), lambda b: (0, 0, 0)),   # W1 taps
                pl.BlockSpec((1, c1p), lambda b: (0, 0)),                # b1
                pl.BlockSpec((n_taps, c1p, c2p), lambda b: (0, 0, 0)),   # W2 taps
                pl.BlockSpec((1, c2p), lambda b: (0, 0)),                # b2
            ],
            out_specs=pl.BlockSpec((1, SUBLANE, c2p), lambda b: (b, 0, 0)),
        ),
        compiler_params=pltpu.CompilerParams(
            dimension_semantics=("parallel",),
            vmem_limit_bytes=32 * 1024 * 1024,
        ),
        cost_estimate=cost,
    )(a0, w0_p, b0_p, p1, w1_p, b1_p, w2_p, b2_p)

    return out[:, 0, :1]                           # crit_pred.view(len, -1) -> (B, 1)


def critic_spec_reference(image, params):
    """Pure-JAX reference (lax.conv; bf16 inputs / f32 accumulate like kernel)."""
    x = image
    n_layers = len(params)
    for i, (w, b, u) in enumerate(params):
        w_sn = spectral_normalize(w, u)
        y = lax.conv_general_dilated(
            x.astype(jnp.bfloat16), w_sn.astype(jnp.bfloat16),
            window_strides=(STRIDE, STRIDE), padding="VALID",
            dimension_numbers=("NCHW", "OIHW", "NCHW"),
            preferred_element_type=jnp.float32,
        ) + b.reshape(1, -1, 1, 1)
        x = jnp.where(y >= 0, y, NEG_SLOPE * y) if i < n_layers - 1 else y
    return x.reshape(x.shape[0], -1)


if __name__ == "__main__":
    key = jax.random.PRNGKey(0)
    key, k_img = jax.random.split(key)

    B, im_chan, hidden_dim, H, W = 2, 3, 8, 28, 28   # spatial: 28 -> 13 -> 5 -> 1
    image = jax.random.normal(k_img, (B, im_chan, H, W), jnp.float32)
    params = init_params(key, im_chan, hidden_dim)

    fwd = jax.jit(critic_spec_forward)
    ref_fn = jax.jit(critic_spec_reference)

    out = jax.block_until_ready(fwd(image, params))
    ref = jax.block_until_ready(ref_fn(image, params))

    assert out.shape == (B, 1), out.shape
    assert jnp.allclose(out, ref, atol=1e-2, rtol=1e-2), (out, ref)

    print("KERNEL_OK")
</pallas_src>

<mosaic_0001>
module attributes {stable_mosaic.version = 11 : i64} {
  func.func @_critic_fused_kernel(%arg0: i32, %arg1: memref<1x256x128xbf16, #tpu.memory_space<vmem>>, %arg2: memref<128x128xbf16, #tpu.memory_space<vmem>>, %arg3: memref<1x128xf32, #tpu.memory_space<vmem>>, %arg4: memref<16x32x256xbf16, #tpu.memory_space<vmem>>, %arg5: memref<16x128x128xbf16, #tpu.memory_space<vmem>>, %arg6: memref<1x128xf32, #tpu.memory_space<vmem>>, %arg7: memref<16x128x128xbf16, #tpu.memory_space<vmem>>, %arg8: memref<1x128xf32, #tpu.memory_space<vmem>>, %arg9: memref<1x8x128xf32, #tpu.memory_space<vmem>>) attributes {dimension_semantics = [#tpu.dimension_semantics<parallel>], iteration_bounds = array<i64: 2>, scalar_prefetch = 0 : i64, scratch_operands = 0 : i64, tpu.core_type = #tpu.core_type<tc>, window_params = [{transform_indices = @transform_0, window_bounds = array<i64: 1, 256, 128>}, {pipeline_mode = #tpu.pipeline_mode<synchronous>, transform_indices = @transform_1, window_bounds = array<i64: 128, 128>}, {pipeline_mode = #tpu.pipeline_mode<synchronous>, transform_indices = @transform_2, window_bounds = array<i64: 1, 128>}, {pipeline_mode = #tpu.pipeline_mode<synchronous>, transform_indices = @transform_3, window_bounds = array<i64: 16, 32, 256>}, {pipeline_mode = #tpu.pipeline_mode<synchronous>, transform_indices = @transform_4, window_bounds = array<i64: 16, 128, 128>}, {pipeline_mode = #tpu.pipeline_mode<synchronous>, transform_indices = @transform_5, window_bounds = array<i64: 1, 128>}, {pipeline_mode = #tpu.pipeline_mode<synchronous>, transform_indices = @transform_6, window_bounds = array<i64: 16, 128, 128>}, {pipeline_mode = #tpu.pipeline_mode<synchronous>, transform_indices = @transform_7, window_bounds = array<i64: 1, 128>}, {transform_indices = @transform_8, window_bounds = array<i64: 1, 8, 128>}]} {
    %c0 = arith.constant 0 : index
    %c0_0 = arith.constant 0 : index
    %c0_1 = arith.constant 0 : index
    %0 = vector.load %arg1[%c0, %c0_0, %c0_1] : memref<1x256x128xbf16, #tpu.memory_space<vmem>>, vector<1x256x128xbf16>
    %1 = vector.shape_cast %0 : vector<1x256x128xbf16> to vector<256x128xbf16>
    %c0_2 = arith.constant 0 : index
    %c0_3 = arith.constant 0 : index
    %2 = vector.load %arg2[%c0_2, %c0_3] : memref<128x128xbf16, #tpu.memory_space<vmem>>, vector<128x128xbf16>
    %cst = arith.constant dense<0.000000e+00> : vector<256x128xf32>
    %3 = tpu.matmul %1, %2, %cst {dimension_numbers = #tpu.dot_dimension_numbers<[1], [0], [0], [1], [0, 0, 1, 1], [], []>} : vector<256x128xbf16>, vector<128x128xbf16>, vector<256x128xf32> -> vector<256x128xf32>
    %c0_4 = arith.constant 0 : index
    %c0_5 = arith.constant 0 : index
    %4 = vector.load %arg3[%c0_4, %c0_5] : memref<1x128xf32, #tpu.memory_space<vmem>>, vector<1x128xf32>
    %5 = vector.broadcast %4 : vector<1x128xf32> to vector<256x128xf32>
    %6 = arith.addf %3, %5 : vector<256x128xf32>
    %cst_6 = arith.constant 0.000000e+00 : f32
    %7 = vector.broadcast %cst_6 : f32 to vector<256x128xf32>
    %8 = arith.cmpf oge, %6, %7 : vector<256x128xf32>
    %cst_7 = arith.constant 2.000000e-01 : f32
    %9 = vector.broadcast %cst_7 : f32 to vector<256x128xf32>
    %10 = arith.mulf %9, %6 : vector<256x128xf32>
    %11 = arith.select %8, %6, %10 : vector<256x128xi1>, vector<256x128xf32>
    %12 = arith.truncf %11 : vector<256x128xf32> to vector<256x128xbf16>
    %cst_8 = arith.constant 0.000000e+00 : f32
    %13 = vector.broadcast %cst_8 : f32 to vector<32x128xf32>
    %c0_9 = arith.constant 0 : index
    %c0_10 = arith.constant 0 : index
    %c0_11 = arith.constant 0 : index
    %14 = vector.load %arg4[%c0_9, %c0_10, %c0_11] : memref<16x32x256xbf16, #tpu.memory_space<vmem>>, vector<1x32x256xbf16>
    %15 = vector.shape_cast %14 : vector<1x32x256xbf16> to vector<32x256xbf16>
    %cst_12 = arith.constant dense<0.000000e+00> : vector<32x128xf32>
    %16 = tpu.matmul %15, %12, %cst_12 {dimension_numbers = #tpu.dot_dimension_numbers<[1], [0], [0], [1], [0, 0, 1, 1], [], []>} : vector<32x256xbf16>, vector<256x128xbf16>, vector<32x128xf32> -> vector<32x128xf32>
    %17 = arith.truncf %16 : vector<32x128xf32> to vector<32x128xbf16>
    %c0_13 = arith.constant 0 : index
    %c0_14 = arith.constant 0 : index
    %c0_15 = arith.constant 0 : index
    %18 = vector.load %arg5[%c0_13, %c0_14, %c0_15] : memref<16x128x128xbf16, #tpu.memory_space<vmem>>, vector<1x128x128xbf16>
    %19 = vector.shape_cast %18 : vector<1x128x128xbf16> to vector<128x128xbf16>
    %cst_16 = arith.constant dense<0.000000e+00> : vector<32x128xf32>
    %20 = tpu.matmul %17, %19, %cst_16 {dimension_numbers = #tpu.dot_dimension_numbers<[1], [0], [0], [1], [0, 0, 1, 1], [], []>} : vector<32x128xbf16>, vector<128x128xbf16>, vector<32x128xf32> -> vector<32x128xf32>
    %21 = arith.addf %13, %20 : vector<32x128xf32>
    %c1 = arith.constant 1 : index
    %c0_17 = arith.constant 0 : index
    %c0_18 = arith.constant 0 : index
    %22 = vector.load %arg4[%c1, %c0_17, %c0_18] : memref<16x32x256xbf16, #tpu.memory_space<vmem>>, vector<1x32x256xbf16>
    %23 = vector.shape_cast %22 : vector<1x32x256xbf16> to vector<32x256xbf16>
    %cst_19 = arith.constant dense<0.000000e+00> : vector<32x128xf32>
    %24 = tpu.matmul %23, %12, %cst_19 {dimension_numbers = #tpu.dot_dimension_numbers<[1], [0], [0], [1], [0, 0, 1, 1], [], []>} : vector<32x256xbf16>, vector<256x128xbf16>, vector<32x128xf32> -> vector<32x128xf32>
    %25 = arith.truncf %24 : vector<32x128xf32> to vector<32x128xbf16>
    %c1_20 = arith.constant 1 : index
    %c0_21 = arith.constant 0 : index
    %c0_22 = arith.constant 0 : index
    %26 = vector.load %arg5[%c1_20, %c0_21, %c0_22] : memref<16x128x128xbf16, #tpu.memory_space<vmem>>, vector<1x128x128xbf16>
    %27 = vector.shape_cast %26 : vector<1x128x128xbf16> to vector<128x128xbf16>
    %cst_23 = arith.constant dense<0.000000e+00> : vector<32x128xf32>
    %28 = tpu.matmul %25, %27, %cst_23 {dimension_numbers = #tpu.dot_dimension_numbers<[1], [0], [0], [1], [0, 0, 1, 1], [], []>} : vector<32x128xbf16>, vector<128x128xbf16>, vector<32x128xf32> -> vector<32x128xf32>
    %29 = arith.addf %21, %28 : vector<32x128xf32>
    %c2 = arith.constant 2 : index
    %c0_24 = arith.constant 0 : index
    %c0_25 = arith.constant 0 : index
    %30 = vector.load %arg4[%c2, %c0_24, %c0_25] : memref<16x32x256xbf16, #tpu.memory_space<vmem>>, vector<1x32x256xbf16>
    %31 = vector.shape_cast %30 : vector<1x32x256xbf16> to vector<32x256xbf16>
    %cst_26 = arith.constant dense<0.000000e+00> : vector<32x128xf32>
    %32 = tpu.matmul %31, %12, %cst_26 {dimension_numbers = #tpu.dot_dimension_numbers<[1], [0], [0], [1], [0, 0, 1, 1], [], []>} : vector<32x256xbf16>, vector<256x128xbf16>, vector<32x128xf32> -> vector<32x128xf32>
    %33 = arith.truncf %32 : vector<32x128xf32> to vector<32x128xbf16>
    %c2_27 = arith.constant 2 : index
    %c0_28 = arith.constant 0 : index
    %c0_29 = arith.constant 0 : index
    %34 = vector.load %arg5[%c2_27, %c0_28, %c0_29] : memref<16x128x128xbf16, #tpu.memory_space<vmem>>, vector<1x128x128xbf16>
    %35 = vector.shape_cast %34 : vector<1x128x128xbf16> to vector<128x128xbf16>
    %cst_30 = arith.constant dense<0.000000e+00> : vector<32x128xf32>
    %36 = tpu.matmul %33, %35, %cst_30 {dimension_numbers = #tpu.dot_dimension_numbers<[1], [0], [0], [1], [0, 0, 1, 1], [], []>} : vector<32x128xbf16>, vector<128x128xbf16>, vector<32x128xf32> -> vector<32x128xf32>
    %37 = arith.addf %29, %36 : vector<32x128xf32>
    %c3 = arith.constant 3 : index
    %c0_31 = arith.constant 0 : index
    %c0_32 = arith.constant 0 : index
    %38 = vector.load %arg4[%c3, %c0_31, %c0_32] : memref<16x32x256xbf16, #tpu.memory_space<vmem>>, vector<1x32x256xbf16>
    %39 = vector.shape_cast %38 : vector<1x32x256xbf16> to vector<32x256xbf16>
    %cst_33 = arith.constant dense<0.000000e+00> : vector<32x128xf32>
    %40 = tpu.matmul %39, %12, %cst_33 {dimension_numbers = #tpu.dot_dimension_numbers<[1], [0], [0], [1], [0, 0, 1, 1], [], []>} : vector<32x256xbf16>, vector<256x128xbf16>, vector<32x128xf32> -> vector<32x128xf32>
    %41 = arith.truncf %40 : vector<32x128xf32> to vector<32x128xbf16>
    %c3_34 = arith.constant 3 : index
    %c0_35 = arith.constant 0 : index
    %c0_36 = arith.constant 0 : index
    %42 = vector.load %arg5[%c3_34, %c0_35, %c0_36] : memref<16x128x128xbf16, #tpu.memory_space<vmem>>, vector<1x128x128xbf16>
    %43 = vector.shape_cast %42 : vector<1x128x128xbf16> to vector<128x128xbf16>
    %cst_37 = arith.constant dense<0.000000e+00> : vector<32x128xf32>
    %44 = tpu.matmul %41, %43, %cst_37 {dimension_numbers = #tpu.dot_dimension_numbers<[1], [0], [0], [1], [0, 0, 1, 1], [], []>} : vector<32x128xbf16>, vector<128x128xbf16>, vector<32x128xf32> -> vector<32x128xf32>
    %45 = arith.addf %37, %44 : vector<32x128xf32>
    %c4 = arith.constant 4 : index
    %c0_38 = arith.constant 0 : index
    %c0_39 = arith.constant 0 : index
    %46 = vector.load %arg4[%c4, %c0_38, %c0_39] : memref<16x32x256xbf16, #tpu.memory_space<vmem>>, vector<1x32x256xbf16>
    %47 = vector.shape_cast %46 : vector<1x32x256xbf16> to vector<32x256xbf16>
    %cst_40 = arith.constant dense<0.000000e+00> : vector<32x128xf32>
    %48 = tpu.matmul %47, %12, %cst_40 {dimension_numbers = #tpu.dot_dimension_numbers<[1], [0], [0], [1], [0, 0, 1, 1], [], []>} : vector<32x256xbf16>, vector<256x128xbf16>, vector<32x128xf32> -> vector<32x128xf32>
    %49 = arith.truncf %48 : vector<32x128xf32> to vector<32x128xbf16>
    %c4_41 = arith.constant 4 : index
    %c0_42 = arith.constant 0 : index
    %c0_43 = arith.constant 0 : index
    %50 = vector.load %arg5[%c4_41, %c0_42, %c0_43] : memref<16x128x128xbf16, #tpu.memory_space<vmem>>, vector<1x128x128xbf16>
    %51 = vector.shape_cast %50 : vector<1x128x128xbf16> to vector<128x128xbf16>
    %cst_44 = arith.constant dense<0.000000e+00> : vector<32x128xf32>
    %52 = tpu.matmul %49, %51, %cst_44 {dimension_numbers = #tpu.dot_dimension_numbers<[1], [0], [0], [1], [0, 0, 1, 1], [], []>} : vector<32x128xbf16>, vector<128x128xbf16>, vector<32x128xf32> -> vector<32x128xf32>
    %53 = arith.addf %45, %52 : vector<32x128xf32>
    %c5 = arith.constant 5 : index
    %c0_45 = arith.constant 0 : index
    %c0_46 = arith.constant 0 : index
    %54 = vector.load %arg4[%c5, %c0_45, %c0_46] : memref<16x32x256xbf16, #tpu.memory_space<vmem>>, vector<1x32x256xbf16>
    %55 = vector.shape_cast %54 : vector<1x32x256xbf16> to vector<32x256xbf16>
    %cst_47 = arith.constant dense<0.000000e+00> : vector<32x128xf32>
    %56 = tpu.matmul %55, %12, %cst_47 {dimension_numbers = #tpu.dot_dimension_numbers<[1], [0], [0], [1], [0, 0, 1, 1], [], []>} : vector<32x256xbf16>, vector<256x128xbf16>, vector<32x128xf32> -> vector<32x128xf32>
    %57 = arith.truncf %56 : vector<32x128xf32> to vector<32x128xbf16>
    %c5_48 = arith.constant 5 : index
    %c0_49 = arith.constant 0 : index
    %c0_50 = arith.constant 0 : index
    %58 = vector.load %arg5[%c5_48, %c0_49, %c0_50] : memref<16x128x128xbf16, #tpu.memory_space<vmem>>, vector<1x128x128xbf16>
    %59 = vector.shape_cast %58 : vector<1x128x128xbf16> to vector<128x128xbf16>
    %cst_51 = arith.constant dense<0.000000e+00> : vector<32x128xf32>
    %60 = tpu.matmul %57, %59, %cst_51 {dimension_numbers = #tpu.dot_dimension_numbers<[1], [0], [0], [1], [0, 0, 1, 1], [], []>} : vector<32x128xbf16>, vector<128x128xbf16>, vector<32x128xf32> -> vector<32x128xf32>
    %61 = arith.addf %53, %60 : vector<32x128xf32>
    %c6 = arith.constant 6 : index
    %c0_52 = arith.constant 0 : index
    %c0_53 = arith.constant 0 : index
    %62 = vector.load %arg4[%c6, %c0_52, %c0_53] : memref<16x32x256xbf16, #tpu.memory_space<vmem>>, vector<1x32x256xbf16>
    %63 = vector.shape_cast %62 : vector<1x32x256xbf16> to vector<32x256xbf16>
    %cst_54 = arith.constant dense<0.000000e+00> : vector<32x128xf32>
    %64 = tpu.matmul %63, %12, %cst_54 {dimension_numbers = #tpu.dot_dimension_numbers<[1], [0], [0], [1], [0, 0, 1, 1], [], []>} : vector<32x256xbf16>, vector<256x128xbf16>, vector<32x128xf32> -> vector<32x128xf32>
    %65 = arith.truncf %64 : vector<32x128xf32> to vector<32x128xbf16>
    %c6_55 = arith.constant 6 : index
    %c0_56 = arith.constant 0 : index
    %c0_57 = arith.constant 0 : index
    %66 = vector.load %arg5[%c6_55, %c0_56, %c0_57] : memref<16x128x128xbf16, #tpu.memory_space<vmem>>, vector<1x128x128xbf16>
    %67 = vector.shape_cast %66 : vector<1x128x128xbf16> to vector<128x128xbf16>
    %cst_58 = arith.constant dense<0.000000e+00> : vector<32x128xf32>
    %68 = tpu.matmul %65, %67, %cst_58 {dimension_numbers = #tpu.dot_dimension_numbers<[1], [0], [0], [1], [0, 0, 1, 1], [], []>} : vector<32x128xbf16>, vector<128x128xbf16>, vector<32x128xf32> -> vector<32x128xf32>
    %69 = arith.addf %61, %68 : vector<32x128xf32>
    %c7 = arith.constant 7 : index
    %c0_59 = arith.constant 0 : index
    %c0_60 = arith.constant 0 : index
    %70 = vector.load %arg4[%c7, %c0_59, %c0_60] : memref<16x32x256xbf16, #tpu.memory_space<vmem>>, vector<1x32x256xbf16>
    %71 = vector.shape_cast %70 : vector<1x32x256xbf16> to vector<32x256xbf16>
    %cst_61 = arith.constant dense<0.000000e+00> : vector<32x128xf32>
    %72 = tpu.matmul %71, %12, %cst_61 {dimension_numbers = #tpu.dot_dimension_numbers<[1], [0], [0], [1], [0, 0, 1, 1], [], []>} : vector<32x256xbf16>, vector<256x128xbf16>, vector<32x128xf32> -> vector<32x128xf32>
    %73 = arith.truncf %72 : vector<32x128xf32> to vector<32x128xbf16>
    %c7_62 = arith.constant 7 : index
    %c0_63 = arith.constant 0 : index
    %c0_64 = arith.constant 0 : index
    %74 = vector.load %arg5[%c7_62, %c0_63, %c0_64] : memref<16x128x128xbf16, #tpu.memory_space<vmem>>, vector<1x128x128xbf16>
    %75 = vector.shape_cast %74 : vector<1x128x128xbf16> to vector<128x128xbf16>
    %cst_65 = arith.constant dense<0.000000e+00> : vector<32x128xf32>
    %76 = tpu.matmul %73, %75, %cst_65 {dimension_numbers = #tpu.dot_dimension_numbers<[1], [0], [0], [1], [0, 0, 1, 1], [], []>} : vector<32x128xbf16>, vector<128x128xbf16>, vector<32x128xf32> -> vector<32x128xf32>
    %77 = arith.addf %69, %76 : vector<32x128xf32>
    %c8 = arith.constant 8 : index
    %c0_66 = arith.constant 0 : index
    %c0_67 = arith.constant 0 : index
    %78 = vector.load %arg4[%c8, %c0_66, %c0_67] : memref<16x32x256xbf16, #tpu.memory_space<vmem>>, vector<1x32x256xbf16>
    %79 = vector.shape_cast %78 : vector<1x32x256xbf16> to vector<32x256xbf16>
    %cst_68 = arith.constant dense<0.000000e+00> : vector<32x128xf32>
    %80 = tpu.matmul %79, %12, %cst_68 {dimension_numbers = #tpu.dot_dimension_numbers<[1], [0], [0], [1], [0, 0, 1, 1], [], []>} : vector<32x256xbf16>, vector<256x128xbf16>, vector<32x128xf32> -> vector<32x128xf32>
    %81 = arith.truncf %80 : vector<32x128xf32> to vector<32x128xbf16>
    %c8_69 = arith.constant 8 : index
    %c0_70 = arith.constant 0 : index
    %c0_71 = arith.constant 0 : index
    %82 = vector.load %arg5[%c8_69, %c0_70, %c0_71] : memref<16x128x128xbf16, #tpu.memory_space<vmem>>, vector<1x128x128xbf16>
    %83 = vector.shape_cast %82 : vector<1x128x128xbf16> to vector<128x128xbf16>
    %cst_72 = arith.constant dense<0.000000e+00> : vector<32x128xf32>
    %84 = tpu.matmul %81, %83, %cst_72 {dimension_numbers = #tpu.dot_dimension_numbers<[1], [0], [0], [1], [0, 0, 1, 1], [], []>} : vector<32x128xbf16>, vector<128x128xbf16>, vector<32x128xf32> -> vector<32x128xf32>
    %85 = arith.addf %77, %84 : vector<32x128xf32>
    %c9 = arith.constant 9 : index
    %c0_73 = arith.constant 0 : index
    %c0_74 = arith.constant 0 : index
    %86 = vector.load %arg4[%c9, %c0_73, %c0_74] : memref<16x32x256xbf16, #tpu.memory_space<vmem>>, vector<1x32x256xbf16>
    %87 = vector.shape_cast %86 : vector<1x32x256xbf16> to vector<32x256xbf16>
    %cst_75 = arith.constant dense<0.000000e+00> : vector<32x128xf32>
    %88 = tpu.matmul %87, %12, %cst_75 {dimension_numbers = #tpu.dot_dimension_numbers<[1], [0], [0], [1], [0, 0, 1, 1], [], []>} : vector<32x256xbf16>, vector<256x128xbf16>, vector<32x128xf32> -> vector<32x128xf32>
    %89 = arith.truncf %88 : vector<32x128xf32> to vector<32x128xbf16>
    %c9_76 = arith.constant 9 : index
    %c0_77 = arith.constant 0 : index
    %c0_78 = arith.constant 0 : index
    %90 = vector.load %arg5[%c9_76, %c0_77, %c0_78] : memref<16x128x128xbf16, #tpu.memory_space<vmem>>, vector<1x128x128xbf16>
    %91 = vector.shape_cast %90 : vector<1x128x128xbf16> to vector<128x128xbf16>
    %cst_79 = arith.constant dense<0.000000e+00> : vector<32x128xf32>
    %92 = tpu.matmul %89, %91, %cst_79 {dimension_numbers = #tpu.dot_dimension_numbers<[1], [0], [0], [1], [0, 0, 1, 1], [], []>} : vector<32x128xbf16>, vector<128x128xbf16>, vector<32x128xf32> -> vector<32x128xf32>
    %93 = arith.addf %85, %92 : vector<32x128xf32>
    %c10 = arith.constant 10 : index
    %c0_80 = arith.constant 0 : index
    %c0_81 = arith.constant 0 : index
    %94 = vector.load %arg4[%c10, %c0_80, %c0_81] : memref<16x32x256xbf16, #tpu.memory_space<vmem>>, vector<1x32x256xbf16>
    %95 = vector.shape_cast %94 : vector<1x32x256xbf16> to vector<32x256xbf16>
    %cst_82 = arith.constant dense<0.000000e+00> : vector<32x128xf32>
    %96 = tpu.matmul %95, %12, %cst_82 {dimension_numbers = #tpu.dot_dimension_numbers<[1], [0], [0], [1], [0, 0, 1, 1], [], []>} : vector<32x256xbf16>, vector<256x128xbf16>, vector<32x128xf32> -> vector<32x128xf32>
    %97 = arith.truncf %96 : vector<32x128xf32> to vector<32x128xbf16>
    %c10_83 = arith.constant 10 : index
    %c0_84 = arith.constant 0 : index
    %c0_85 = arith.constant 0 : index
    %98 = vector.load %arg5[%c10_83, %c0_84, %c0_85] : memref<16x128x128xbf16, #tpu.memory_space<vmem>>, vector<1x128x128xbf16>
    %99 = vector.shape_cast %98 : vector<1x128x128xbf16> to vector<128x128xbf16>
    %cst_86 = arith.constant dense<0.000000e+00> : vector<32x128xf32>
    %100 = tpu.matmul %97, %99, %cst_86 {dimension_numbers = #tpu.dot_dimension_numbers<[1], [0], [0], [1], [0, 0, 1, 1], [], []>} : vector<32x128xbf16>, vector<128x128xbf16>, vector<32x128xf32> -> vector<32x128xf32>
    %101 = arith.addf %93, %100 : vector<32x128xf32>
    %c11 = arith.constant 11 : index
    %c0_87 = arith.constant 0 : index
    %c0_88 = arith.constant 0 : index
    %102 = vector.load %arg4[%c11, %c0_87, %c0_88] : memref<16x32x256xbf16, #tpu.memory_space<vmem>>, vector<1x32x256xbf16>
    %103 = vector.shape_cast %102 : vector<1x32x256xbf16> to vector<32x256xbf16>
    %cst_89 = arith.constant dense<0.000000e+00> : vector<32x128xf32>
    %104 = tpu.matmul %103, %12, %cst_89 {dimension_numbers = #tpu.dot_dimension_numbers<[1], [0], [0], [1], [0, 0, 1, 1], [], []>} : vector<32x256xbf16>, vector<256x128xbf16>, vector<32x128xf32> -> vector<32x128xf32>
    %105 = arith.truncf %104 : vector<32x128xf32> to vector<32x128xbf16>
    %c11_90 = arith.constant 11 : index
    %c0_91 = arith.constant 0 : index
    %c0_92 = arith.constant 0 : index
    %106 = vector.load %arg5[%c11_90, %c0_91, %c0_92] : memref<16x128x128xbf16, #tpu.memory_space<vmem>>, vector<1x128x128xbf16>
    %107 = vector.shape_cast %106 : vector<1x128x128xbf16> to vector<128x128xbf16>
    %cst_93 = arith.constant dense<0.000000e+00> : vector<32x128xf32>
    %108 = tpu.matmul %105, %107, %cst_93 {dimension_numbers = #tpu.dot_dimension_numbers<[1], [0], [0], [1], [0, 0, 1, 1], [], []>} : vector<32x128xbf16>, vector<128x128xbf16>, vector<32x128xf32> -> vector<32x128xf32>
    %109 = arith.addf %101, %108 : vector<32x128xf32>
    %c12 = arith.constant 12 : index
    %c0_94 = arith.constant 0 : index
    %c0_95 = arith.constant 0 : index
    %110 = vector.load %arg4[%c12, %c0_94, %c0_95] : memref<16x32x256xbf16, #tpu.memory_space<vmem>>, vector<1x32x256xbf16>
    %111 = vector.shape_cast %110 : vector<1x32x256xbf16> to vector<32x256xbf16>
    %cst_96 = arith.constant dense<0.000000e+00> : vector<32x128xf32>
    %112 = tpu.matmul %111, %12, %cst_96 {dimension_numbers = #tpu.dot_dimension_numbers<[1], [0], [0], [1], [0, 0, 1, 1], [], []>} : vector<32x256xbf16>, vector<256x128xbf16>, vector<32x128xf32> -> vector<32x128xf32>
    %113 = arith.truncf %112 : vector<32x128xf32> to vector<32x128xbf16>
    %c12_97 = arith.constant 12 : index
    %c0_98 = arith.constant 0 : index
    %c0_99 = arith.constant 0 : index
    %114 = vector.load %arg5[%c12_97, %c0_98, %c0_99] : memref<16x128x128xbf16, #tpu.memory_space<vmem>>, vector<1x128x128xbf16>
    %115 = vector.shape_cast %114 : vector<1x128x128xbf16> to vector<128x128xbf16>
    %cst_100 = arith.constant dense<0.000000e+00> : vector<32x128xf32>
    %116 = tpu.matmul %113, %115, %cst_100 {dimension_numbers = #tpu.dot_dimension_numbers<[1], [0], [0], [1], [0, 0, 1, 1], [], []>} : vector<32x128xbf16>, vector<128x128xbf16>, vector<32x128xf32> -> vector<32x128xf32>
    %117 = arith.addf %109, %116 : vector<32x128xf32>
    %c13 = arith.constant 13 : index
    %c0_101 = arith.constant 0 : index
    %c0_102 = arith.constant 0 : index
    %118 = vector.load %arg4[%c13, %c0_101, %c0_102] : memref<16x32x256xbf16, #tpu.memory_space<vmem>>, vector<1x32x256xbf16>
    %119 = vector.shape_cast %118 : vector<1x32x256xbf16> to vector<32x256xbf16>
    %cst_103 = arith.constant dense<0.000000e+00> : vector<32x128xf32>
    %120 = tpu.matmul %119, %12, %cst_103 {dimension_numbers = #tpu.dot_dimension_numbers<[1], [0], [0], [1], [0, 0, 1, 1], [], []>} : vector<32x256xbf16>, vector<256x128xbf16>, vector<32x128xf32> -> vector<32x128xf32>
    %121 = arith.truncf %120 : vector<32x128xf32> to vector<32x128xbf16>
    %c13_104 = arith.constant 13 : index
    %c0_105 = arith.constant 0 : index
    %c0_106 = arith.constant 0 : index
    %122 = vector.load %arg5[%c13_104, %c0_105, %c0_106] : memref<16x128x128xbf16, #tpu.memory_space<vmem>>, vector<1x128x128xbf16>
    %123 = vector.shape_cast %122 : vector<1x128x128xbf16> to vector<128x128xbf16>
    %cst_107 = arith.constant dense<0.000000e+00> : vector<32x128xf32>
    %124 = tpu.matmul %121, %123, %cst_107 {dimension_numbers = #tpu.dot_dimension_numbers<[1], [0], [0], [1], [0, 0, 1, 1], [], []>} : vector<32x128xbf16>, vector<128x128xbf16>, vector<32x128xf32> -> vector<32x128xf32>
    %125 = arith.addf %117, %124 : vector<32x128xf32>
    %c14 = arith.constant 14 : index
    %c0_108 = arith.constant 0 : index
    %c0_109 = arith.constant 0 : index
    %126 = vector.load %arg4[%c14, %c0_108, %c0_109] : memref<16x32x256xbf16, #tpu.memory_space<vmem>>, vector<1x32x256xbf16>
    %127 = vector.shape_cast %126 : vector<1x32x256xbf16> to vector<32x256xbf16>
    %cst_110 = arith.constant dense<0.000000e+00> : vector<32x128xf32>
    %128 = tpu.matmul %127, %12, %cst_110 {dimension_numbers = #tpu.dot_dimension_numbers<[1], [0], [0], [1], [0, 0, 1, 1], [], []>} : vector<32x256xbf16>, vector<256x128xbf16>, vector<32x128xf32> -> vector<32x128xf32>
    %129 = arith.truncf %128 : vector<32x128xf32> to vector<32x128xbf16>
    %c14_111 = arith.constant 14 : index
    %c0_112 = arith.constant 0 : index
    %c0_113 = arith.constant 0 : index
    %130 = vector.load %arg5[%c14_111, %c0_112, %c0_113] : memref<16x128x128xbf16, #tpu.memory_space<vmem>>, vector<1x128x128xbf16>
    %131 = vector.shape_cast %130 : vector<1x128x128xbf16> to vector<128x128xbf16>
    %cst_114 = arith.constant dense<0.000000e+00> : vector<32x128xf32>
    %132 = tpu.matmul %129, %131, %cst_114 {dimension_numbers = #tpu.dot_dimension_numbers<[1], [0], [0], [1], [0, 0, 1, 1], [], []>} : vector<32x128xbf16>, vector<128x128xbf16>, vector<32x128xf32> -> vector<32x128xf32>
    %133 = arith.addf %125, %132 : vector<32x128xf32>
    %c15 = arith.constant 15 : index
    %c0_115 = arith.constant 0 : index
    %c0_116 = arith.constant 0 : index
    %134 = vector.load %arg4[%c15, %c0_115, %c0_116] : memref<16x32x256xbf16, #tpu.memory_space<vmem>>, vector<1x32x256xbf16>
    %135 = vector.shape_cast %134 : vector<1x32x256xbf16> to vector<32x256xbf16>
    %cst_117 = arith.constant dense<0.000000e+00> : vector<32x128xf32>
    %136 = tpu.matmul %135, %12, %cst_117 {dimension_numbers = #tpu.dot_dimension_numbers<[1], [0], [0], [1], [0, 0, 1, 1], [], []>} : vector<32x256xbf16>, vector<256x128xbf16>, vector<32x128xf32> -> vector<32x128xf32>
    %137 = arith.truncf %136 : vector<32x128xf32> to vector<32x128xbf16>
    %c15_118 = arith.constant 15 : index
    %c0_119 = arith.constant 0 : index
    %c0_120 = arith.constant 0 : index
    %138 = vector.load %arg5[%c15_118, %c0_119, %c0_120] : memref<16x128x128xbf16, #tpu.memory_space<vmem>>, vector<1x128x128xbf16>
    %139 = vector.shape_cast %138 : vector<1x128x128xbf16> to vector<128x128xbf16>
    %cst_121 = arith.constant dense<0.000000e+00> : vector<32x128xf32>
    %140 = tpu.matmul %137, %139, %cst_121 {dimension_numbers = #tpu.dot_dimension_numbers<[1], [0], [0], [1], [0, 0, 1, 1], [], []>} : vector<32x128xbf16>, vector<128x128xbf16>, vector<32x128xf32> -> vector<32x128xf32>
    %141 = arith.addf %133, %140 : vector<32x128xf32>
    %c0_122 = arith.constant 0 : index
    %c0_123 = arith.constant 0 : index
    %142 = vector.load %arg6[%c0_122, %c0_123] : memref<1x128xf32, #tpu.memory_space<vmem>>, vector<1x128xf32>
    %143 = vector.broadcast %142 : vector<1x128xf32> to vector<32x128xf32>
    %144 = arith.addf %141, %143 : vector<32x128xf32>
    %cst_124 = arith.constant 0.000000e+00 : f32
    %145 = vector.broadcast %cst_124 : f32 to vector<32x128xf32>
    %146 = arith.cmpf oge, %144, %145 : vector<32x128xf32>
    %cst_125 = arith.constant 2.000000e-01 : f32
    %147 = vector.broadcast %cst_125 : f32 to vector<32x128xf32>
    %148 = arith.mulf %147, %144 : vector<32x128xf32>
    %149 = arith.select %146, %144, %148 : vector<32x128xi1>, vector<32x128xf32>
    %150 = arith.truncf %149 : vector<32x128xf32> to vector<32x128xbf16>
    %cst_126 = arith.constant 0.000000e+00 : f32
    %151 = vector.broadcast %cst_126 : f32 to vector<8x128xf32>
    %c0_127 = arith.constant 0 : index
    %c0_128 = arith.constant 0 : index
    %c0_129 = arith.constant 0 : index
    %152 = vector.load %arg7[%c0_127, %c0_128, %c0_129] : memref<16x128x128xbf16, #tpu.memory_space<vmem>>, vector<1x128x128xbf16>
    %153 = vector.shape_cast %152 : vector<1x128x128xbf16> to vector<128x128xbf16>
    %cst_130 = arith.constant dense<0.000000e+00> : vector<32x128xf32>
    %154 = tpu.matmul %150, %153, %cst_130 {dimension_numbers = #tpu.dot_dimension_numbers<[1], [0], [0], [1], [0, 0, 1, 1], [], []>} : vector<32x128xbf16>, vector<128x128xbf16>, vector<32x128xf32> -> vector<32x128xf32>
    %155 = vector.extract_strided_slice %154 {offsets = [0, 0], sizes = [1, 128], strides = [1, 1]} : vector<32x128xf32> to vector<1x128xf32>
    %156 = vector.broadcast %155 : vector<1x128xf32> to vector<8x128xf32>
    %157 = arith.addf %151, %156 : vector<8x128xf32>
    %c1_131 = arith.constant 1 : index
    %c0_132 = arith.constant 0 : index
    %c0_133 = arith.constant 0 : index
    %158 = vector.load %arg7[%c1_131, %c0_132, %c0_133] : memref<16x128x128xbf16, #tpu.memory_space<vmem>>, vector<1x128x128xbf16>
    %159 = vector.shape_cast %158 : vector<1x128x128xbf16> to vector<128x128xbf16>
    %cst_134 = arith.constant dense<0.000000e+00> : vector<32x128xf32>
    %160 = tpu.matmul %150, %159, %cst_134 {dimension_numbers = #tpu.dot_dimension_numbers<[1], [0], [0], [1], [0, 0, 1, 1], [], []>} : vector<32x128xbf16>, vector<128x128xbf16>, vector<32x128xf32> -> vector<32x128xf32>
    %161 = vector.extract_strided_slice %160 {offsets = [1, 0], sizes = [1, 128], strides = [1, 1]} : vector<32x128xf32> to vector<1x128xf32>
    %162 = vector.broadcast %161 : vector<1x128xf32> to vector<8x128xf32>
    %163 = arith.addf %157, %162 : vector<8x128xf32>
    %c2_135 = arith.constant 2 : index
    %c0_136 = arith.constant 0 : index
    %c0_137 = arith.constant 0 : index
    %164 = vector.load %arg7[%c2_135, %c0_136, %c0_137] : memref<16x128x128xbf16, #tpu.memory_space<vmem>>, vector<1x128x128xbf16>
    %165 = vector.shape_cast %164 : vector<1x128x128xbf16> to vector<128x128xbf16>
    %cst_138 = arith.constant dense<0.000000e+00> : vector<32x128xf32>
    %166 = tpu.matmul %150, %165, %cst_138 {dimension_numbers = #tpu.dot_dimension_numbers<[1], [0], [0], [1], [0, 0, 1, 1], [], []>} : vector<32x128xbf16>, vector<128x128xbf16>, vector<32x128xf32> -> vector<32x128xf32>
    %167 = vector.extract_strided_slice %166 {offsets = [2, 0], sizes = [1, 128], strides = [1, 1]} : vector<32x128xf32> to vector<1x128xf32>
    %168 = vector.broadcast %167 : vector<1x128xf32> to vector<8x128xf32>
    %169 = arith.addf %163, %168 : vector<8x128xf32>
    %c3_139 = arith.constant 3 : index
    %c0_140 = arith.constant 0 : index
    %c0_141 = arith.constant 0 : index
    %170 = vector.load %arg7[%c3_139, %c0_140, %c0_141] : memref<16x128x128xbf16, #tpu.memory_space<vmem>>, vector<1x128x128xbf16>
    %171 = vector.shape_cast %170 : vector<1x128x128xbf16> to vector<128x128xbf16>
    %cst_142 = arith.constant dense<0.000000e+00> : vector<32x128xf32>
    %172 = tpu.matmul %150, %171, %cst_142 {dimension_numbers = #tpu.dot_dimension_numbers<[1], [0], [0], [1], [0, 0, 1, 1], [], []>} : vector<32x128xbf16>, vector<128x128xbf16>, vector<32x128xf32> -> vector<32x128xf32>
    %173 = vector.extract_strided_slice %172 {offsets = [3, 0], sizes = [1, 128], strides = [1, 1]} : vector<32x128xf32> to vector<1x128xf32>
    %174 = vector.broadcast %173 : vector<1x128xf32> to vector<8x128xf32>
    %175 = arith.addf %169, %174 : vector<8x128xf32>
    %c4_143 = arith.constant 4 : index
    %c0_144 = arith.constant 0 : index
    %c0_145 = arith.constant 0 : index
    %176 = vector.load %arg7[%c4_143, %c0_144, %c0_145] : memref<16x128x128xbf16, #tpu.memory_space<vmem>>, vector<1x128x128xbf16>
    %177 = vector.shape_cast %176 : vector<1x128x128xbf16> to vector<128x128xbf16>
    %cst_146 = arith.constant dense<0.000000e+00> : vector<32x128xf32>
    %178 = tpu.matmul %150, %177, %cst_146 {dimension_numbers = #tpu.dot_dimension_numbers<[1], [0], [0], [1], [0, 0, 1, 1], [], []>} : vector<32x128xbf16>, vector<128x128xbf16>, vector<32x128xf32> -> vector<32x128xf32>
    %179 = vector.extract_strided_slice %178 {offsets = [5, 0], sizes = [1, 128], strides = [1, 1]} : vector<32x128xf32> to vector<1x128xf32>
    %180 = vector.broadcast %179 : vector<1x128xf32> to vector<8x128xf32>
    %181 = arith.addf %175, %180 : vector<8x128xf32>
    %c5_147 = arith.constant 5 : index
    %c0_148 = arith.constant 0 : index
    %c0_149 = arith.constant 0 : index
    %182 = vector.load %arg7[%c5_147, %c0_148, %c0_149] : memref<16x128x128xbf16, #tpu.memory_space<vmem>>, vector<1x128x128xbf16>
    %183 = vector.shape_cast %182 : vector<1x128x128xbf16> to vector<128x128xbf16>
    %cst_150 = arith.constant dense<0.000000e+00> : vector<32x128xf32>
    %184 = tpu.matmul %150, %183, %cst_150 {dimension_numbers = #tpu.dot_dimension_numbers<[1], [0], [0], [1], [0, 0, 1, 1], [], []>} : vector<32x128xbf16>, vector<128x128xbf16>, vector<32x128xf32> -> vector<32x128xf32>
    %185 = vector.extract_strided_slice %184 {offsets = [6, 0], sizes = [1, 128], strides = [1, 1]} : vector<32x128xf32> to vector<1x128xf32>
    %186 = vector.broadcast %185 : vector<1x128xf32> to vector<8x128xf32>
    %187 = arith.addf %181, %186 : vector<8x128xf32>
    %c6_151 = arith.constant 6 : index
    %c0_152 = arith.constant 0 : index
    %c0_153 = arith.constant 0 : index
    %188 = vector.load %arg7[%c6_151, %c0_152, %c0_153] : memref<16x128x128xbf16, #tpu.memory_space<vmem>>, vector<1x128x128xbf16>
    %189 = vector.shape_cast %188 : vector<1x128x128xbf16> to vector<128x128xbf16>
    %cst_154 = arith.constant dense<0.000000e+00> : vector<32x128xf32>
    %190 = tpu.matmul %150, %189, %cst_154 {dimension_numbers = #tpu.dot_dimension_numbers<[1], [0], [0], [1], [0, 0, 1, 1], [], []>} : vector<32x128xbf16>, vector<128x128xbf16>, vector<32x128xf32> -> vector<32x128xf32>
    %191 = vector.extract_strided_slice %190 {offsets = [7, 0], sizes = [1, 128], strides = [1, 1]} : vector<32x128xf32> to vector<1x128xf32>
    %192 = vector.broadcast %191 : vector<1x128xf32> to vector<8x128xf32>
    %193 = arith.addf %187, %192 : vector<8x128xf32>
    %c7_155 = arith.constant 7 : index
    %c0_156 = arith.constant 0 : index
    %c0_157 = arith.constant 0 : index
    %194 = vector.load %arg7[%c7_155, %c0_156, %c0_157] : memref<16x128x128xbf16, #tpu.memory_space<vmem>>, vector<1x128x128xbf16>
    %195 = vector.shape_cast %194 : vector<1x128x128xbf16> to vector<128x128xbf16>
    %cst_158 = arith.constant dense<0.000000e+00> : vector<32x128xf32>
    %196 = tpu.matmul %150, %195, %cst_158 {dimension_numbers = #tpu.dot_dimension_numbers<[1], [0], [0], [1], [0, 0, 1, 1], [], []>} : vector<32x128xbf16>, vector<128x128xbf16>, vector<32x128xf32> -> vector<32x128xf32>
    %197 = vector.extract_strided_slice %196 {offsets = [8, 0], sizes = [1, 128], strides = [1, 1]} : vector<32x128xf32> to vector<1x128xf32>
    %198 = vector.broadcast %197 : vector<1x128xf32> to vector<8x128xf32>
    %199 = arith.addf %193, %198 : vector<8x128xf32>
    %c8_159 = arith.constant 8 : index
    %c0_160 = arith.constant 0 : index
    %c0_161 = arith.constant 0 : index
    %200 = vector.load %arg7[%c8_159, %c0_160, %c0_161] : memref<16x128x128xbf16, #tpu.memory_space<vmem>>, vector<1x128x128xbf16>
    %201 = vector.shape_cast %200 : vector<1x128x128xbf16> to vector<128x128xbf16>
    %cst_162 = arith.constant dense<0.000000e+00> : vector<32x128xf32>
    %202 = tpu.matmul %150, %201, %cst_162 {dimension_numbers = #tpu.dot_dimension_numbers<[1], [0], [0], [1], [0, 0, 1, 1], [], []>} : vector<32x128xbf16>, vector<128x128xbf16>, vector<32x128xf32> -> vector<32x128xf32>
    %203 = vector.extract_strided_slice %202 {offsets = [10, 0], sizes = [1, 128], strides = [1, 1]} : vector<32x128xf32> to vector<1x128xf32>
    %204 = vector.broadcast %203 : vector<1x128xf32> to vector<8x128xf32>
    %205 = arith.addf %199, %204 : vector<8x128xf32>
    %c9_163 = arith.constant 9 : index
    %c0_164 = arith.constant 0 : index
    %c0_165 = arith.constant 0 : index
    %206 = vector.load %arg7[%c9_163, %c0_164, %c0_165] : memref<16x128x128xbf16, #tpu.memory_space<vmem>>, vector<1x128x128xbf16>
    %207 = vector.shape_cast %206 : vector<1x128x128xbf16> to vector<128x128xbf16>
    %cst_166 = arith.constant dense<0.000000e+00> : vector<32x128xf32>
    %208 = tpu.matmul %150, %207, %cst_166 {dimension_numbers = #tpu.dot_dimension_numbers<[1], [0], [0], [1], [0, 0, 1, 1], [], []>} : vector<32x128xbf16>, vector<128x128xbf16>, vector<32x128xf32> -> vector<32x128xf32>
    %209 = vector.extract_strided_slice %208 {offsets = [11, 0], sizes = [1, 128], strides = [1, 1]} : vector<32x128xf32> to vector<1x128xf32>
    %210 = vector.broadcast %209 : vector<1x128xf32> to vector<8x128xf32>
    %211 = arith.addf %205, %210 : vector<8x128xf32>
    %c10_167 = arith.constant 10 : index
    %c0_168 = arith.constant 0 : index
    %c0_169 = arith.constant 0 : index
    %212 = vector.load %arg7[%c10_167, %c0_168, %c0_169] : memref<16x128x128xbf16, #tpu.memory_space<vmem>>, vector<1x128x128xbf16>
    %213 = vector.shape_cast %212 : vector<1x128x128xbf16> to vector<128x128xbf16>
    %cst_170 = arith.constant dense<0.000000e+00> : vector<32x128xf32>
    %214 = tpu.matmul %150, %213, %cst_170 {dimension_numbers = #tpu.dot_dimension_numbers<[1], [0], [0], [1], [0, 0, 1, 1], [], []>} : vector<32x128xbf16>, vector<128x128xbf16>, vector<32x128xf32> -> vector<32x128xf32>
    %215 = vector.extract_strided_slice %214 {offsets = [12, 0], sizes = [1, 128], strides = [1, 1]} : vector<32x128xf32> to vector<1x128xf32>
    %216 = vector.broadcast %215 : vector<1x128xf32> to vector<8x128xf32>
    %217 = arith.addf %211, %216 : vector<8x128xf32>
    %c11_171 = arith.constant 11 : index
    %c0_172 = arith.constant 0 : index
    %c0_173 = arith.constant 0 : index
    %218 = vector.load %arg7[%c11_171, %c0_172, %c0_173] : memref<16x128x128xbf16, #tpu.memory_space<vmem>>, vector<1x128x128xbf16>
    %219 = vector.shape_cast %218 : vector<1x128x128xbf16> to vector<128x128xbf16>
    %cst_174 = arith.constant dense<0.000000e+00> : vector<32x128xf32>
    %220 = tpu.matmul %150, %219, %cst_174 {dimension_numbers = #tpu.dot_dimension_numbers<[1], [0], [0], [1], [0, 0, 1, 1], [], []>} : vector<32x128xbf16>, vector<128x128xbf16>, vector<32x128xf32> -> vector<32x128xf32>
    %221 = vector.extract_strided_slice %220 {offsets = [13, 0], sizes = [1, 128], strides = [1, 1]} : vector<32x128xf32> to vector<1x128xf32>
    %222 = vector.broadcast %221 : vector<1x128xf32> to vector<8x128xf32>
    %223 = arith.addf %217, %222 : vector<8x128xf32>
    %c12_175 = arith.constant 12 : index
    %c0_176 = arith.constant 0 : index
    %c0_177 = arith.constant 0 : index
    %224 = vector.load %arg7[%c12_175, %c0_176, %c0_177] : memref<16x128x128xbf16, #tpu.memory_space<vmem>>, vector<1x128x128xbf16>
    %225 = vector.shape_cast %224 : vector<1x128x128xbf16> to vector<128x128xbf16>
    %cst_178 = arith.constant dense<0.000000e+00> : vector<32x128xf32>
    %226 = tpu.matmul %150, %225, %cst_178 {dimension_numbers = #tpu.dot_dimension_numbers<[1], [0], [0], [1], [0, 0, 1, 1], [], []>} : vector<32x128xbf16>, vector<128x128xbf16>, vector<32x128xf32> -> vector<32x128xf32>
    %227 = vector.extract_strided_slice %226 {offsets = [15, 0], sizes = [1, 128], strides = [1, 1]} : vector<32x128xf32> to vector<1x128xf32>
    %228 = vector.broadcast %227 : vector<1x128xf32> to vector<8x128xf32>
    %229 = arith.addf %223, %228 : vector<8x128xf32>
    %c13_179 = arith.constant 13 : index
    %c0_180 = arith.constant 0 : index
    %c0_181 = arith.constant 0 : index
    %230 = vector.load %arg7[%c13_179, %c0_180, %c0_181] : memref<16x128x128xbf16, #tpu.memory_space<vmem>>, vector<1x128x128xbf16>
    %231 = vector.shape_cast %230 : vector<1x128x128xbf16> to vector<128x128xbf16>
    %cst_182 = arith.constant dense<0.000000e+00> : vector<32x128xf32>
    %232 = tpu.matmul %150, %231, %cst_182 {dimension_numbers = #tpu.dot_dimension_numbers<[1], [0], [0], [1], [0, 0, 1, 1], [], []>} : vector<32x128xbf16>, vector<128x128xbf16>, vector<32x128xf32> -> vector<32x128xf32>
    %233 = vector.extract_strided_slice %232 {offsets = [16, 0], sizes = [1, 128], strides = [1, 1]} : vector<32x128xf32> to vector<1x128xf32>
    %234 = vector.broadcast %233 : vector<1x128xf32> to vector<8x128xf32>
    %235 = arith.addf %229, %234 : vector<8x128xf32>
    %c14_183 = arith.constant 14 : index
    %c0_184 = arith.constant 0 : index
    %c0_185 = arith.constant 0 : index
    %236 = vector.load %arg7[%c14_183, %c0_184, %c0_185] : memref<16x128x128xbf16, #tpu.memory_space<vmem>>, vector<1x128x128xbf16>
    %237 = vector.shape_cast %236 : vector<1x128x128xbf16> to vector<128x128xbf16>
    %cst_186 = arith.constant dense<0.000000e+00> : vector<32x128xf32>
    %238 = tpu.matmul %150, %237, %cst_186 {dimension_numbers = #tpu.dot_dimension_numbers<[1], [0], [0], [1], [0, 0, 1, 1], [], []>} : vector<32x128xbf16>, vector<128x128xbf16>, vector<32x128xf32> -> vector<32x128xf32>
    %239 = vector.extract_strided_slice %238 {offsets = [17, 0], sizes = [1, 128], strides = [1, 1]} : vector<32x128xf32> to vector<1x128xf32>
    %240 = vector.broadcast %239 : vector<1x128xf32> to vector<8x128xf32>
    %241 = arith.addf %235, %240 : vector<8x128xf32>
    %c15_187 = arith.constant 15 : index
    %c0_188 = arith.constant 0 : index
    %c0_189 = arith.constant 0 : index
    %242 = vector.load %arg7[%c15_187, %c0_188, %c0_189] : memref<16x128x128xbf16, #tpu.memory_space<vmem>>, vector<1x128x128xbf16>
    %243 = vector.shape_cast %242 : vector<1x128x128xbf16> to vector<128x128xbf16>
    %cst_190 = arith.constant dense<0.000000e+00> : vector<32x128xf32>
    %244 = tpu.matmul %150, %243, %cst_190 {dimension_numbers = #tpu.dot_dimension_numbers<[1], [0], [0], [1], [0, 0, 1, 1], [], []>} : vector<32x128xbf16>, vector<128x128xbf16>, vector<32x128xf32> -> vector<32x128xf32>
    %245 = vector.extract_strided_slice %244 {offsets = [18, 0], sizes = [1, 128], strides = [1, 1]} : vector<32x128xf32> to vector<1x128xf32>
    %246 = vector.broadcast %245 : vector<1x128xf32> to vector<8x128xf32>
    %247 = arith.addf %241, %246 : vector<8x128xf32>
    %c0_191 = arith.constant 0 : index
    %c0_192 = arith.constant 0 : index
    %248 = vector.load %arg8[%c0_191, %c0_192] : memref<1x128xf32, #tpu.memory_space<vmem>>, vector<1x128xf32>
    %249 = vector.broadcast %248 : vector<1x128xf32> to vector<8x128xf32>
    %250 = arith.addf %247, %249 : vector<8x128xf32>
    %c0_193 = arith.constant 0 : index
    %c0_194 = arith.constant 0 : index
    %c0_195 = arith.constant 0 : index
    %251 = vector.load %arg9[%c0_193, %c0_194, %c0_195] : memref<1x8x128xf32, #tpu.memory_space<vmem>>, vector<1x8x128xf32>
    %252 = vector.shape_cast %251 : vector<1x8x128xf32> to vector<8x128xf32>
    %253 = vector.shape_cast %250 : vector<8x128xf32> to vector<1x8x128xf32>
    tpu.vector_store %arg9[%c0_193, %c0_194, %c0_195], %253 {strides = array<i32>} : memref<1x8x128xf32, #tpu.memory_space<vmem>>, vector<1x8x128xf32>,
    return
  }
  func.func @transform_0(%arg0: i32) -> (i32, i32, i32) {
    %c0_i32 = arith.constant 0 : i32
    %c0_i32_0 = arith.constant 0 : i32
    %c0_i32_1 = arith.constant 0 : i32
    return %arg0, %c0_i32, %c0_i32_0 : i32, i32, i32
  }
  func.func @transform_1(%arg0: i32) -> (i32, i32) {
    %c0_i32 = arith.constant 0 : i32
    %c0_i32_0 = arith.constant 0 : i32
    %c0_i32_1 = arith.constant 0 : i32
    return %c0_i32, %c0_i32_0 : i32, i32
  }
  func.func @transform_2(%arg0: i32) -> (i32, i32) {
    %c0_i32 = arith.constant 0 : i32
    %c0_i32_0 = arith.constant 0 : i32
    %c0_i32_1 = arith.constant 0 : i32
    return %c0_i32, %c0_i32_0 : i32, i32
  }
  func.func @transform_3(%arg0: i32) -> (i32, i32, i32) {
    %c0_i32 = arith.constant 0 : i32
    %c0_i32_0 = arith.constant 0 : i32
    %c0_i32_1 = arith.constant 0 : i32
    %c0_i32_2 = arith.constant 0 : i32
    return %c0_i32, %c0_i32_0, %c0_i32_1 : i32, i32, i32
  }
  func.func @transform_4(%arg0: i32) -> (i32, i32, i32) {
    %c0_i32 = arith.constant 0 : i32
    %c0_i32_0 = arith.constant 0 : i32
    %c0_i32_1 = arith.constant 0 : i32
    %c0_i32_2 = arith.constant 0 : i32
    return %c0_i32, %c0_i32_0, %c0_i32_1 : i32, i32, i32
  }
  func.func @transform_5(%arg0: i32) -> (i32, i32) {
    %c0_i32 = arith.constant 0 : i32
    %c0_i32_0 = arith.constant 0 : i32
    %c0_i32_1 = arith.constant 0 : i32
    return %c0_i32, %c0_i32_0 : i32, i32
  }
  func.func @transform_6(%arg0: i32) -> (i32, i32, i32) {
    %c0_i32 = arith.constant 0 : i32
    %c0_i32_0 = arith.constant 0 : i32
    %c0_i32_1 = arith.constant 0 : i32
    %c0_i32_2 = arith.constant 0 : i32
    return %c0_i32, %c0_i32_0, %c0_i32_1 : i32, i32, i32
  }
  func.func @transform_7(%arg0: i32) -> (i32, i32) {
    %c0_i32 = arith.constant 0 : i32
    %c0_i32_0 = arith.constant 0 : i32
    %c0_i32_1 = arith.constant 0 : i32
    return %c0_i32, %c0_i32_0 : i32, i32
  }
  func.func @transform_8(%arg0: i32) -> (i32, i32, i32) {
    %c0_i32 = arith.constant 0 : i32
    %c0_i32_0 = arith.constant 0 : i32
    %c0_i32_1 = arith.constant 0 : i32
    return %arg0, %c0_i32, %c0_i32_0 : i32, i32, i32
  }
}

</mosaic_0001>

<bundles_post_ra>
// kernel: critic_spec_forward.1
= control target key start
LH: loop header
LB: loop body
LE: loop exit
PB: predicated region body
PF: predicated region fallthrough
CT: control target
= control target key end

     0   :  { %s8628_s27 = smov 0   ;;  %s10146_s0 = inlined_call_operand.vmem [shape: bf16[2,256,128], index: 0, kind: input, shape index: {}]   ;;  %s10147_s1 = inlined_call_operand.vmem [shape: bf16[128,128], index: 1, kind: input, shape index: {}]   ;;  %s10148_s2 = inlined_call_operand.vmem [shape: f32[1,128], index: 2, kind: input, shape index: {}]   ;;  %s10149_s3 = inlined_call_operand.vmem [shape: bf16[16,32,256], index: 3, kind: input, shape index: {}]   ;;  %s10150_s4 = inlined_call_operand.vmem [shape: bf16[16,128,128], index: 4, kind: input, shape index: {}]   ;;  %s10151_s5 = inlined_call_operand.vmem [shape: f32[1,128], index: 5, kind: input, shape index: {}]   ;;  %s10152_s6 = inlined_call_operand.vmem [shape: bf16[16,128,128], index: 6, kind: input, shape index: {}]   ;;  %s10153_s7 = inlined_call_operand.vmem [shape: f32[1,128], index: 7, kind: input, shape index: {}]   ;;  %s10154_s8 = inlined_call_operand.vmem [shape: f32[2,8,128], index: 8, kind: output, shape index: {}]  }
   0x1 LB: > { %s5813_s28 = sadd.s32 4294967295, %s8581_s27   ;;  %p5817_p0 = scmp.ge.s32.totalorder %s8581_s27, 1  ;;  %s8581_s27 = sphi %s8628_s27, %s18_s27  }
   0x2   : > { %p262_p1 = scmp.lt.s32.totalorder %s8581_s27, 3 }
   0x4   : > { %p263_p2 = pnand %p5817_p0, %p262_p1 }
   0x5   : > { %p295_p3 = scmp.lt.s32.totalorder (!%p263_p2), %s5813_s28, 1 }
   0x6   : > { %266 = sbr.rel (%p263_p2) target bundleno = 1873 (0x751), region = 52 }
   0xb   : > { %v8199_v0 = vld [vmem:[%s10147_s1 + $0x38] sm:$0xff]   ;;  %v8200_v1 = vld [vmem:[%s10147_s1 + $0x30] sm:$0xff]   ;;  %s10156_s28 = smov (!%p295_p3, %s5813_s28), 1  ;;  %v8201_v2 = vld [vmem:[%s10147_s1 + $0x28] sm:$0xff]  }
   0xc   : > { %7503 = vmatprep.subr.bf16.mxu0 %v8199_v0  ;;  %s6710_s13 = sshll.u32 %s10156_s28, 7  ;;  %v8202_v3 = vld [vmem:[%s10147_s1 + $0x20] sm:$0xff]   ;;  %v8203_v5 = vld [vmem:[%s10147_s1 + $0x18] sm:$0xff]   ;;  %v8204_v6 = vld [vmem:[%s10147_s1 + $0x10] sm:$0xff]   ;;  %s5820_s11 = sshll.u32 %s10156_s28, 3 }
   0xd   : > { %7504 = vmatpush3.bf16.msra.mxu0 %v8199_v0  ;;  %s8651_s16 = scalar_lea.vmem %s10146_s0, %s6710_s13  ;;  %v8205_v7 = vld [vmem:[%s10147_s1 + $0x8] sm:$0xff]   ;;  %v8206_v8 = vld [vmem:[%s10147_s1] sm:$0xff]   ;;  %v8223_v24 = vld [vmem:[%s10150_s4 + $0x78] sm:$0xff]  }
   0xe   : > { %7505 = vmatprep.subr.bf16.mxu0 %v8200_v1  ;;  %v8207_v4 = vld [vmem:[%s8651_s16] sm:$0xff]   ;;  %v8208_v9 = vld [vmem:[%s8651_s16 + $0x8] sm:$0xff]   ;;  %v8209_v10 = vld [vmem:[%s8651_s16 + $0x10] sm:$0xff]  }
   0xf   : > { %7519 = vmatprep.mubr.bf16.mxu0 %v8207_v4  ;;  %v8210_v11 = vld [vmem:[%s8651_s16 + $0x18] sm:$0xff]   ;;  %v8211_v12 = vld [vmem:[%s8651_s16 + $0x20] sm:$0xff]   ;;  %v8212_v13 = vld [vmem:[%s8651_s16 + $0x28] sm:$0xff]  }
  0x10   : > { %v8213_v14 = vld [vmem:[%s8651_s16 + $0x30] sm:$0xff]   ;;  %v8214_v15 = vld [vmem:[%s8651_s16 + $0x38] sm:$0xff]   ;;  %v8215_v16 = vld [vmem:[%s8651_s16 + $0x40] sm:$0xff]  }
  0x11   : > { %7506 = vmatpush3.bf16.msra.mxu0 %v8200_v1  ;;  %v8216_v17 = vld [vmem:[%s8651_s16 + $0x48] sm:$0xff]   ;;  %v8217_v18 = vld [vmem:[%s8651_s16 + $0x50] sm:$0xff]   ;;  %v8218_v19 = vld [vmem:[%s8651_s16 + $0x58] sm:$0xff]  }
  0x12   : > { %7507 = vmatprep.subr.bf16.mxu0 %v8201_v2  ;;  %v8219_v20 = vld [vmem:[%s8651_s16 + $0x60] sm:$0xff]   ;;  %v8220_v21 = vld [vmem:[%s8651_s16 + $0x68] sm:$0xff]   ;;  %v8221_v22 = vld [vmem:[%s8651_s16 + $0x70] sm:$0xff]  }
  0x13   : > { %v8222_v23 = vld [vmem:[%s8651_s16 + $0x78] sm:$0xff]   ;;  %v8224_v25 = vld [vmem:[%s10150_s4 + $0x70] sm:$0xff]   ;;  %v8225_v26 = vld [vmem:[%s10150_s4 + $0x68] sm:$0xff]   ;;  %s303_s16 = scalar_lea.vmem %s10154_s8, %s5820_s11 }
  0x14   : > { %v8226_v27 = vld [vmem:[%s10150_s4 + $0x60] sm:$0xff]   ;;  %v8227_v28 = vld [vmem:[%s10150_s4 + $0x58] sm:$0xff]   ;;  %v8228_v29 = vld [vmem:[%s10150_s4 + $0x50] sm:$0xff]  }
  0x15   : > { %7508 = vmatpush3.bf16.msra.mxu0 %v8201_v2  ;;  %v8229_v30 = vld [vmem:[%s10150_s4 + $0x48] sm:$0xff]   ;;  %v8230_v31 = vld [vmem:[%s10150_s4 + $0x40] sm:$0xff]  }
  0x16   : > { %7509 = vmatprep.subr.bf16.mxu0 %v8202_v3  ;;  %v8233_v32 = vld [vmem:[%s10149_s3 + $0x4] ss:$8 sps:$4 sm:$0xff]   ;;  %v8714_v33 = vld [vmem:[%s10148_s2] ss:$0 sm:$0xff] }
  0x17   : > { %833 = vmatprep.mubr.bf16.mxu1 %v8233_v32 }
  0x19   : > { %7510 = vmatpush3.bf16.msra.mxu0 %v8202_v3 }
  0x1a   : > { %7511 = vmatprep.subr.bf16.mxu0 %v8203_v5 }
  0x1d   : > { %7512 = vmatpush3.bf16.msra.mxu0 %v8203_v5 }
  0x1e   : > { %7513 = vmatprep.subr.bf16.mxu0 %v8204_v6 }
  0x21   : > { %7514 = vmatpush3.bf16.msra.mxu0 %v8204_v6 }
  0x22   : > { %7515 = vmatprep.subr.bf16.mxu0 %v8205_v7 }
  0x25   : > { %7516 = vmatpush3.bf16.msra.mxu0 %v8205_v7 }
  0x26   : > { %7517 = vmatprep.subr.bf16.mxu0 %v8206_v8 }
  0x29   : > { %7518 = vmatpush3.bf16.msra.mxu0 %v8206_v8 }
  0x2a   : > { %7551 = vmatprep.subr.bf16.mxu0 %v8223_v24 }
  0x2c   : > { %7520 = vmatmul.mubr.bf16.vlgmr.msra.gmra.mxu0 %v8208_v9 }
  0x2d   : > { %7523 = vmatprep.mubr.bf16.mxu0 %v8209_v10  ;;  %7552 = vmatpush3.bf16.msra.mxu0 %v8223_v24 }
  0x2e   : > { %7553 = vmatprep.subr.bf16.mxu0 %v8224_v25 }
  0x31   : > { %7554 = vmatpush3.bf16.msra.mxu0 %v8224_v25 }
  0x32   : > { %7555 = vmatprep.subr.bf16.mxu0 %v8225_v26 }
  0x34   : > { %7524 = vmatmul.mubr.bf16.gmra.mxu0 %v8210_v11 }
  0x35   : > { %7527 = vmatprep.mubr.bf16.mxu0 %v8211_v12  ;;  %7556 = vmatpush3.bf16.msra.mxu0 %v8225_v26 }
  0x36   : > { %7557 = vmatprep.subr.bf16.mxu0 %v8226_v27 }
  0x39   : > { %7558 = vmatpush3.bf16.msra.mxu0 %v8226_v27 }
  0x3a   : > { %7559 = vmatprep.subr.bf16.mxu0 %v8227_v28 }
  0x3c   : > { %7528 = vmatmul.mubr.bf16.gmra.mxu0 %v8212_v13 }
  0x3d   : > { %7531 = vmatprep.mubr.bf16.mxu0 %v8213_v14  ;;  %7560 = vmatpush3.bf16.msra.mxu0 %v8227_v28 }
  0x3e   : > { %7561 = vmatprep.subr.bf16.mxu0 %v8228_v29 }
  0x41   : > { %7562 = vmatpush3.bf16.msra.mxu0 %v8228_v29 }
  0x42   : > { %7563 = vmatprep.subr.bf16.mxu0 %v8229_v30 }
  0x44   : > { %7532 = vmatmul.mubr.bf16.gmra.mxu0 %v8214_v15 }
  0x45   : > { %7535 = vmatprep.mubr.bf16.mxu0 %v8215_v16  ;;  %7564 = vmatpush3.bf16.msra.mxu0 %v8229_v30 }
  0x46   : > { %7565 = vmatprep.subr.bf16.mxu0 %v8230_v31 }
  0x49   : > { %7566 = vmatpush3.bf16.msra.mxu0 %v8230_v31 }
  0x4c   : > { %7536 = vmatmul.mubr.bf16.gmra.mxu0 %v8216_v17 }
  0x4d   : > { %7539 = vmatprep.mubr.bf16.mxu0 %v8217_v18 }
  0x54   : > { %7540 = vmatmul.mubr.bf16.gmra.mxu0 %v8218_v19 }
  0x55   : > { %7543 = vmatprep.mubr.bf16.mxu0 %v8219_v20 }
  0x5c   : > { %7544 = vmatmul.mubr.bf16.gmra.mxu0 %v8220_v21 }
  0x5d   : > { %7547 = vmatprep.mubr.bf16.mxu0 %v8221_v22 }
  0x64   : > { %7548 = vmatmul.mubr.bf16.gmra.mxu0 %v8222_v23 }
  0xec   : > { %v7521_v34 = vpop.f32.mrf.mxu0 }
  0xed   : > { %v547_v35 = vadd.f32 %v7521_v34, %v8714_v33 }
  0xee   : > { %v8717_v36 = vpop.f32.mrf.mxu0 }
  0xef   : > { %v699_v38 = vmul.f32 0.2, %v547_v35  ;;  %vm667_vm0 = vcmp.ge.f32.partialorder %v547_v35, 0.0 }
  0xf0   : > { %v7522_v37 = vpop.f32.mrf.mxu0 }
  0xf1   : > { %v550_v39 = vadd.f32 %v7522_v37, %v8714_v33  ;;  %v731_v43 = vsel %vm667_vm0, %v547_v35, %v699_v38 }
  0xf2   : > { %v8720_v40 = vpop.f32.mrf.mxu0 }
  0xf3   : > { %vm668_vm1 = vcmp.ge.f32.partialorder %v550_v39, 0.0  ;;  %v700_v41 = vmul.f32 0.2, %v550_v39 }
  0xf4   : > { %v7525_v42 = vpop.f32.mrf.mxu0 }
  0xf5   : > { %v732_v44 = vsel %vm668_vm1, %v550_v39, %v700_v41  ;;  %v563_v45 = vadd.f32 %v7525_v42, %v8714_v33 }
  0xf6   : > { %v8723_v46 = vpack.c.bf16 %v732_v44, %v731_v43  ;;  %v8725_v47 = vpop.f32.mrf.mxu0 }
  0xf7   : > { %v703_v49 = vmul.f32 0.2, %v563_v45  ;;  %vm671_vm2 = vcmp.ge.f32.partialorder %v563_v45, 0.0 }
  0xf8   : > { %v7526_v48 = vpop.f32.mrf.mxu0 }
  0xf9   : > { %v566_v50 = vadd.f32 %v7526_v48, %v8714_v33  ;;  %v735_v54 = vsel %vm671_vm2, %v563_v45, %v703_v49 }
  0xfa   : > { %v8728_v51 = vpop.f32.mrf.mxu0 }
  0xfb   : > { %vm672_vm3 = vcmp.ge.f32.partialorder %v566_v50, 0.0  ;;  %v704_v52 = vmul.f32 0.2, %v566_v50 }
  0xfc   : > { %v7529_v53 = vpop.f32.mrf.mxu0 }
  0xfd   : > { %v736_v55 = vsel %vm672_vm3, %v566_v50, %v704_v52  ;;  %v8759_v22 = vadd.f32 %v7529_v53, %v8714_v33 }
  0xfe   : > { %v8730_v56 = vpack.c.bf16 %v736_v55, %v735_v54  ;;  %v8732_v57 = vpop.f32.mrf.mxu0 }
  0xff   : > { %vm675_vm9 = vcmp.ge.f32.partialorder %v8759_v22, 0.0 }
 0x100   : > { %v7530_v58 = vpop.f32.mrf.mxu0 }
 0x101   : > { %v8753_v14 = vadd.f32 %v7530_v58, %v8714_v33 }
 0x102   : > { %v8734_v59 = vpop.f32.mrf.mxu0 }
 0x103   : > { %v708_v24 = vmul.f32 0.2, %v8753_v14  ;;  %v574_v55 = vadd.f32 %v8714_v33, %v8734_v59  ;;  %vm676_vm15 = vcmp.ge.f32.partialorder %v8753_v14, 0.0  ;;  %v571_v59 = vadd.f32 %v8714_v33, %v8732_v57 }
 0x104   : > { %v7533_v60 = vpop.f32.mrf.mxu0 }
 0x105   : > { %v595_v11 = vadd.f32 %v7533_v60, %v8714_v33  ;;  %vm674_vm2 = vcmp.ge.f32.partialorder %v574_v55, 0.0  ;;  %vm673_vm3 = vcmp.ge.f32.partialorder %v571_v59, 0.0 }
 0x106   : > { %v586_v61 = vpop.f32.mrf.mxu0 }
 0x107   : > { %v711_v16 = vmul.f32 0.2, %v595_v11  ;;  %v587_v17 = vadd.f32 %v8714_v33, %v586_v61  ;;  %vm679_vm4 = vcmp.ge.f32.partialorder %v595_v11, 0.0 }
 0x108   : > { %v7534_v62 = vpop.f32.mrf.mxu0 }
 0x109   : > { %v598_v12 = vadd.f32 %v7534_v62, %v8714_v33  ;;  %v743_v27 = vsel %vm679_vm4, %v595_v11, %v711_v16  ;;  %vm677_vm6 = vcmp.ge.f32.partialorder %v587_v17, 0.0  ;;  %v709_v45 = vmul.f32 0.2, %v587_v17 }
 0x10a   : > { %v589_v63 = vpop.f32.mrf.mxu0 }
 0x10b   : > { %v712_v19 = vmul.f32 0.2, %v598_v12  ;;  %v590_v20 = vadd.f32 %v8714_v33, %v589_v63  ;;  %vm680_vm5 = vcmp.ge.f32.partialorder %v598_v12, 0.0 }
 0x10c   : > { %v8736_v0 = vpop.f32.mrf.mxu0 }
 0x10d   : > { %v744_v30 = vsel %vm680_vm5, %v598_v12, %v712_v19  ;;  %vm678_vm7 = vcmp.ge.f32.partialorder %v590_v20, 0.0  ;;  %v710_v38 = vmul.f32 0.2, %v590_v20  ;;  %v705_v19 = vmul.f32 0.2, %v571_v59 }
 0x10e   : > { %v8738_v1 = vpop.f32.mrf.mxu0  ;;  %v8769_v48 = vpack.c.bf16 %v744_v30, %v743_v27 }
 0x10f   : > { %v742_v58 = vsel %vm678_vm7, %v590_v20, %v710_v38  ;;  %v603_v38 = vadd.f32 %v8714_v33, %v8738_v1 }
 0x110   : > { %v8740_v2 = vpop.f32.mrf.mxu0 }
 0x112   : > { %v8742_v3 = vpop.f32.mrf.mxu0 }
 0x114   : > { %v8744_v4 = vpop.f32.mrf.mxu0 }
 0x115   : > { %v627_v11 = vadd.f32 %v8744_v4, %v8714_v33 }
 0x116   : > { %v8746_v5 = vpop.f32.mrf.mxu0 }
 0x117   : > { %v719_v20 = vmul.f32 0.2, %v627_v11  ;;  %vm687_vm5 = vcmp.ge.f32.partialorder %v627_v11, 0.0 }
 0x118   : > { %v7542_v6 = vpop.f32.mrf.mxu0 }
 0x119   : > { %v630_v61 = vadd.f32 %v7542_v6, %v8714_v33  ;;  %v751_v30 = vsel %vm687_vm5, %v627_v11, %v719_v20  ;;  %v8239_v11 = vld [vmem:[%s10149_s3 + $0x24] ss:$8 sps:$4 sm:$0xff]  }
 0x11a   : > { %v8748_v7 = vpop.f32.mrf.mxu0  ;;  %v8249_v20 = vld [vmem:[%s10150_s4 + $0x8] sm:$0xff]  }
 0x11b   : > { %v720_v57 = vmul.f32 0.2, %v630_v61  ;;  %vm688_vm4 = vcmp.ge.f32.partialorder %v630_v61, 0.0 }
 0x11c   : > { %v7545_v8 = vpop.f32.mrf.mxu0 }
 0x11d   : > { %v643_v31 = vadd.f32 %v7545_v8, %v8714_v33  ;;  %v707_v8 = vmul.f32 0.2, %v8759_v22 }
 0x11e   : > { %v634_v9 = vpop.f32.mrf.mxu0 }
 0x11f   : > { %v723_v50 = vmul.f32 0.2, %v643_v31  ;;  %v635_v52 = vadd.f32 %v8714_v33, %v634_v9  ;;  %vm691_vm14 = vcmp.ge.f32.partialorder %v643_v31, 0.0  ;;  %v741_v9 = vsel %vm677_vm6, %v587_v17, %v709_v45 }
 0x120   : > { %v7546_v10 = vpop.f32.mrf.mxu0  ;;  %v622_v17 = vadd.f32 %v8714_v33, %v8748_v7  ;;  %v739_v4 = vsel %vm675_vm9, %v8759_v22, %v707_v8  ;;  %v558_v7 = vadd.f32 %v8714_v33, %v8728_v51  ;;  %v614_v22 = vadd.f32 %v8740_v2, %v8714_v33  ;;  %v8231_v8 = vld [vmem:[%s10149_s3] ss:$8 sps:$4 sm:$0xff]  }
 0x121   : > { %v646_v25 = vadd.f32 %v7546_v10, %v8714_v33  ;;  %v8789_v10 = vpack.c.bf16 %v742_v58, %v741_v9  ;;  %v755_v6 = vsel %vm691_vm14, %v643_v31, %v723_v50  ;;  %v721_v12 = vmul.f32 0.2, %v635_v52  ;;  %v8236_v9 = vld [vmem:[%s10149_s3 + $0x10] ss:$8 sps:$4 sm:$0xff]  }
 0x122   : > { %v637_v13 = vpop.f32.mrf.mxu0  ;;  %vm689_vm1 = vcmp.ge.f32.partialorder %v635_v52, 0.0  ;;  %v718_v27 = vmul.f32 0.2, %v622_v17  ;;  %vm686_vm6 = vcmp.ge.f32.partialorder %v622_v17, 0.0  ;;  %v702_v2 = vmul.f32 0.2, %v558_v7 }
 0x123   : > { %v724_v39 = vmul.f32 0.2, %v646_v25  ;;  %v638_v41 = vadd.f32 %v8714_v33, %v637_v13  ;;  %vm692_vm13 = vcmp.ge.f32.partialorder %v646_v25, 0.0  ;;  %v740_v13 = vsel %vm676_vm15, %v8753_v14, %v708_v24 }
 0x124   : > { %v7549_v15 = vpop.f32.mrf.mxu0  ;;  %v8804_v14 = vpack.c.bf16 %v740_v13, %v739_v4  ;;  %vm684_vm9 = vcmp.ge.f32.partialorder %v614_v22, 0.0  ;;  %v539_v45 = vadd.f32 %v8714_v33, %v8717_v36  ;;  %v8240_v13 = vld [vmem:[%s10149_s3 + $0x34] ss:$8 sps:$4 sm:$0xff]  }
 0x125   : > { %v659_v18 = vadd.f32 %v7549_v15, %v8714_v33  ;;  %v756_v62 = vsel %vm692_vm13, %v646_v25, %v724_v39  ;;  %v722_v63 = vmul.f32 0.2, %v638_v41  ;;  %vm690_vm0 = vcmp.ge.f32.partialorder %v638_v41, 0.0  ;;  %v8247_v4 = vld [vmem:[%s10150_s4 + $0x18] sm:$0xff]  }
 0x126   : > { %v650_v21 = vpop.f32.mrf.mxu0  ;;  %v706_v15 = vmul.f32 0.2, %v574_v55  ;;  %v8795_v16 = vpack.c.bf16 %v756_v62, %v755_v6  ;;  %vm681_vm13 = vcmp.ge.f32.partialorder %v603_v38, 0.0  ;;  %v697_v58 = vmul.f32 0.2, %v539_v45  ;;  %v8243_v6 = vld [vmem:[%s10150_s4 + $0x38] sm:$0xff]  }
 0x127   : > { %v651_v23 = vadd.f32 %v8714_v33, %v650_v21  ;;  %v727_v28 = vmul.f32 0.2, %v659_v18  ;;  %vm695_vm8 = vcmp.ge.f32.partialorder %v659_v18, 0.0  ;;  %v619_v21 = vadd.f32 %v8714_v33, %v8746_v5 }
 0x128   : > { %v7550_v26 = vpop.f32.mrf.mxu0  ;;  %v738_v24 = vsel %vm674_vm2, %v574_v55, %v706_v15  ;;  %v737_v5 = vsel %vm673_vm3, %v571_v59, %v705_v19  ;;  %vm665_vm15 = vcmp.ge.f32.partialorder %v539_v45, 0.0  ;;  %v8234_v59 = vld [vmem:[%s10149_s3 + $0x14] ss:$8 sps:$4 sm:$0xff]  }
 0x129   : > { %v662_v29 = vadd.f32 %v7550_v26, %v8714_v33  ;;  %v725_v34 = vmul.f32 0.2, %v651_v23  ;;  %vm693_vm11 = vcmp.ge.f32.partialorder %v651_v23, 0.0  ;;  %v759_v42 = vsel %vm695_vm8, %v659_v18, %v727_v28  ;;  %v8244_v15 = vld [vmem:[%s10150_s4 + $0x30] sm:$0xff]  }
 0x12a   : > { %v653_v32 = vpop.f32.mrf.mxu0  ;;  %v754_v18 = vsel %vm690_vm0, %v638_v41, %v722_v63  ;;  %v752_v26 = vsel %vm688_vm4, %v630_v61, %v720_v57  ;;  %v555_v28 = vadd.f32 %v8714_v33, %v8725_v47  ;;  %v8819_v51 = vpack.c.bf16 %v738_v24, %v737_v5  ;;  %v8245_v57 = vld [vmem:[%s10150_s4 + $0x28] sm:$0xff]   ;;  %v8248_v19 = vld [vmem:[%s10150_s4 + $0x10] sm:$0xff]  }
 0x12b   : > { %vm696_vm10 = vcmp.ge.f32.partialorder %v662_v29, 0.0  ;;  %v728_v35 = vmul.f32 0.2, %v662_v29  ;;  %v654_v37 = vadd.f32 %v8714_v33, %v653_v32  ;;  %v757_v53 = vsel %vm693_vm11, %v651_v23, %v725_v34 }
 0x12c   : > { %v753_v23 = vsel %vm689_vm1, %v635_v52, %v721_v12  ;;  %v717_v31 = vmul.f32 0.2, %v619_v21  ;;  %vm685_vm7 = vcmp.ge.f32.partialorder %v619_v21, 0.0  ;;  %v8823_v32 = vpack.c.bf16 %v752_v26, %v751_v30  ;;  %v8237_v12 = vld [vmem:[%s10149_s3 + $0x20] ss:$8 sps:$4 sm:$0xff]  }
 0x12d   : > { %v760_v43 = vsel %vm696_vm10, %v662_v29, %v728_v35  ;;  %vm694_vm12 = vcmp.ge.f32.partialorder %v654_v37, 0.0  ;;  %v726_v44 = vmul.f32 0.2, %v654_v37  ;;  %v8810_v25 = vpack.c.bf16 %v754_v18, %v753_v23  ;;  %v8246_v18 = vld [vmem:[%s10150_s4 + $0x20] sm:$0xff]  }
 0x12e   : > { %v8771_v49 = vpack.c.bf16 %v760_v43, %v759_v42  ;;  %v611_v29 = vadd.f32 %v8736_v0, %v8714_v33  ;;  %vm670_vm8 = vcmp.ge.f32.partialorder %v558_v7, 0.0  ;;  %v716_v34 = vmul.f32 0.2, %v614_v22 }
 0x12f   : > { %v758_v54 = vsel %vm694_vm12, %v654_v37, %v726_v44  ;;  %v606_v47 = vadd.f32 %v8714_v33, %v8742_v3  ;;  %v750_v35 = vsel %vm686_vm6, %v622_v17, %v718_v27  ;;  %v701_v37 = vmul.f32 0.2, %v555_v28  ;;  %v8242_v17 = vld [vmem:[%s10149_s3 + $0x30] ss:$8 sps:$4 sm:$0xff]  }
 0x130   : > { %v8777_v60 = vpack.c.bf16 %v758_v54, %v757_v53  ;;  %6735 = vmatprep.subr.bf16.mxu1 %v8771_v49  ;;  %6811 = vmatprep.subr.bf16.mxu0 %v8771_v49  ;;  %vm669_vm10 = vcmp.ge.f32.partialorder %v555_v28, 0.0  ;;  %v715_v0 = vmul.f32 0.2, %v611_v29  ;;  %v749_v39 = vsel %vm685_vm7, %v619_v21, %v717_v31  ;;  %v8250_v21 = vld [vmem:[%s10150_s4] sm:$0xff]  }
 0x131   : > { %6736 = vmatpush3.bf16.msra.mxu1 %v8769_v48  ;;  %v542_v41 = vadd.f32 %v8714_v33, %v8720_v40  ;;  %v734_v42 = vsel %vm670_vm8, %v558_v7, %v702_v2  ;;  %vm683_vm11 = vcmp.ge.f32.partialorder %v611_v29, 0.0  ;;  %v8833_v43 = vpack.c.bf16 %v750_v35, %v749_v39 }
 0x132   : > { %6737 = vmatprep.subr.bf16.mxu1 %v8777_v60  ;;  %v748_v3 = vsel %vm684_vm9, %v614_v22, %v716_v34  ;;  %v714_v44 = vmul.f32 0.2, %v606_v47  ;;  %v733_v50 = vsel %vm669_vm10, %v555_v28, %v701_v37  ;;  %vm682_vm12 = vcmp.ge.f32.partialorder %v606_v47, 0.0 }
 0x133   : > { %v8839_v1 = vpack.c.bf16 %v734_v42, %v733_v50  ;;  %v747_v52 = vsel %vm683_vm11, %v611_v29, %v715_v0  ;;  %v713_v53 = vmul.f32 0.2, %v603_v38  ;;  %v698_v40 = vmul.f32 0.2, %v542_v41 }
 0x134   : > { %v8841_v54 = vpack.c.bf16 %v748_v3, %v747_v52  ;;  %vm666_vm14 = vcmp.ge.f32.partialorder %v542_v41, 0.0  ;;  %v746_v55 = vsel %vm682_vm12, %v606_v47, %v714_v44  ;;  %v729_v62 = vsel %vm665_vm15, %v539_v45, %v697_v58  ;;  %v8251_v58 = vld [vmem:[%s10149_s3 + $0x40] ss:$8 sps:$4 sm:$0xff]  }
 0x135   : > { %6738 = vmatpush3.bf16.msra.mxu1 %v8789_v10  ;;  %v745_v33 = vsel %vm681_vm13, %v603_v38, %v713_v53  ;;  %v730_v36 = vsel %vm666_vm14, %v542_v41, %v698_v40  ;;  %v8253_v40 = vld [vmem:[%s10149_s3 + $0x44] ss:$8 sps:$4 sm:$0xff]  }
 0x136   : > { %6739 = vmatprep.subr.bf16.mxu1 %v8795_v16  ;;  %v8845_v61 = vpack.c.bf16 %v746_v55, %v745_v33  ;;  %v8849_v63 = vpack.c.bf16 %v730_v36, %v729_v62  ;;  %v8254_v33 = vld [vmem:[%s10149_s3 + $0x54] ss:$8 sps:$4 sm:$0xff]   ;;  %v8256_v36 = vld [vmem:[%s10149_s3 + $0x50] ss:$8 sps:$4 sm:$0xff]   ;;  %v8259_v62 = vld [vmem:[%s10149_s3 + $0x64] ss:$8 sps:$4 sm:$0xff]  }
 0x139   : > { %6740 = vmatpush3.bf16.msra.mxu1 %v8804_v14 }
 0x13a   : > { %6741 = vmatprep.subr.bf16.mxu1 %v8810_v25 }
 0x13d   : > { %6742 = vmatpush3.bf16.msra.mxu1 %v8819_v51 }
 0x13e   : > { %6743 = vmatprep.subr.bf16.mxu1 %v8823_v32 }
 0x141   : > { %6744 = vmatpush3.bf16.msra.mxu1 %v8730_v56 }
 0x142   : > { %6745 = vmatprep.subr.bf16.mxu1 %v8833_v43 }
 0x145   : > { %6746 = vmatpush3.bf16.msra.mxu1 %v8839_v1 }
 0x146   : > { %6747 = vmatprep.subr.bf16.mxu1 %v8841_v54 }
 0x149   : > { %6748 = vmatpush3.bf16.msra.mxu1 %v8723_v46 }
 0x14a   : > { %6749 = vmatprep.subr.bf16.mxu1 %v8845_v61 }
 0x14d   : > { %6750 = vmatpush3.bf16.msra.mxu1 %v8849_v63 }
 0x14e   : > { %6763 = vmatprep.subr.bf16.mxu1 %v8771_v49 }
 0x150   : > { %834 = vmatmul.mubr.bf16.vlgmr.msra.gmra.mxu1 %v8231_v8  ;;  %v8257_v8 = vld [vmem:[%s10149_s3 + $0x60] ss:$8 sps:$4 sm:$0xff]  }
 0x151   : > { %6764 = vmatpush3.bf16.msra.mxu1 %v8769_v48  ;;  %841 = vmatprep.mubr.bf16.mxu1 %v8234_v59  ;;  %v8260_v59 = vld [vmem:[%s10149_s3 + $0x74] ss:$8 sps:$4 sm:$0xff]  }
 0x152   : > { %6765 = vmatprep.subr.bf16.mxu1 %v8777_v60 }
 0x155   : > { %6766 = vmatpush3.bf16.msra.mxu1 %v8789_v10 }
 0x156   : > { %6767 = vmatprep.subr.bf16.mxu1 %v8795_v16 }
 0x158   : > { %842 = vmatmul.mubr.bf16.gmra.mxu1 %v8236_v9  ;;  %v8262_v9 = vld [vmem:[%s10149_s3 + $0x70] ss:$8 sps:$4 sm:$0xff]  }
 0x159   : > { %6768 = vmatpush3.bf16.msra.mxu1 %v8804_v14  ;;  %925 = vmatprep.mubr.bf16.mxu1 %v8239_v11  ;;  %v8265_v11 = vld [vmem:[%s10149_s3 + $0x84] ss:$8 sps:$4 sm:$0xff]  }
 0x15a   : > { %6769 = vmatprep.subr.bf16.mxu1 %v8810_v25 }
 0x15d   : > { %6770 = vmatpush3.bf16.msra.mxu1 %v8819_v51 }
 0x15e   : > { %6771 = vmatprep.subr.bf16.mxu1 %v8823_v32 }
 0x161   : > { %6772 = vmatpush3.bf16.msra.mxu1 %v8730_v56 }
 0x162   : > { %6773 = vmatprep.subr.bf16.mxu1 %v8833_v43 }
 0x165   : > { %6774 = vmatpush3.bf16.msra.mxu1 %v8839_v1 }
 0x166   : > { %6775 = vmatprep.subr.bf16.mxu1 %v8841_v54 }
 0x169   : > { %6776 = vmatpush3.bf16.msra.mxu1 %v8723_v46 }
 0x16a   : > { %6777 = vmatprep.subr.bf16.mxu1 %v8845_v61 }
 0x16d   : > { %6778 = vmatpush3.bf16.msra.mxu1 %v8849_v63 }
 0x16e   : > { %7571 = vmatprep.subr.bf16.mxu1 %v8243_v6 }
 0x170   : > { %926 = vmatmul.mubr.bf16.vlgmr.msra.gmra.mxu1 %v8237_v12  ;;  %v8288_v12 = vld [vmem:[%s10150_s4 + $0xb0] sm:$0xff]  }
 0x171   : > { %933 = vmatprep.mubr.bf16.mxu1 %v8240_v13  ;;  %7572 = vmatpush3.bf16.msra.mxu1 %v8243_v6  ;;  %v8287_v6 = vld [vmem:[%s10150_s4 + $0xb8] sm:$0xff]   ;;  %v8289_v13 = vld [vmem:[%s10150_s4 + $0xa8] sm:$0xff]  }
 0x172   : > { %7573 = vmatprep.subr.bf16.mxu1 %v8244_v15 }
 0x175   : > { %7574 = vmatpush3.bf16.msra.mxu1 %v8244_v15  ;;  %v8263_v15 = vld [vmem:[%s10149_s3 + $0x80] ss:$8 sps:$4 sm:$0xff]  }
 0x176   : > { %7575 = vmatprep.subr.bf16.mxu1 %v8245_v57 }
 0x178   : > { %934 = vmatmul.mubr.bf16.gmra.mxu1 %v8242_v17  ;;  %v8290_v17 = vld [vmem:[%s10150_s4 + $0xa0] sm:$0xff]  }
 0x179   : > { %7576 = vmatpush3.bf16.msra.mxu1 %v8245_v57  ;;  %v8266_v57 = vld [vmem:[%s10149_s3 + $0x94] ss:$8 sps:$4 sm:$0xff]  }
 0x17a   : > { %7577 = vmatprep.subr.bf16.mxu1 %v8246_v18 }
 0x17d   : > { %7578 = vmatpush3.bf16.msra.mxu1 %v8246_v18  ;;  %v8294_v18 = vld [vmem:[%s10150_s4 + $0x98] sm:$0xff]  }
 0x17e   : > { %7579 = vmatprep.subr.bf16.mxu1 %v8247_v4 }
 0x181   : > { %7580 = vmatpush3.bf16.msra.mxu1 %v8247_v4  ;;  %v8268_v4 = vld [vmem:[%s10149_s3 + $0x90] ss:$8 sps:$4 sm:$0xff]  }
 0x182   : > { %7581 = vmatprep.subr.bf16.mxu1 %v8248_v19 }
 0x185   : > { %7582 = vmatpush3.bf16.msra.mxu1 %v8248_v19  ;;  %v8271_v19 = vld [vmem:[%s10149_s3 + $0xa4] ss:$8 sps:$4 sm:$0xff]  }
 0x186   : > { %7583 = vmatprep.subr.bf16.mxu1 %v8249_v20 }
 0x189   : > { %7584 = vmatpush3.bf16.msra.mxu1 %v8249_v20  ;;  %v8295_v20 = vld [vmem:[%s10150_s4 + $0x90] sm:$0xff]  }
 0x18a   : > { %7585 = vmatprep.subr.bf16.mxu1 %v8250_v21 }
 0x18d   : > { %7586 = vmatpush3.bf16.msra.mxu1 %v8250_v21  ;;  %v8299_v21 = vld [vmem:[%s10150_s4 + $0x88] sm:$0xff]  }
 0x18e   : > { %7591 = vmatprep.subr.bf16.mxu1 %v8287_v6 }
 0x210   : > { %v6751_v23 = vpop.f32.mrf.mxu1 }
 0x212   : > { %v6752_v7 = vpop.f32.mrf.mxu1 }
 0x213   : > { %v6753_v26 = vadd.f32 %v6752_v7, %v6751_v23  ;;  %v8300_v23 = vld [vmem:[%s10150_s4 + $0x80] sm:$0xff]   ;;  %v9036_v7 = vld [vmem:[%s10150_s4 + $0xf8] sm:$0xff]  }
 0x214   : > { %v6754_v24 = vpop.f32.mrf.mxu1 }
 0x216   : > { %v6755_v22 = vpop.f32.mrf.mxu1 }
 0x217   : > { %v6756_v27 = vadd.f32 %v6755_v22, %v6754_v24  ;;  %v8269_v24 = vld [vmem:[%s10149_s3 + $0xa0] ss:$8 sps:$4 sm:$0xff]   ;;  %v8272_v22 = vld [vmem:[%s10149_s3 + $0xb4] ss:$8 sps:$4 sm:$0xff]  }
 0x218   : > { %v6757_v28 = vpop.f32.mrf.mxu1 }
 0x219   : > { %v850_v5 = vpack.c.bf16 %v6756_v27, %v6753_v26  ;;  %v8274_v26 = vld [vmem:[%s10149_s3 + $0xb0] ss:$8 sps:$4 sm:$0xff]   ;;  %v8277_v27 = vld [vmem:[%s10149_s3 + $0xc4] ss:$8 sps:$4 sm:$0xff]  }
 0x21a   : > { %v6758_v29 = vpop.f32.mrf.mxu1 }
 0x21b   : > { %7587 = vmatprep.mubr.bf16.mxu1 %v850_v5  ;;  %v6759_v31 = vadd.f32 %v6758_v29, %v6757_v28  ;;  %v8275_v28 = vld [vmem:[%s10149_s3 + $0xc0] ss:$8 sps:$4 sm:$0xff]   ;;  %v8278_v5 = vld [vmem:[%s10149_s3 + $0xd4] ss:$8 sps:$4 sm:$0xff]   ;;  %v8280_v29 = vld [vmem:[%s10149_s3 + $0xd0] ss:$8 sps:$4 sm:$0xff]  }
 0x21c   : > { %v6760_v30 = vpop.f32.mrf.mxu1 }
 0x21e   : > { %v6761_v2 = vpop.f32.mrf.mxu1 }
 0x21f   : > { %v6762_v34 = vadd.f32 %v6761_v2, %v6760_v30  ;;  %v8283_v30 = vld [vmem:[%s10149_s3 + $0xe4] ss:$8 sps:$4 sm:$0xff]   ;;  %v8281_v2 = vld [vmem:[%s10149_s3 + $0xe0] ss:$8 sps:$4 sm:$0xff]  }
 0x221   : > { %v851_v47 = vpack.c.bf16 %v6762_v34, %v6759_v31  ;;  %v8284_v34 = vld [vmem:[%s10149_s3 + $0xf4] ss:$8 sps:$4 sm:$0xff]  }
 0x223   : > { %7588 = vmatmul.mubr.bf16.vlgmr.msra.gmra.mxu1 %v851_v47 }
 0x224   : > { %7592 = vmatpush3.bf16.msra.mxu1 %v8287_v6 }
 0x225   : > { %7593 = vmatprep.subr.bf16.mxu1 %v8288_v12 }
 0x228   : > { %7594 = vmatpush3.bf16.msra.mxu1 %v8288_v12 }
 0x229   : > { %7595 = vmatprep.subr.bf16.mxu1 %v8289_v13 }
 0x22c   : > { %7596 = vmatpush3.bf16.msra.mxu1 %v8289_v13 }
 0x22d   : > { %7597 = vmatprep.subr.bf16.mxu1 %v8290_v17 }
 0x230   : > { %v6779_v35 = vpop.f32.mrf.mxu1  ;;  %7598 = vmatpush3.bf16.msra.mxu1 %v8290_v17  ;;  %v8302_v17 = vld [vmem:[%s10150_s4 + $0xf0] sm:$0xff]  }
 0x231   : > { %7599 = vmatprep.subr.bf16.mxu1 %v8294_v18 }
 0x232   : > { %v6780_v37 = vpop.f32.mrf.mxu1 }
 0x233   : > { %v6781_v39 = vadd.f32 %v6780_v37, %v6779_v35 }
 0x234   : > { %v6782_v0 = vpop.f32.mrf.mxu1  ;;  %7600 = vmatpush3.bf16.msra.mxu1 %v8294_v18  ;;  %v8303_v18 = vld [vmem:[%s10150_s4 + $0xe8] sm:$0xff]  }
 0x235   : > { %7601 = vmatprep.subr.bf16.mxu1 %v8295_v20 }
 0x236   : > { %v6783_v38 = vpop.f32.mrf.mxu1 }
 0x237   : > { %v6784_v41 = vadd.f32 %v6783_v38, %v6782_v0 }
 0x238   : > { %v6785_v42 = vpop.f32.mrf.mxu1  ;;  %7602 = vmatpush3.bf16.msra.mxu1 %v8295_v20  ;;  %v8308_v20 = vld [vmem:[%s10150_s4 + $0xd8] sm:$0xff]  }
 0x239   : > { %v942_v3 = vpack.c.bf16 %v6784_v41, %v6781_v39  ;;  %7603 = vmatprep.subr.bf16.mxu1 %v8299_v21 }
 0x23a   : > { %v6786_v44 = vpop.f32.mrf.mxu1 }
 0x23b   : > { %7567 = vmatprep.mubr.bf16.mxu0 %v942_v3  ;;  %v6787_v52 = vadd.f32 %v6786_v44, %v6785_v42  ;;  %v8286_v42 = vld [vmem:[%s10149_s3 + $0xf0] ss:$8 sps:$4 sm:$0xff]   ;;  %v8293_v44 = vld [vmem:[%s10149_s3 + $0x104] ss:$8 sps:$4 sm:$0xff]  }
 0x23c   : > { %v6788_v45 = vpop.f32.mrf.mxu1  ;;  %7604 = vmatpush3.bf16.msra.mxu1 %v8299_v21  ;;  %v8310_v21 = vld [vmem:[%s10149_s3 + $0x134] ss:$8 sps:$4 sm:$0xff]  }
 0x23d   : > { %7605 = vmatprep.subr.bf16.mxu1 %v8300_v23 }
 0x23e   : > { %v6789_v50 = vpop.f32.mrf.mxu1 }
 0x23f   : > { %v6790_v53 = vadd.f32 %v6789_v50, %v6788_v45  ;;  %v8291_v45 = vld [vmem:[%s10149_s3 + $0x100] ss:$8 sps:$4 sm:$0xff]   ;;  %v8296_v50 = vld [vmem:[%s10149_s3 + $0x114] ss:$8 sps:$4 sm:$0xff]  }
 0x240   : > { %7606 = vmatpush3.bf16.msra.mxu1 %v8300_v23 }
 0x241   : > { %v943_v55 = vpack.c.bf16 %v6790_v53, %v6787_v52  ;;  %7611 = vmatprep.subr.bf16.mxu1 %v9036_v7 }
 0x243   : > { %7568 = vmatmul.mubr.bf16.vlgmr.msra.gmra.mxu0 %v943_v55 }
 0x244   : > { %6812 = vmatpush3.bf16.msra.mxu0 %v8769_v48  ;;  %1212 = vmatprep.mubr.bf16.mxu0 %v8253_v40 }
 0x245   : > { %6813 = vmatprep.subr.bf16.mxu0 %v8777_v60 }
 0x248   : > { %6814 = vmatpush3.bf16.msra.mxu0 %v8789_v10 }
 0x249   : > { %6815 = vmatprep.subr.bf16.mxu0 %v8795_v16 }
 0x24c   : > { %6816 = vmatpush3.bf16.msra.mxu0 %v8804_v14 }
 0x24d   : > { %6817 = vmatprep.subr.bf16.mxu0 %v8810_v25 }
 0x250   : > { %6818 = vmatpush3.bf16.msra.mxu0 %v8819_v51 }
 0x251   : > { %6819 = vmatprep.subr.bf16.mxu0 %v8823_v32 }
 0x254   : > { %6820 = vmatpush3.bf16.msra.mxu0 %v8730_v56 }
 0x255   : > { %6821 = vmatprep.subr.bf16.mxu0 %v8833_v43 }
 0x258   : > { %6822 = vmatpush3.bf16.msra.mxu0 %v8839_v1 }
 0x259   : > { %6823 = vmatprep.subr.bf16.mxu0 %v8841_v54 }
 0x25c   : > { %6824 = vmatpush3.bf16.msra.mxu0 %v8723_v46 }
 0x25d   : > { %6825 = vmatprep.subr.bf16.mxu0 %v8845_v61 }
 0x260   : > { %6826 = vmatpush3.bf16.msra.mxu0 %v8849_v63 }
 0x261   : > { %6849 = vmatprep.subr.bf16.mxu0 %v8771_v49 }
 0x263   : > { %1213 = vmatmul.mubr.bf16.vlgmr.msra.gmra.mxu0 %v8251_v58  ;;  %v8298_v58 = vld [vmem:[%s10149_s3 + $0x110] ss:$8 sps:$4 sm:$0xff]  }
 0x264   : > { %6850 = vmatpush3.bf16.msra.mxu0 %v8769_v48  ;;  %1220 = vmatprep.mubr.bf16.mxu0 %v8254_v33  ;;  %v8307_v33 = vld [vmem:[%s10149_s3 + $0x124] ss:$8 sps:$4 sm:$0xff]  }
 0x265   : > { %6851 = vmatprep.subr.bf16.mxu0 %v8777_v60 }
 0x268   : > { %6852 = vmatpush3.bf16.msra.mxu0 %v8789_v10 }
 0x269   : > { %6853 = vmatprep.subr.bf16.mxu0 %v8795_v16 }
 0x26b   : > { %1221 = vmatmul.mubr.bf16.gmra.mxu0 %v8256_v36 }
 0x26c   : > { %6854 = vmatpush3.bf16.msra.mxu0 %v8804_v14  ;;  %1406 = vmatprep.mubr.bf16.mxu0 %v8259_v62 }
 0x26d   : > { %6855 = vmatprep.subr.bf16.mxu0 %v8810_v25 }
 0x270   : > { %6856 = vmatpush3.bf16.msra.mxu0 %v8819_v51 }
 0x271   : > { %6857 = vmatprep.subr.bf16.mxu0 %v8823_v32 }
 0x274   : > { %6858 = vmatpush3.bf16.msra.mxu0 %v8730_v56 }
 0x275   : > { %6859 = vmatprep.subr.bf16.mxu0 %v8833_v43 }
 0x278   : > { %6860 = vmatpush3.bf16.msra.mxu0 %v8839_v1 }
 0x279   : > { %6861 = vmatprep.subr.bf16.mxu0 %v8841_v54 }
 0x27c   : > { %6862 = vmatpush3.bf16.msra.mxu0 %v8723_v46 }
 0x27d   : > { %6863 = vmatprep.subr.bf16.mxu0 %v8845_v61 }
 0x280   : > { %6864 = vmatpush3.bf16.msra.mxu0 %v8849_v63 }
 0x281   : > { %6887 = vmatprep.subr.bf16.mxu0 %v8771_v49 }
 0x283   : > { %1407 = vmatmul.mubr.bf16.vlgmr.msra.gmra.mxu0 %v8257_v8 }
 0x284   : > { %6888 = vmatpush3.bf16.msra.mxu0 %v8769_v48  ;;  %1414 = vmatprep.mubr.bf16.mxu0 %v8260_v59 }
 0x285   : > { %6889 = vmatprep.subr.bf16.mxu0 %v8777_v60 }
 0x288   : > { %6890 = vmatpush3.bf16.msra.mxu0 %v8789_v10 }
 0x289   : > { %6891 = vmatprep.subr.bf16.mxu0 %v8795_v16 }
 0x28b   : > { %1415 = vmatmul.mubr.bf16.gmra.mxu0 %v8262_v9 }
 0x28c   : > { %6892 = vmatpush3.bf16.msra.mxu0 %v8804_v14  ;;  %1600 = vmatprep.mubr.bf16.mxu0 %v8265_v11 }
 0x28d   : > { %6893 = vmatprep.subr.bf16.mxu0 %v8810_v25 }
 0x290   : > { %6894 = vmatpush3.bf16.msra.mxu0 %v8819_v51 }
 0x291   : > { %6895 = vmatprep.subr.bf16.mxu0 %v8823_v32 }
 0x294   : > { %6896 = vmatpush3.bf16.msra.mxu0 %v8730_v56 }
 0x295   : > { %6897 = vmatprep.subr.bf16.mxu0 %v8833_v43 }
 0x298   : > { %6898 = vmatpush3.bf16.msra.mxu0 %v8839_v1 }
 0x299   : > { %6899 = vmatprep.subr.bf16.mxu0 %v8841_v54 }
 0x29c   : > { %6900 = vmatpush3.bf16.msra.mxu0 %v8723_v46 }
 0x29d   : > { %6901 = vmatprep.subr.bf16.mxu0 %v8845_v61 }
 0x2a0   : > { %6902 = vmatpush3.bf16.msra.mxu0 %v8849_v63 }
 0x2a1   : > { %6925 = vmatprep.subr.bf16.mxu0 %v8771_v49 }
 0x2a3   : > { %1601 = vmatmul.mubr.bf16.vlgmr.msra.gmra.mxu0 %v8263_v15 }
 0x2a4   : > { %6926 = vmatpush3.bf16.msra.mxu0 %v8769_v48  ;;  %1608 = vmatprep.mubr.bf16.mxu0 %v8266_v57 }
 0x2a5   : > { %6927 = vmatprep.subr.bf16.mxu0 %v8777_v60 }
 0x2a8   : > { %6928 = vmatpush3.bf16.msra.mxu0 %v8789_v10 }
 0x2a9   : > { %6929 = vmatprep.subr.bf16.mxu0 %v8795_v16 }
 0x2ab   : > { %1609 = vmatmul.mubr.bf16.gmra.mxu0 %v8268_v4  ;;  %v8304_v4 = vld [vmem:[%s10150_s4 + $0xe0] sm:$0xff]  }
 0x2ac   : > { %6930 = vmatpush3.bf16.msra.mxu0 %v8804_v14  ;;  %1794 = vmatprep.mubr.bf16.mxu0 %v8271_v19  ;;  %v8305_v19 = vld [vmem:[%s10149_s3 + $0x120] ss:$8 sps:$4 sm:$0xff]  }
 0x2ad   : > { %6931 = vmatprep.subr.bf16.mxu0 %v8810_v25 }
 0x2b0   : > { %6932 = vmatpush3.bf16.msra.mxu0 %v8819_v51 }
 0x2b1   : > { %6933 = vmatprep.subr.bf16.mxu0 %v8823_v32 }
 0x2b4   : > { %6934 = vmatpush3.bf16.msra.mxu0 %v8730_v56 }
 0x2b5   : > { %6935 = vmatprep.subr.bf16.mxu0 %v8833_v43 }
 0x2b8   : > { %6936 = vmatpush3.bf16.msra.mxu0 %v8839_v1 }
 0x2b9   : > { %6937 = vmatprep.subr.bf16.mxu0 %v8841_v54 }
 0x2bc   : > { %6938 = vmatpush3.bf16.msra.mxu0 %v8723_v46 }
 0x2bd   : > { %6939 = vmatprep.subr.bf16.mxu0 %v8845_v61 }
 0x2c0   : > { %6940 = vmatpush3.bf16.msra.mxu0 %v8849_v63 }
 0x2c1   : > { %6963 = vmatprep.subr.bf16.mxu0 %v8771_v49 }
 0x2c3   : > { %1795 = vmatmul.mubr.bf16.vlgmr.msra.gmra.mxu0 %v8269_v24 }
 0x2c4   : > { %6964 = vmatpush3.bf16.msra.mxu0 %v8769_v48  ;;  %1802 = vmatprep.mubr.bf16.mxu0 %v8272_v22 }
 0x2c5   : > { %6965 = vmatprep.subr.bf16.mxu0 %v8777_v60 }
 0x2c8   : > { %6966 = vmatpush3.bf16.msra.mxu0 %v8789_v10 }
 0x2c9   : > { %6967 = vmatprep.subr.bf16.mxu0 %v8795_v16 }
 0x2cb   : > { %1803 = vmatmul.mubr.bf16.gmra.mxu0 %v8274_v26  ;;  %v8312_v26 = vld [vmem:[%s10149_s3 + $0x130] ss:$8 sps:$4 sm:$0xff]  }
 0x2cc   : > { %6968 = vmatpush3.bf16.msra.mxu0 %v8804_v14  ;;  %1988 = vmatprep.mubr.bf16.mxu0 %v8277_v27  ;;  %v8313_v27 = vld [vmem:[%s10150_s4 + $0xc8] sm:$0xff]  }
 0x2cd   : > { %6969 = vmatprep.subr.bf16.mxu0 %v8810_v25 }
 0x2d0   : > { %6970 = vmatpush3.bf16.msra.mxu0 %v8819_v51 }
 0x2d1   : > { %6971 = vmatprep.subr.bf16.mxu0 %v8823_v32 }
 0x2d4   : > { %6972 = vmatpush3.bf16.msra.mxu0 %v8730_v56 }
 0x2d5   : > { %6973 = vmatprep.subr.bf16.mxu0 %v8833_v43 }
 0x2d8   : > { %6974 = vmatpush3.bf16.msra.mxu0 %v8839_v1 }
 0x2d9   : > { %6975 = vmatprep.subr.bf16.mxu0 %v8841_v54 }
 0x2dc   : > { %6976 = vmatpush3.bf16.msra.mxu0 %v8723_v46 }
 0x2dd   : > { %6977 = vmatprep.subr.bf16.mxu0 %v8845_v61 }
 0x2e0   : > { %6978 = vmatpush3.bf16.msra.mxu0 %v8849_v63 }
 0x2e1   : > { %7001 = vmatprep.subr.bf16.mxu0 %v8771_v49 }
 0x2e3   : > { %1989 = vmatmul.mubr.bf16.vlgmr.msra.gmra.mxu0 %v8275_v28  ;;  %v7589_v31 = vpop.f32.mrf.mxu1 }
 0x2e4   : > { %7002 = vmatpush3.bf16.msra.mxu0 %v8769_v48  ;;  %1996 = vmatprep.mubr.bf16.mxu0 %v8278_v5  ;;  %v8321_v5 = vld [vmem:[%s10149_s3 + $0x144] ss:$8 sps:$4 sm:$0xff]  }
 0x2e5   : > { %7003 = vmatprep.subr.bf16.mxu0 %v8777_v60  ;;  %v1140_v47 = vpop.f32.mrf.mxu1 }
 0x2e7   : > { %v7590_v39 = vpop.f32.mrf.mxu1 }
 0x2e8   : > { %7004 = vmatpush3.bf16.msra.mxu0 %v8789_v10 }
 0x2e9   : > { %7005 = vmatprep.subr.bf16.mxu0 %v8795_v16 }
 0x2eb   : > { %1997 = vmatmul.mubr.bf16.gmra.mxu0 %v8280_v29 }
 0x2ec   : > { %7006 = vmatpush3.bf16.msra.mxu0 %v8804_v14  ;;  %2182 = vmatprep.mubr.bf16.mxu0 %v8283_v30 }
 0x2ed   : > { %7007 = vmatprep.subr.bf16.mxu0 %v8810_v25 }
 0x2f0   : > { %7008 = vmatpush3.bf16.msra.mxu0 %v8819_v51 }
 0x2f1   : > { %7009 = vmatprep.subr.bf16.mxu0 %v8823_v32 }
 0x2f4   : > { %7010 = vmatpush3.bf16.msra.mxu0 %v8730_v56 }
 0x2f5   : > { %7011 = vmatprep.subr.bf16.mxu0 %v8833_v43 }
 0x2f8   : > { %7012 = vmatpush3.bf16.msra.mxu0 %v8839_v1 }
 0x2f9   : > { %7013 = vmatprep.subr.bf16.mxu0 %v8841_v54 }
 0x2fc   : > { %7014 = vmatpush3.bf16.msra.mxu0 %v8723_v46 }
 0x2fd   : > { %7015 = vmatprep.subr.bf16.mxu0 %v8845_v61 }
 0x300   : > { %7016 = vmatpush3.bf16.msra.mxu0 %v8849_v63 }
 0x301   : > { %7039 = vmatprep.subr.bf16.mxu0 %v8771_v49 }
 0x303   : > { %2183 = vmatmul.mubr.bf16.vlgmr.msra.gmra.mxu0 %v8281_v2  ;;  %v7569_v35 = vpop.f32.mrf.mxu0 }
 0x304   : > { %v9108_v37 = vadd.f32 %v7589_v31, %v7569_v35  ;;  %7040 = vmatpush3.bf16.msra.mxu0 %v8769_v48  ;;  %2190 = vmatprep.mubr.bf16.mxu0 %v8284_v34  ;;  %v8314_v34 = vld [vmem:[%s10150_s4 + $0xc0] sm:$0xff]  }
 0x305   : > { %7041 = vmatprep.subr.bf16.mxu0 %v8777_v60  ;;  %v1043_v0 = vpop.f32.mrf.mxu0 }
 0x306   : > { %v9112_v38 = vadd.f32 %v1140_v47, %v1043_v0  ;;  %v8315_v0 = vld [vmem:[%s10150_s4 + $0x138] sm:$0xff]  }
 0x307   : > { %v7570_v41 = vpop.f32.mrf.mxu0 }
 0x308   : > { %v9117_v3 = vadd.f32 %v7590_v39, %v7570_v41  ;;  %7042 = vmatpush3.bf16.msra.mxu0 %v8789_v10 }
 0x309   : > { %7043 = vmatprep.subr.bf16.mxu0 %v8795_v16  ;;  %v9141_v52 = vpop.f32.mrf.mxu0 }
 0x30b   : > { %2191 = vmatmul.mubr.bf16.gmra.mxu0 %v8286_v42 }
 0x30c   : > { %7044 = vmatpush3.bf16.msra.mxu0 %v8804_v14  ;;  %2376 = vmatprep.mubr.bf16.mxu0 %v8293_v44 }
 0x30d   : > { %7045 = vmatprep.subr.bf16.mxu0 %v8810_v25 }
 0x310   : > { %7046 = vmatpush3.bf16.msra.mxu0 %v8819_v51 }
 0x311   : > { %7047 = vmatprep.subr.bf16.mxu0 %v8823_v32 }
 0x314   : > { %7048 = vmatpush3.bf16.msra.mxu0 %v8730_v56 }
 0x315   : > { %7049 = vmatprep.subr.bf16.mxu0 %v8833_v43 }
 0x318   : > { %7050 = vmatpush3.bf16.msra.mxu0 %v8839_v1 }
 0x319   : > { %7051 = vmatprep.subr.bf16.mxu0 %v8841_v54 }
 0x31c   : > { %7052 = vmatpush3.bf16.msra.mxu0 %v8723_v46 }
 0x31d   : > { %7053 = vmatprep.subr.bf16.mxu0 %v8845_v61 }
 0x320   : > { %7054 = vmatpush3.bf16.msra.mxu0 %v8849_v63 }
 0x321   : > { %7077 = vmatprep.subr.bf16.mxu0 %v8771_v49 }
 0x323   : > { %v6827_v53 = vpop.f32.mrf.mxu0  ;;  %2377 = vmatmul.mubr.bf16.vlgmr.msra.gmra.mxu0 %v8291_v45  ;;  %v8316_v45 = vld [vmem:[%s10150_s4 + $0x130] sm:$0xff]  }
 0x324   : > { %7078 = vmatpush3.bf16.msra.mxu0 %v8769_v48  ;;  %2384 = vmatprep.mubr.bf16.mxu0 %v8296_v50  ;;  %v8317_v50 = vld [vmem:[%s10150_s4 + $0x128] sm:$0xff]  }
 0x325   : > { %v6828_v40 = vpop.f32.mrf.mxu0  ;;  %7079 = vmatprep.subr.bf16.mxu0 %v8777_v60 }
 0x326   : > { %v6829_v62 = vadd.f32 %v6828_v40, %v6827_v53  ;;  %v8318_v53 = vld [vmem:[%s10150_s4 + $0x120] sm:$0xff]  }
 0x327   : > { %v6830_v55 = vpop.f32.mrf.mxu0  ;;  %v8319_v40 = vld [vmem:[%s10149_s3 + $0x140] ss:$8 sps:$4 sm:$0xff]  }
 0x328   : > { %7080 = vmatpush3.bf16.msra.mxu0 %v8789_v10 }
 0x329   : > { %v6831_v36 = vpop.f32.mrf.mxu0  ;;  %7081 = vmatprep.subr.bf16.mxu0 %v8795_v16 }
 0x32a   : > { %v6832_v8 = vadd.f32 %v6831_v36, %v6830_v55  ;;  %v8322_v55 = vld [vmem:[%s10150_s4 + $0x118] sm:$0xff]   ;;  %v8323_v36 = vld [vmem:[%s10150_s4 + $0x110] sm:$0xff]  }
 0x32b   : > { %v6833_v59 = vpop.f32.mrf.mxu0  ;;  %2385 = vmatmul.mubr.bf16.gmra.mxu0 %v8298_v58  ;;  %v8324_v58 = vld [vmem:[%s10149_s3 + $0x154] ss:$8 sps:$4 sm:$0xff]  }
 0x32c   : > { %v1229_v9 = vpack.c.bf16 %v6832_v8, %v6829_v62  ;;  %7082 = vmatpush3.bf16.msra.mxu0 %v8804_v14  ;;  %2570 = vmatprep.mubr.bf16.mxu0 %v8307_v33 }
 0x32d   : > { %v6834_v11 = vpop.f32.mrf.mxu0  ;;  %7083 = vmatprep.subr.bf16.mxu0 %v8810_v25 }
 0x32e   : > { %7607 = vmatprep.mubr.bf16.mxu1 %v1229_v9  ;;  %v6835_v13 = vadd.f32 %v6834_v11, %v6833_v59  ;;  %v8326_v59 = vld [vmem:[%s10149_s3 + $0x150] ss:$8 sps:$4 sm:$0xff]   ;;  %v8327_v9 = vld [vmem:[%s10150_s4 + $0x108] sm:$0xff]  }
 0x32f   : > { %v6836_v6 = vpop.f32.mrf.mxu0 }
 0x330   : > { %7084 = vmatpush3.bf16.msra.mxu0 %v8819_v51 }
 0x331   : > { %v6837_v12 = vpop.f32.mrf.mxu0  ;;  %7085 = vmatprep.subr.bf16.mxu0 %v8823_v32 }
 0x332   : > { %v6838_v15 = vadd.f32 %v6837_v12, %v6836_v6  ;;  %v8335_v6 = vld [vmem:[%s10149_s3 + $0x164] ss:$8 sps:$4 sm:$0xff]  }
 0x334   : > { %v1230_v57 = vpack.c.bf16 %v6838_v15, %v6835_v13  ;;  %7086 = vmatpush3.bf16.msra.mxu0 %v8730_v56 }
 0x335   : > { %7087 = vmatprep.subr.bf16.mxu0 %v8833_v43 }
 0x336   : > { %7608 = vmatmul.mubr.bf16.vlgmr.msra.gmra.mxu1 %v1230_v57 }
 0x337   : > { %7612 = vmatpush3.bf16.msra.mxu1 %v9036_v7  ;;  %v8309_v7 = vld [vmem:[%s10150_s4 + $0xd0] sm:$0xff]  }
 0x338   : > { %7088 = vmatpush3.bf16.msra.mxu0 %v8839_v1  ;;  %7613 = vmatprep.subr.bf16.mxu1 %v8302_v17 }
 0x339   : > { %7089 = vmatprep.subr.bf16.mxu0 %v8841_v54 }
 0x33b   : > { %7614 = vmatpush3.bf16.msra.mxu1 %v8302_v17  ;;  %v8328_v17 = vld [vmem:[%s10150_s4 + $0x100] sm:$0xff]  }
 0x33c   : > { %7090 = vmatpush3.bf16.msra.mxu0 %v8723_v46  ;;  %7615 = vmatprep.subr.bf16.mxu1 %v8303_v18 }
 0x33d   : > { %7091 = vmatprep.subr.bf16.mxu0 %v8845_v61 }
 0x33f   : > { %7616 = vmatpush3.bf16.msra.mxu1 %v8303_v18 }
 0x340   : > { %7092 = vmatpush3.bf16.msra.mxu0 %v8849_v63  ;;  %7617 = vmatprep.subr.bf16.mxu1 %v8304_v4 }
 0x341   : > { %7115 = vmatprep.subr.bf16.mxu0 %v8771_v49 }
 0x343   : > { %v6865_v23 = vpop.f32.mrf.mxu0  ;;  %7618 = vmatpush3.bf16.msra.mxu1 %v8304_v4  ;;  %2571 = vmatmul.mubr.bf16.vlgmr.msra.gmra.mxu0 %v8305_v19  ;;  %v8329_v19 = vld [vmem:[%s10150_s4 + $0x178] sm:$0xff]  }
 0x344   : > { %7116 = vmatpush3.bf16.msra.mxu0 %v8769_v48  ;;  %7619 = vmatprep.subr.bf16.mxu1 %v8308_v20 }
 0x345   : > { %v6866_v24 = vpop.f32.mrf.mxu0  ;;  %7117 = vmatprep.subr.bf16.mxu0 %v8777_v60  ;;  %2578 = vmatprep.mubr.bf16.mxu0 %v8310_v21 }
 0x346   : > { %v6867_v29 = vadd.f32 %v6866_v24, %v6865_v23  ;;  %v8330_v24 = vld [vmem:[%s10150_s4 + $0x170] sm:$0xff]  }
 0x347   : > { %v6868_v22 = vpop.f32.mrf.mxu0  ;;  %7620 = vmatpush3.bf16.msra.mxu1 %v8308_v20 }
 0x348   : > { %7118 = vmatpush3.bf16.msra.mxu0 %v8789_v10  ;;  %7621 = vmatprep.subr.bf16.mxu1 %v8309_v7 }
 0x349   : > { %v6869_v28 = vpop.f32.mrf.mxu0  ;;  %7119 = vmatprep.subr.bf16.mxu0 %v8795_v16 }
 0x34a   : > { %v6870_v30 = vadd.f32 %v6869_v28, %v6868_v22  ;;  %v8331_v22 = vld [vmem:[%s10150_s4 + $0x168] sm:$0xff]   ;;  %v8336_v28 = vld [vmem:[%s10150_s4 + $0x158] sm:$0xff]  }
 0x34b   : > { %v6871_v31 = vpop.f32.mrf.mxu0  ;;  %7622 = vmatpush3.bf16.msra.mxu1 %v8309_v7  ;;  %2579 = vmatmul.mubr.bf16.gmra.mxu0 %v8312_v26  ;;  %v8332_v26 = vld [vmem:[%s10150_s4 + $0x160] sm:$0xff]  }
 0x34c   : > { %v1423_v2 = vpack.c.bf16 %v6870_v30, %v6867_v29  ;;  %7120 = vmatpush3.bf16.msra.mxu0 %v8804_v14  ;;  %7623 = vmatprep.subr.bf16.mxu1 %v8313_v27  ;;  %v8337_v30 = vld [vmem:[%s10150_s4 + $0x150] sm:$0xff]  }
 0x34d   : > { %v6872_v47 = vpop.f32.mrf.mxu0  ;;  %7121 = vmatprep.subr.bf16.mxu0 %v8810_v25  ;;  %2764 = vmatprep.mubr.bf16.mxu0 %v8321_v5  ;;  %v8340_v5 = vld [vmem:[%s10149_s3 + $0x174] ss:$8 sps:$4 sm:$0xff]  }
 0x34e   : > { %7627 = vmatprep.mubr.bf16.mxu1 %v1423_v2  ;;  %v6873_v41 = vadd.f32 %v6872_v47, %v6871_v31  ;;  %v8341_v47 = vld [vmem:[%s10150_s4 + $0x148] sm:$0xff]  }
 0x34f   : > { %v6874_v35 = vpop.f32.mrf.mxu0  ;;  %7624 = vmatpush3.bf16.msra.mxu1 %v8313_v27  ;;  %v8333_v27 = vld [vmem:[%s10149_s3 + $0x160] ss:$8 sps:$4 sm:$0xff]  }
 0x350   : > { %7122 = vmatpush3.bf16.msra.mxu0 %v8819_v51  ;;  %7625 = vmatprep.subr.bf16.mxu1 %v8314_v34 }
 0x351   : > { %v6875_v39 = vpop.f32.mrf.mxu0  ;;  %7123 = vmatprep.subr.bf16.mxu0 %v8823_v32 }
 0x352   : > { %v6876_v42 = vadd.f32 %v6875_v39, %v6874_v35 }
 0x353   : > { %7626 = vmatpush3.bf16.msra.mxu1 %v8314_v34  ;;  %v8338_v34 = vld [vmem:[%s10149_s3 + $0x170] ss:$8 sps:$4 sm:$0xff]  }
 0x354   : > { %v1424_v44 = vpack.c.bf16 %v6876_v42, %v6873_v41  ;;  %7124 = vmatpush3.bf16.msra.mxu0 %v8730_v56  ;;  %7631 = vmatprep.subr.bf16.mxu1 %v8315_v0 }
 0x355   : > { %7125 = vmatprep.subr.bf16.mxu0 %v8833_v43 }
 0x356   : > { %7628 = vmatmul.mubr.bf16.vlgmr.msra.gmra.mxu1 %v1424_v44 }
 0x357   : > { %7632 = vmatpush3.bf16.msra.mxu1 %v8315_v0  ;;  %v8349_v0 = vld [vmem:[%s10149_s3 + $0x184] ss:$8 sps:$4 sm:$0xff]  }
 0x358   : > { %7126 = vmatpush3.bf16.msra.mxu0 %v8839_v1  ;;  %7633 = vmatprep.subr.bf16.mxu1 %v8316_v45 }
 0x359   : > { %7127 = vmatprep.subr.bf16.mxu0 %v8841_v54 }
 0x35b   : > { %7634 = vmatpush3.bf16.msra.mxu1 %v8316_v45  ;;  %v8342_v45 = vld [vmem:[%s10150_s4 + $0x140] sm:$0xff]  }
 0x35c   : > { %7128 = vmatpush3.bf16.msra.mxu0 %v8723_v46  ;;  %7635 = vmatprep.subr.bf16.mxu1 %v8317_v50 }
 0x35d   : > { %7129 = vmatprep.subr.bf16.mxu0 %v8845_v61 }
 0x35f   : > { %7636 = vmatpush3.bf16.msra.mxu1 %v8317_v50 }
 0x360   : > { %7130 = vmatpush3.bf16.msra.mxu0 %v8849_v63  ;;  %7637 = vmatprep.subr.bf16.mxu1 %v8318_v53 }
 0x361   : > { %7153 = vmatprep.subr.bf16.mxu0 %v8771_v49 }
 0x363   : > { %v6903_v33 = vpop.f32.mrf.mxu0  ;;  %7638 = vmatpush3.bf16.msra.mxu1 %v8318_v53  ;;  %2765 = vmatmul.mubr.bf16.vlgmr.msra.gmra.mxu0 %v8319_v40  ;;  %v8343_v40 = vld [vmem:[%s10150_s4 + $0x1b8] sm:$0xff]  }
 0x364   : > { %7154 = vmatpush3.bf16.msra.mxu0 %v8769_v48  ;;  %7639 = vmatprep.subr.bf16.mxu1 %v8322_v55 }
 0x365   : > { %v6904_v62 = vpop.f32.mrf.mxu0  ;;  %7155 = vmatprep.subr.bf16.mxu0 %v8777_v60  ;;  %2772 = vmatprep.mubr.bf16.mxu0 %v8324_v58 }
 0x366   : > { %v6905_v12 = vadd.f32 %v6904_v62, %v6903_v33  ;;  %v8344_v62 = vld [vmem:[%s10150_s4 + $0x1b0] sm:$0xff]  }
 0x367   : > { %v6906_v8 = vpop.f32.mrf.mxu0  ;;  %7640 = vmatpush3.bf16.msra.mxu1 %v8322_v55 }
 0x368   : > { %7156 = vmatpush3.bf16.msra.mxu0 %v8789_v10  ;;  %7641 = vmatprep.subr.bf16.mxu1 %v8323_v36 }
 0x369   : > { %v6907_v11 = vpop.f32.mrf.mxu0  ;;  %7157 = vmatprep.subr.bf16.mxu0 %v8795_v16 }
 0x36a   : > { %v6908_v13 = vadd.f32 %v6907_v11, %v6906_v8  ;;  %v8345_v8 = vld [vmem:[%s10150_s4 + $0x1a8] sm:$0xff]   ;;  %v8350_v11 = vld [vmem:[%s10150_s4 + $0x198] sm:$0xff]  }
 0x36b   : > { %v6909_v15 = vpop.f32.mrf.mxu0  ;;  %7642 = vmatpush3.bf16.msra.mxu1 %v8323_v36  ;;  %2773 = vmatmul.mubr.bf16.gmra.mxu0 %v8326_v59  ;;  %v8346_v59 = vld [vmem:[%s10150_s4 + $0x1a0] sm:$0xff]  }
 0x36c   : > { %v1617_v57 = vpack.c.bf16 %v6908_v13, %v6905_v12  ;;  %7158 = vmatpush3.bf16.msra.mxu0 %v8804_v14  ;;  %7643 = vmatprep.subr.bf16.mxu1 %v8327_v9  ;;  %v8351_v13 = vld [vmem:[%s10150_s4 + $0x190] sm:$0xff]  }
 0x36d   : > { %v6910_v18 = vpop.f32.mrf.mxu0  ;;  %7159 = vmatprep.subr.bf16.mxu0 %v8810_v25  ;;  %2958 = vmatprep.mubr.bf16.mxu0 %v8335_v6  ;;  %v8354_v6 = vld [vmem:[%s10149_s3 + $0x194] ss:$8 sps:$4 sm:$0xff]  }
 0x36e   : > { %7647 = vmatprep.mubr.bf16.mxu1 %v1617_v57  ;;  %v6911_v21 = vadd.f32 %v6910_v18, %v6909_v15  ;;  %v8355_v18 = vld [vmem:[%s10150_s4 + $0x188] sm:$0xff]  }
 0x36f   : > { %v6912_v4 = vpop.f32.mrf.mxu0  ;;  %7644 = vmatpush3.bf16.msra.mxu1 %v8327_v9  ;;  %v8347_v9 = vld [vmem:[%s10149_s3 + $0x180] ss:$8 sps:$4 sm:$0xff]  }
 0x370   : > { %7160 = vmatpush3.bf16.msra.mxu0 %v8819_v51  ;;  %7645 = vmatprep.subr.bf16.mxu1 %v8328_v17 }
 0x371   : > { %v6913_v20 = vpop.f32.mrf.mxu0  ;;  %7161 = vmatprep.subr.bf16.mxu0 %v8823_v32 }
 0x372   : > { %v6914_v23 = vadd.f32 %v6913_v20, %v6912_v4 }
 0x373   : > { %7646 = vmatpush3.bf16.msra.mxu1 %v8328_v17  ;;  %v8352_v17 = vld [vmem:[%s10149_s3 + $0x190] ss:$8 sps:$4 sm:$0xff]  }
 0x374   : > { %v1618_v7 = vpack.c.bf16 %v6914_v23, %v6911_v21  ;;  %7162 = vmatpush3.bf16.msra.mxu0 %v8730_v56  ;;  %7651 = vmatprep.subr.bf16.mxu1 %v8329_v19 }
 0x375   : > { %7163 = vmatprep.subr.bf16.mxu0 %v8833_v43 }
 0x376   : > { %7648 = vmatmul.mubr.bf16.vlgmr.msra.gmra.mxu1 %v1618_v7 }
 0x377   : > { %7652 = vmatpush3.bf16.msra.mxu1 %v8329_v19  ;;  %v8363_v19 = vld [vmem:[%s10149_s3 + $0x1a4] ss:$8 sps:$4 sm:$0xff]  }
 0x378   : > { %7164 = vmatpush3.bf16.msra.mxu0 %v8839_v1  ;;  %7653 = vmatprep.subr.bf16.mxu1 %v8330_v24 }
 0x379   : > { %7165 = vmatprep.subr.bf16.mxu0 %v8841_v54 }
 0x37b   : > { %7654 = vmatpush3.bf16.msra.mxu1 %v8330_v24  ;;  %v8356_v24 = vld [vmem:[%s10150_s4 + $0x180] sm:$0xff]  }
 0x37c   : > { %7166 = vmatpush3.bf16.msra.mxu0 %v8723_v46  ;;  %7655 = vmatprep.subr.bf16.mxu1 %v8331_v22 }
 0x37d   : > { %7167 = vmatprep.subr.bf16.mxu0 %v8845_v61 }
 0x37f   : > { %7656 = vmatpush3.bf16.msra.mxu1 %v8331_v22 }
 0x380   : > { %7168 = vmatpush3.bf16.msra.mxu0 %v8849_v63  ;;  %7657 = vmatprep.subr.bf16.mxu1 %v8332_v26 }
 0x381   : > { %7191 = vmatprep.subr.bf16.mxu0 %v8771_v49 }
 0x383   : > { %v6941_v29 = vpop.f32.mrf.mxu0  ;;  %7658 = vmatpush3.bf16.msra.mxu1 %v8332_v26  ;;  %2959 = vmatmul.mubr.bf16.vlgmr.msra.gmra.mxu0 %v8333_v27  ;;  %v8357_v27 = vld [vmem:[%s10150_s4 + $0x1f8] sm:$0xff]  }
 0x384   : > { %7192 = vmatpush3.bf16.msra.mxu0 %v8769_v48  ;;  %7659 = vmatprep.subr.bf16.mxu1 %v8336_v28 }
 0x385   : > { %v6942_v31 = vpop.f32.mrf.mxu0  ;;  %7193 = vmatprep.subr.bf16.mxu0 %v8777_v60  ;;  %2966 = vmatprep.mubr.bf16.mxu0 %v8340_v5 }
 0x386   : > { %v6943_v39 = vadd.f32 %v6942_v31, %v6941_v29  ;;  %v8358_v31 = vld [vmem:[%s10150_s4 + $0x1f0] sm:$0xff]  }
 0x387   : > { %v6944_v2 = vpop.f32.mrf.mxu0  ;;  %7660 = vmatpush3.bf16.msra.mxu1 %v8336_v28 }
 0x388   : > { %7194 = vmatpush3.bf16.msra.mxu0 %v8789_v10  ;;  %7661 = vmatprep.subr.bf16.mxu1 %v8337_v30 }
 0x389   : > { %v6945_v35 = vpop.f32.mrf.mxu0  ;;  %7195 = vmatprep.subr.bf16.mxu0 %v8795_v16 }
 0x38a   : > { %v6946_v41 = vadd.f32 %v6945_v35, %v6944_v2  ;;  %v8359_v2 = vld [vmem:[%s10150_s4 + $0x1e8] sm:$0xff]   ;;  %v8364_v35 = vld [vmem:[%s10150_s4 + $0x1d8] sm:$0xff]  }
 0x38b   : > { %v6947_v42 = vpop.f32.mrf.mxu0  ;;  %7662 = vmatpush3.bf16.msra.mxu1 %v8337_v30  ;;  %2967 = vmatmul.mubr.bf16.gmra.mxu0 %v8338_v34  ;;  %v8360_v34 = vld [vmem:[%s10150_s4 + $0x1e0] sm:$0xff]  }
 0x38c   : > { %v1811_v44 = vpack.c.bf16 %v6946_v41, %v6943_v39  ;;  %7196 = vmatpush3.bf16.msra.mxu0 %v8804_v14  ;;  %7663 = vmatprep.subr.bf16.mxu1 %v8341_v47  ;;  %v8365_v41 = vld [vmem:[%s10150_s4 + $0x1d0] sm:$0xff]  }
 0x38d   : > { %v6948_v50 = vpop.f32.mrf.mxu0  ;;  %7197 = vmatprep.subr.bf16.mxu0 %v8810_v25  ;;  %3152 = vmatprep.mubr.bf16.mxu0 %v8349_v0  ;;  %v8368_v0 = vld [vmem:[%s10149_s3 + $0x1b4] ss:$8 sps:$4 sm:$0xff]  }
 0x38e   : > { %7667 = vmatprep.mubr.bf16.mxu1 %v1811_v44  ;;  %v6949_v58 = vadd.f32 %v6948_v50, %v6947_v42  ;;  %v8369_v50 = vld [vmem:[%s10150_s4 + $0x1c8] sm:$0xff]  }
 0x38f   : > { %v6950_v53 = vpop.f32.mrf.mxu0  ;;  %7664 = vmatpush3.bf16.msra.mxu1 %v8341_v47  ;;  %v8361_v47 = vld [vmem:[%s10149_s3 + $0x1a0] ss:$8 sps:$4 sm:$0xff]  }
 0x390   : > { %7198 = vmatpush3.bf16.msra.mxu0 %v8819_v51  ;;  %7665 = vmatprep.subr.bf16.mxu1 %v8342_v45 }
 0x391   : > { %v6951_v55 = vpop.f32.mrf.mxu0  ;;  %7199 = vmatprep.subr.bf16.mxu0 %v8823_v32 }
 0x392   : > { %v6952_v33 = vadd.f32 %v6951_v55, %v6950_v53 }
 0x393   : > { %7666 = vmatpush3.bf16.msra.mxu1 %v8342_v45  ;;  %v8366_v45 = vld [vmem:[%s10149_s3 + $0x1b0] ss:$8 sps:$4 sm:$0xff]  }
 0x394   : > { %v1812_v36 = vpack.c.bf16 %v6952_v33, %v6949_v58  ;;  %7200 = vmatpush3.bf16.msra.mxu0 %v8730_v56  ;;  %7671 = vmatprep.subr.bf16.mxu1 %v8343_v40 }
 0x395   : > { %7201 = vmatprep.subr.bf16.mxu0 %v8833_v43 }
 0x396   : > { %7668 = vmatmul.mubr.bf16.vlgmr.msra.gmra.mxu1 %v1812_v36 }
 0x397   : > { %7672 = vmatpush3.bf16.msra.mxu1 %v8343_v40  ;;  %v8377_v40 = vld [vmem:[%s10149_s3 + $0x1c4] ss:$8 sps:$4 sm:$0xff]  }
 0x398   : > { %7202 = vmatpush3.bf16.msra.mxu0 %v8839_v1  ;;  %7673 = vmatprep.subr.bf16.mxu1 %v8344_v62 }
 0x399   : > { %7203 = vmatprep.subr.bf16.mxu0 %v8841_v54 }
 0x39b   : > { %7674 = vmatpush3.bf16.msra.mxu1 %v8344_v62  ;;  %v8370_v62 = vld [vmem:[%s10150_s4 + $0x1c0] sm:$0xff]  }
 0x39c   : > { %7204 = vmatpush3.bf16.msra.mxu0 %v8723_v46  ;;  %7675 = vmatprep.subr.bf16.mxu1 %v8345_v8 }
 0x39d   : > { %7205 = vmatprep.subr.bf16.mxu0 %v8845_v61 }
 0x39f   : > { %7676 = vmatpush3.bf16.msra.mxu1 %v8345_v8 }
 0x3a0   : > { %7206 = vmatpush3.bf16.msra.mxu0 %v8849_v63  ;;  %7677 = vmatprep.subr.bf16.mxu1 %v8346_v59 }
 0x3a1   : > { %7229 = vmatprep.subr.bf16.mxu0 %v8771_v49 }
 0x3a3   : > { %v6979_v12 = vpop.f32.mrf.mxu0  ;;  %7678 = vmatpush3.bf16.msra.mxu1 %v8346_v59  ;;  %3153 = vmatmul.mubr.bf16.vlgmr.msra.gmra.mxu0 %v8347_v9  ;;  %v8371_v9 = vld [vmem:[%s10150_s4 + $0x238] sm:$0xff]  }
 0x3a4   : > { %7230 = vmatpush3.bf16.msra.mxu0 %v8769_v48  ;;  %7679 = vmatprep.subr.bf16.mxu1 %v8350_v11 }
 0x3a5   : > { %v6980_v15 = vpop.f32.mrf.mxu0  ;;  %7231 = vmatprep.subr.bf16.mxu0 %v8777_v60  ;;  %3160 = vmatprep.mubr.bf16.mxu0 %v8354_v6 }
 0x3a6   : > { %v6981_v20 = vadd.f32 %v6980_v15, %v6979_v12  ;;  %v8372_v15 = vld [vmem:[%s10150_s4 + $0x230] sm:$0xff]  }
 0x3a7   : > { %v6982_v57 = vpop.f32.mrf.mxu0  ;;  %7680 = vmatpush3.bf16.msra.mxu1 %v8350_v11 }
 0x3a8   : > { %7232 = vmatpush3.bf16.msra.mxu0 %v8789_v10  ;;  %7681 = vmatprep.subr.bf16.mxu1 %v8351_v13 }
 0x3a9   : > { %v6983_v4 = vpop.f32.mrf.mxu0  ;;  %7233 = vmatprep.subr.bf16.mxu0 %v8795_v16 }
 0x3aa   : > { %v6984_v21 = vadd.f32 %v6983_v4, %v6982_v57  ;;  %v8373_v57 = vld [vmem:[%s10150_s4 + $0x228] sm:$0xff]   ;;  %v8378_v4 = vld [vmem:[%s10150_s4 + $0x218] sm:$0xff]  }
 0x3ab   : > { %v6985_v23 = vpop.f32.mrf.mxu0  ;;  %7682 = vmatpush3.bf16.msra.mxu1 %v8351_v13  ;;  %3161 = vmatmul.mubr.bf16.gmra.mxu0 %v8352_v17  ;;  %v8374_v17 = vld [vmem:[%s10150_s4 + $0x220] sm:$0xff]  }
 0x3ac   : > { %v2005_v7 = vpack.c.bf16 %v6984_v21, %v6981_v20  ;;  %7234 = vmatpush3.bf16.msra.mxu0 %v8804_v14  ;;  %7683 = vmatprep.subr.bf16.mxu1 %v8355_v18  ;;  %v8379_v21 = vld [vmem:[%s10150_s4 + $0x210] sm:$0xff]  }
 0x3ad   : > { %v6986_v22 = vpop.f32.mrf.mxu0  ;;  %7235 = vmatprep.subr.bf16.mxu0 %v8810_v25  ;;  %3346 = vmatprep.mubr.bf16.mxu0 %v8363_v19  ;;  %v8382_v19 = vld [vmem:[%s10149_s3 + $0x1d4] ss:$8 sps:$4 sm:$0xff]  }
 0x3ae   : > { %7687 = vmatprep.mubr.bf16.mxu1 %v2005_v7  ;;  %v6987_v5 = vadd.f32 %v6986_v22, %v6985_v23 }
 0x3af   : > { %v6988_v26 = vpop.f32.mrf.mxu0  ;;  %7684 = vmatpush3.bf16.msra.mxu1 %v8355_v18  ;;  %v8375_v18 = vld [vmem:[%s10149_s3 + $0x1c0] ss:$8 sps:$4 sm:$0xff]  }
 0x3b0   : > { %7236 = vmatpush3.bf16.msra.mxu0 %v8819_v51  ;;  %7685 = vmatprep.subr.bf16.mxu1 %v8356_v24 }
 0x3b1   : > { %v6989_v28 = vpop.f32.mrf.mxu0  ;;  %7237 = vmatprep.subr.bf16.mxu0 %v8823_v32 }
 0x3b2   : > { %v6990_v29 = vadd.f32 %v6989_v28, %v6988_v26 }
 0x3b3   : > { %7686 = vmatpush3.bf16.msra.mxu1 %v8356_v24 }
 0x3b4   : > { %v2006_v30 = vpack.c.bf16 %v6990_v29, %v6987_v5  ;;  %7238 = vmatpush3.bf16.msra.mxu0 %v8730_v56  ;;  %7691 = vmatprep.subr.bf16.mxu1 %v8357_v27  ;;  %v8385_v29 = vld [vmem:[%s10150_s4 + $0x278] sm:$0xff]  }
 0x3b5   : > { %7239 = vmatprep.subr.bf16.mxu0 %v8833_v43 }
 0x3b6   : > { %7688 = vmatmul.mubr.bf16.vlgmr.msra.gmra.mxu1 %v2006_v30 }
 0x3b7   : > { %7692 = vmatpush3.bf16.msra.mxu1 %v8357_v27 }
 0x3b8   : > { %7240 = vmatpush3.bf16.msra.mxu0 %v8839_v1  ;;  %7693 = vmatprep.subr.bf16.mxu1 %v8358_v31 }
 0x3b9   : > { %7241 = vmatprep.subr.bf16.mxu0 %v8841_v54 }
 0x3bb   : > { %7694 = vmatpush3.bf16.msra.mxu1 %v8358_v31 }
 0x3bc   : > { %7242 = vmatpush3.bf16.msra.mxu0 %v8723_v46  ;;  %7695 = vmatprep.subr.bf16.mxu1 %v8359_v2 }
 0x3bd   : > { %7243 = vmatprep.subr.bf16.mxu0 %v8845_v61 }
 0x3bf   : > { %7696 = vmatpush3.bf16.msra.mxu1 %v8359_v2  ;;  %v9471_v2 = vpop.f32.mrf.mxu1 }
 0x3c0   : > { %7244 = vmatpush3.bf16.msra.mxu0 %v8849_v63  ;;  %7697 = vmatprep.subr.bf16.mxu1 %v8360_v34 }
 0x3c1   : > { %7267 = vmatprep.subr.bf16.mxu0 %v8771_v49 }
 0x3c3   : > { %v7017_v39 = vpop.f32.mrf.mxu0  ;;  %7698 = vmatpush3.bf16.msra.mxu1 %v8360_v34  ;;  %3347 = vmatmul.mubr.bf16.vlgmr.msra.gmra.mxu0 %v8361_v47 }
 0x3c4   : > { %7268 = vmatpush3.bf16.msra.mxu0 %v8769_v48  ;;  %7699 = vmatprep.subr.bf16.mxu1 %v8364_v35 }
 0x3c5   : > { %v7018_v42 = vpop.f32.mrf.mxu0  ;;  %7269 = vmatprep.subr.bf16.mxu0 %v8777_v60  ;;  %3354 = vmatprep.mubr.bf16.mxu0 %v8368_v0 }
 0x3c6   : > { %v7019_v55 = vadd.f32 %v7018_v42, %v7017_v39  ;;  %v8394_v39 = vld [vmem:[%s10149_s3 + $0x1f0] ss:$8 sps:$4 sm:$0xff]  }
 0x3c7   : > { %v7020_v44 = vpop.f32.mrf.mxu0  ;;  %7700 = vmatpush3.bf16.msra.mxu1 %v8364_v35 }
 0x3c8   : > { %7270 = vmatpush3.bf16.msra.mxu0 %v8789_v10  ;;  %7701 = vmatprep.subr.bf16.mxu1 %v8365_v41 }
 0x3c9   : > { %v7021_v53 = vpop.f32.mrf.mxu0  ;;  %7271 = vmatprep.subr.bf16.mxu0 %v8795_v16 }
 0x3ca   : > { %v7022_v58 = vadd.f32 %v7021_v53, %v7020_v44 }
 0x3cb   : > { %v7023_v33 = vpop.f32.mrf.mxu0  ;;  %7702 = vmatpush3.bf16.msra.mxu1 %v8365_v41  ;;  %3355 = vmatmul.mubr.bf16.gmra.mxu0 %v8366_v45  ;;  %v8397_v41 = vld [vmem:[%s10150_s4 + $0x248] sm:$0xff]  }
 0x3cc   : > { %v2199_v36 = vpack.c.bf16 %v7022_v58, %v7019_v55  ;;  %7272 = vmatpush3.bf16.msra.mxu0 %v8804_v14  ;;  %7703 = vmatprep.subr.bf16.mxu1 %v8369_v50 }
 0x3cd   : > { %v7024_v8 = vpop.f32.mrf.mxu0  ;;  %7273 = vmatprep.subr.bf16.mxu0 %v8810_v25  ;;  %3540 = vmatprep.mubr.bf16.mxu0 %v8377_v40  ;;  %v8398_v40 = vld [vmem:[%s10150_s4 + $0x240] sm:$0xff]  }
 0x3ce   : > { %7707 = vmatprep.mubr.bf16.mxu1 %v2199_v36  ;;  %v7025_v6 = vadd.f32 %v7024_v8, %v7023_v33  ;;  %v8399_v33 = vld [vmem:[%s10150_s4 + $0x2b8] sm:$0xff]  }
 0x3cf   : > { %v7026_v59 = vpop.f32.mrf.mxu0  ;;  %7704 = vmatpush3.bf16.msra.mxu1 %v8369_v50 }
 0x3d0   : > { %7274 = vmatpush3.bf16.msra.mxu0 %v8819_v51  ;;  %7705 = vmatprep.subr.bf16.mxu1 %v8370_v62 }
 0x3d1   : > { %v7027_v11 = vpop.f32.mrf.mxu0  ;;  %7275 = vmatprep.subr.bf16.mxu0 %v8823_v32 }
 0x3d2   : > { %v7028_v12 = vadd.f32 %v7027_v11, %v7026_v59  ;;  %v8400_v11 = vld [vmem:[%s10150_s4 + $0x2b0] sm:$0xff]  }
 0x3d3   : > { %7706 = vmatpush3.bf16.msra.mxu1 %v8370_v62 }
 0x3d4   : > { %v2200_v13 = vpack.c.bf16 %v7028_v12, %v7025_v6  ;;  %7276 = vmatpush3.bf16.msra.mxu0 %v8730_v56  ;;  %7711 = vmatprep.subr.bf16.mxu1 %v8371_v9 }
 0x3d5   : > { %7277 = vmatprep.subr.bf16.mxu0 %v8833_v43 }
 0x3d6   : > { %7708 = vmatmul.mubr.bf16.vlgmr.msra.gmra.mxu1 %v2200_v13 }
 0x3d7   : > { %7712 = vmatpush3.bf16.msra.mxu1 %v8371_v9 }
 0x3d8   : > { %7278 = vmatpush3.bf16.msra.mxu0 %v8839_v1  ;;  %7713 = vmatprep.subr.bf16.mxu1 %v8372_v15 }
 0x3d9   : > { %7279 = vmatprep.subr.bf16.mxu0 %v8841_v54 }
 0x3db   : > { %7714 = vmatpush3.bf16.msra.mxu1 %v8372_v15  ;;  %v8401_v15 = vld [vmem:[%s10150_s4 + $0x2a8] sm:$0xff]  }
 0x3dc   : > { %7280 = vmatpush3.bf16.msra.mxu0 %v8723_v46  ;;  %7715 = vmatprep.subr.bf16.mxu1 %v8373_v57 }
 0x3dd   : > { %7281 = vmatprep.subr.bf16.mxu0 %v8845_v61 }
 0x3df   : > { %7716 = vmatpush3.bf16.msra.mxu1 %v8373_v57  ;;  %v1144_v57 = vadd.f32 %v9471_v2, %v9141_v52  ;;  %v8404_v52 = vld [vmem:[%s10150_s4 + $0x290] sm:$0xff]  }
 0x3e0   : > { %7282 = vmatpush3.bf16.msra.mxu0 %v8849_v63  ;;  %7717 = vmatprep.subr.bf16.mxu1 %v8374_v17 }
 0x3e1   : > { %7305 = vmatprep.subr.bf16.mxu0 %v8771_v49  ;;  %v8380_v49 = vld [vmem:[%s10149_s3 + $0x1d0] ss:$8 sps:$4 sm:$0xff]  }
 0x3e3   : > { %v7055_v20 = vpop.f32.mrf.mxu0  ;;  %7718 = vmatpush3.bf16.msra.mxu1 %v8374_v17  ;;  %3541 = vmatmul.mubr.bf16.vlgmr.msra.gmra.mxu0 %v8375_v18 }
 0x3e4   : > { %7306 = vmatpush3.bf16.msra.mxu0 %v8769_v48  ;;  %7719 = vmatprep.subr.bf16.mxu1 %v8378_v4  ;;  %v8383_v48 = vld [vmem:[%s10150_s4 + $0x208] sm:$0xff]  }
 0x3e5   : > { %v7056_v23 = vpop.f32.mrf.mxu0  ;;  %7307 = vmatprep.subr.bf16.mxu0 %v8777_v60  ;;  %3548 = vmatprep.mubr.bf16.mxu0 %v8382_v19  ;;  %v8391_v60 = vld [vmem:[%s10149_s3 + $0x1e4] ss:$8 sps:$4 sm:$0xff]  }
 0x3e6   : > { %v7057_v22 = vadd.f32 %v7056_v23, %v7055_v20 }
 0x3e7   : > { %v7058_v7 = vpop.f32.mrf.mxu0  ;;  %7720 = vmatpush3.bf16.msra.mxu1 %v8378_v4 }
 0x3e8   : > { %7308 = vmatpush3.bf16.msra.mxu0 %v8789_v10  ;;  %7721 = vmatprep.subr.bf16.mxu1 %v8379_v21  ;;  %v8384_v10 = vld [vmem:[%s10150_s4 + $0x200] sm:$0xff]  }
 0x3e9   : > { %v7059_v24 = vpop.f32.mrf.mxu0  ;;  %7309 = vmatprep.subr.bf16.mxu0 %v8795_v16 }
 0x3ea   : > { %v7060_v26 = vadd.f32 %v7059_v24, %v7058_v7  ;;  %v8403_v7 = vld [vmem:[%s10150_s4 + $0x298] sm:$0xff]  }
 0x3eb   : > { %v7061_v27 = vpop.f32.mrf.mxu0  ;;  %7722 = vmatpush3.bf16.msra.mxu1 %v8379_v21  ;;  %3549 = vmatmul.mubr.bf16.gmra.mxu0 %v8380_v49  ;;  %v8402_v21 = vld [vmem:[%s10150_s4 + $0x2a0] sm:$0xff]  }
 0x3ec   : > { %v2393_v28 = vpack.c.bf16 %v7060_v26, %v7057_v22  ;;  %7310 = vmatpush3.bf16.msra.mxu0 %v8804_v14  ;;  %7723 = vmatprep.subr.bf16.mxu1 %v8383_v48 }
 0x3ed   : > { %v7062_v5 = vpop.f32.mrf.mxu0  ;;  %7311 = vmatprep.subr.bf16.mxu0 %v8810_v25  ;;  %3734 = vmatprep.mubr.bf16.mxu0 %v8391_v60  ;;  %v8405_v60 = vld [vmem:[%s10150_s4 + $0x288] sm:$0xff]  }
 0x3ee   : > { %7727 = vmatprep.mubr.bf16.mxu1 %v2393_v28  ;;  %v7063_v30 = vadd.f32 %v7062_v5, %v7061_v27  ;;  %v8406_v5 = vld [vmem:[%s10150_s4 + $0x280] sm:$0xff]  }
 0x3ef   : > { %v7064_v16 = vpop.f32.mrf.mxu0  ;;  %7724 = vmatpush3.bf16.msra.mxu1 %v8383_v48 }
 0x3f0   : > { %7312 = vmatpush3.bf16.msra.mxu0 %v8819_v51  ;;  %7725 = vmatprep.subr.bf16.mxu1 %v8384_v10  ;;  %v8386_v51 = vld [vmem:[%s10150_s4 + $0x270] sm:$0xff]  }
 0x3f1   : > { %v7065_v14 = vpop.f32.mrf.mxu0  ;;  %7313 = vmatprep.subr.bf16.mxu0 %v8823_v32 }
 0x3f2   : > { %v7066_v31 = vadd.f32 %v7065_v14, %v7064_v16  ;;  %v8407_v14 = vld [vmem:[%s10150_s4 + $0x2f8] sm:$0xff]  }
 0x3f3   : > { %7726 = vmatpush3.bf16.msra.mxu1 %v8384_v10 }
 0x3f4   : > { %v2394_v25 = vpack.c.bf16 %v7066_v31, %v7063_v30  ;;  %7314 = vmatpush3.bf16.msra.mxu0 %v8730_v56  ;;  %7731 = vmatprep.subr.bf16.mxu1 %v8385_v29  ;;  %v8387_v56 = vld [vmem:[%s10150_s4 + $0x268] sm:$0xff]  }
 0x3f5   : > { %7315 = vmatprep.subr.bf16.mxu0 %v8833_v43 }
 0x3f6   : > { %v7609_v34 = vpop.f32.mrf.mxu1  ;;  %7728 = vmatmul.mubr.bf16.vlgmr.msra.gmra.mxu1 %v2394_v25 }
 0x3f7   : > { %v1347_v47 = vadd.f32 %v7609_v34, %v9108_v37  ;;  %7732 = vmatpush3.bf16.msra.mxu1 %v8385_v29  ;;  %v8389_v37 = vld [vmem:[%s10149_s3 + $0x1e0] ss:$8 sps:$4 sm:$0xff]  }
 0x3f8   : > { %v1330_v32 = vpop.f32.mrf.mxu1  ;;  %7316 = vmatpush3.bf16.msra.mxu0 %v8839_v1  ;;  %7733 = vmatprep.subr.bf16.mxu1 %v8386_v51  ;;  %v8388_v1 = vld [vmem:[%s10150_s4 + $0x260] sm:$0xff]  }
 0x3f9   : > { %v1345_v35 = vadd.f32 %v1330_v32, %v9112_v38  ;;  %7317 = vmatprep.subr.bf16.mxu0 %v8841_v54  ;;  %v8392_v54 = vld [vmem:[%s10150_s4 + $0x258] sm:$0xff]  }
 0x3fa   : > { %v7610_v0 = vpop.f32.mrf.mxu1 }
 0x3fb   : > { %v1348_v43 = vadd.f32 %v7610_v0, %v9117_v3  ;;  %7734 = vmatpush3.bf16.msra.mxu1 %v8386_v51  ;;  %v8408_v51 = vld [vmem:[%s10150_s4 + $0x2f0] sm:$0xff]  }
 0x3fc   : > { %7318 = vmatpush3.bf16.msra.mxu0 %v8723_v46  ;;  %7735 = vmatprep.subr.bf16.mxu1 %v8387_v56  ;;  %v8396_v46 = vld [vmem:[%s10149_s3 + $0x1f4] ss:$8 sps:$4 sm:$0xff]   ;;  %v1333_v59 = vpop.f32.mrf.mxu1 }
 0x3fd   : > { %7319 = vmatprep.subr.bf16.mxu0 %v8845_v61  ;;  %v8393_v61 = vld [vmem:[%s10150_s4 + $0x250] sm:$0xff]   ;;  %v1346_v4 = vadd.f32 %v1333_v59, %v1144_v57  ;;  %v8419_v57 = vld [vmem:[%s10150_s4 + $0x318] sm:$0xff]  }
 0x3fe   : > { %v8416_v59 = vld [vmem:[%s10150_s4 + $0x330] sm:$0xff]  }
 0x3ff   : > { %7736 = vmatpush3.bf16.msra.mxu1 %v8387_v56  ;;  %v8409_v56 = vld [vmem:[%s10150_s4 + $0x2e8] sm:$0xff]  }
 0x400   : > { %7320 = vmatpush3.bf16.msra.mxu0 %v8849_v63  ;;  %7737 = vmatprep.subr.bf16.mxu1 %v8388_v1 }
 0x403   : > { %v7093_v38 = vpop.f32.mrf.mxu0  ;;  %7738 = vmatpush3.bf16.msra.mxu1 %v8388_v1  ;;  %3735 = vmatmul.mubr.bf16.vlgmr.msra.gmra.mxu0 %v8389_v37  ;;  %v8410_v37 = vld [vmem:[%s10150_s4 + $0x2e0] sm:$0xff]  }
 0x404   : > { %7739 = vmatprep.subr.bf16.mxu1 %v8392_v54  ;;  %3742 = vmatprep.mubr.bf16.mxu0 %v8396_v46  ;;  %v8411_v46 = vld [vmem:[%s10150_s4 + $0x2d8] sm:$0xff]  }
 0x405   : > { %v7094_v3 = vpop.f32.mrf.mxu0 }
 0x406   : > { %v7095_v44 = vadd.f32 %v7094_v3, %v7093_v38 }
 0x407   : > { %v7096_v63 = vpop.f32.mrf.mxu0  ;;  %7740 = vmatpush3.bf16.msra.mxu1 %v8392_v54 }
 0x408   : > { %7741 = vmatprep.subr.bf16.mxu1 %v8393_v61 }
 0x409   : > { %v7097_v42 = vpop.f32.mrf.mxu0 }
 0x40a   : > { %v7098_v45 = vadd.f32 %v7097_v42, %v7096_v63 }
 0x40b   : > { %v7099_v50 = vpop.f32.mrf.mxu0  ;;  %7742 = vmatpush3.bf16.msra.mxu1 %v8393_v61  ;;  %3743 = vmatmul.mubr.bf16.gmra.mxu0 %v8394_v39  ;;  %v8412_v61 = vld [vmem:[%s10150_s4 + $0x2d0] sm:$0xff]   ;;  %v8413_v39 = vld [vmem:[%s10150_s4 + $0x2c8] sm:$0xff]  }
 0x40c   : > { %v2587_v53 = vpack.c.bf16 %v7098_v45, %v7095_v44  ;;  %7743 = vmatprep.subr.bf16.mxu1 %v8397_v41 }
 0x40d   : > { %v7100_v55 = vpop.f32.mrf.mxu0 }
 0x40e   : > { %7747 = vmatprep.mubr.bf16.mxu1 %v2587_v53  ;;  %v7101_v62 = vadd.f32 %v7100_v55, %v7099_v50  ;;  %v8414_v53 = vld [vmem:[%s10150_s4 + $0x2c0] sm:$0xff]  }
 0x40f   : > { %v7102_v58 = vpop.f32.mrf.mxu0  ;;  %7744 = vmatpush3.bf16.msra.mxu1 %v8397_v41 }
 0x410   : > { %7745 = vmatprep.subr.bf16.mxu1 %v8398_v40 }
 0x411   : > { %v7103_v36 = vpop.f32.mrf.mxu0 }
 0x412   : > { %v7104_v8 = vadd.f32 %v7103_v36, %v7102_v58  ;;  %v8415_v58 = vld [vmem:[%s10150_s4 + $0x338] sm:$0xff]  }
 0x413   : > { %7746 = vmatpush3.bf16.msra.mxu1 %v8398_v40 }
 0x414   : > { %v2588_v9 = vpack.c.bf16 %v7104_v8, %v7101_v62  ;;  %7751 = vmatprep.subr.bf16.mxu1 %v8399_v33 }
 0x416   : > { %v7629_v6 = vpop.f32.mrf.mxu1  ;;  %7748 = vmatmul.mubr.bf16.vlgmr.msra.gmra.mxu1 %v2588_v9 }
 0x417   : > { %v1541_v12 = vadd.f32 %v7629_v6, %v1347_v47  ;;  %7752 = vmatpush3.bf16.msra.mxu1 %v8399_v33 }
 0x418   : > { %v1524_v13 = vpop.f32.mrf.mxu1  ;;  %7753 = vmatprep.subr.bf16.mxu1 %v8400_v11 }
 0x419   : > { %v1539_v17 = vadd.f32 %v1524_v13, %v1345_v35 }
 0x41a   : > { %v7630_v18 = vpop.f32.mrf.mxu1 }
 0x41b   : > { %v1542_v19 = vadd.f32 %v7630_v18, %v1348_v43  ;;  %7754 = vmatpush3.bf16.msra.mxu1 %v8400_v11  ;;  %v8420_v18 = vld [vmem:[%s10150_s4 + $0x310] sm:$0xff]  }
 0x41c   : > { %v1527_v20 = vpop.f32.mrf.mxu1  ;;  %7755 = vmatprep.subr.bf16.mxu1 %v8401_v15 }
 0x41d   : > { %v1540_v23 = vadd.f32 %v1527_v20, %v1346_v4  ;;  %v8421_v20 = vld [vmem:[%s10150_s4 + $0x308] sm:$0xff]  }
 0x41f   : > { %7756 = vmatpush3.bf16.msra.mxu1 %v8401_v15  ;;  %v8418_v15 = vld [vmem:[%s10150_s4 + $0x320] sm:$0xff]  }
 0x420   : > { %7757 = vmatprep.subr.bf16.mxu1 %v8402_v21 }
 0x423   : > { %v7131_v49 = vpop.f32.mrf.mxu0  ;;  %7758 = vmatpush3.bf16.msra.mxu1 %v8402_v21 }
 0x424   : > { %7759 = vmatprep.subr.bf16.mxu1 %v8403_v7 }
 0x425   : > { %v7132_v48 = vpop.f32.mrf.mxu0 }
 0x426   : > { %v7133_v26 = vadd.f32 %v7132_v48, %v7131_v49  ;;  %v8422_v48 = vld [vmem:[%s10150_s4 + $0x300] sm:$0xff]  }
 0x427   : > { %v7134_v24 = vpop.f32.mrf.mxu0  ;;  %7760 = vmatpush3.bf16.msra.mxu1 %v8403_v7 }
 0x428   : > { %7761 = vmatprep.subr.bf16.mxu1 %v8404_v52 }
 0x429   : > { %v7135_v22 = vpop.f32.mrf.mxu0 }
 0x42a   : > { %v7136_v27 = vadd.f32 %v7135_v22, %v7134_v24  ;;  %v8423_v22 = vld [vmem:[%s10150_s4 + $0x378] sm:$0xff]  }
 0x42b   : > { %v7137_v28 = vpop.f32.mrf.mxu0  ;;  %7762 = vmatpush3.bf16.msra.mxu1 %v8404_v52 }
 0x42c   : > { %v2781_v10 = vpack.c.bf16 %v7136_v27, %v7133_v26  ;;  %7763 = vmatprep.subr.bf16.mxu1 %v8405_v60 }
 0x42d   : > { %v7138_v16 = vpop.f32.mrf.mxu0 }
 0x42e   : > { %7767 = vmatprep.mubr.bf16.mxu1 %v2781_v10  ;;  %v7139_v31 = vadd.f32 %v7138_v16, %v7137_v28  ;;  %v8425_v16 = vld [vmem:[%s10150_s4 + $0x368] sm:$0xff]  }
 0x42f   : > { %v7140_v29 = vpop.f32.mrf.mxu0  ;;  %7764 = vmatpush3.bf16.msra.mxu1 %v8405_v60 }
 0x430   : > { %7765 = vmatprep.subr.bf16.mxu1 %v8406_v5 }
 0x431   : > { %v7141_v30 = vpop.f32.mrf.mxu0 }
 0x432   : > { %v7142_v2 = vadd.f32 %v7141_v30, %v7140_v29  ;;  %v8426_v29 = vld [vmem:[%s10150_s4 + $0x360] sm:$0xff]  }
 0x433   : > { %7766 = vmatpush3.bf16.msra.mxu1 %v8406_v5  ;;  %v8424_v5 = vld [vmem:[%s10150_s4 + $0x370] sm:$0xff]  }
 0x434   : > { %v2782_v25 = vpack.c.bf16 %v7142_v2, %v7139_v31  ;;  %7771 = vmatprep.subr.bf16.mxu1 %v8407_v14  ;;  %v8428_v31 = vld [vmem:[%s10150_s4 + $0x350] sm:$0xff]  }
 0x436   : > { %v7649_v34 = vpop.f32.mrf.mxu1  ;;  %7768 = vmatmul.mubr.bf16.vlgmr.msra.gmra.mxu1 %v2782_v25 }
 0x437   : > { %v1735_v47 = vadd.f32 %v7649_v34, %v1541_v12  ;;  %7772 = vmatpush3.bf16.msra.mxu1 %v8407_v14  ;;  %v8417_v12 = vld [vmem:[%s10150_s4 + $0x328] sm:$0xff]   ;;  %v8427_v14 = vld [vmem:[%s10150_s4 + $0x358] sm:$0xff]  }
 0x438   : > { %v1718_v32 = vpop.f32.mrf.mxu1  ;;  %7773 = vmatprep.subr.bf16.mxu1 %v8408_v51 }
 0x439   : > { %v1733_v35 = vadd.f32 %v1718_v32, %v1539_v17 }
 0x43a   : > { %v7650_v0 = vpop.f32.mrf.mxu1 }
 0x43b   : > { %v9548_v43 = vadd.f32 %v7650_v0, %v1542_v19  ;;  %7774 = vmatpush3.bf16.msra.mxu1 %v8408_v51  ;;  %v8429_v51 = vld [vmem:[%s10150_s4 + $0x348] sm:$0xff]   ;;  %v8430_v0 = vld [vmem:[%s10150_s4 + $0x340] sm:$0xff]  }
 0x43c   : > { %v1721_v1 = vpop.f32.mrf.mxu1  ;;  %7775 = vmatprep.subr.bf16.mxu1 %v8409_v56 }
 0x43d   : > { %v9553_v54 = vadd.f32 %v1721_v1, %v1540_v23 }
 0x43f   : > { %7776 = vmatpush3.bf16.msra.mxu1 %v8409_v56 }
 0x440   : > { %7777 = vmatprep.subr.bf16.mxu1 %v8410_v37 }
 0x443   : > { %v7169_v38 = vpop.f32.mrf.mxu0  ;;  %7778 = vmatpush3.bf16.msra.mxu1 %v8410_v37 }
 0x444   : > { %7779 = vmatprep.subr.bf16.mxu1 %v8411_v46 }
 0x445   : > { %v7170_v3 = vpop.f32.mrf.mxu0 }
 0x446   : > { %v7171_v42 = vadd.f32 %v7170_v3, %v7169_v38 }
 0x447   : > { %v7172_v63 = vpop.f32.mrf.mxu0  ;;  %7780 = vmatpush3.bf16.msra.mxu1 %v8411_v46  ;;  %v8431_v46 = vld [vmem:[%s10150_s4 + $0x3b8] sm:$0xff]  }
 0x448   : > { %7781 = vmatprep.subr.bf16.mxu1 %v8412_v61 }
 0x449   : > { %v7173_v41 = vpop.f32.mrf.mxu0 }
 0x44a   : > { %v7174_v44 = vadd.f32 %v7173_v41, %v7172_v63  ;;  %v8433_v41 = vld [vmem:[%s10150_s4 + $0x3a8] sm:$0xff]  }
 0x44b   : > { %v7175_v45 = vpop.f32.mrf.mxu0  ;;  %7782 = vmatpush3.bf16.msra.mxu1 %v8412_v61 }
 0x44c   : > { %v2975_v50 = vpack.c.bf16 %v7174_v44, %v7171_v42  ;;  %7783 = vmatprep.subr.bf16.mxu1 %v8413_v39  ;;  %v8434_v42 = vld [vmem:[%s10150_s4 + $0x3a0] sm:$0xff]   ;;  %v8435_v44 = vld [vmem:[%s10150_s4 + $0x398] sm:$0xff]  }
 0x44d   : > { %v7176_v40 = vpop.f32.mrf.mxu0 }
 0x44e   : > { %7787 = vmatprep.mubr.bf16.mxu1 %v2975_v50  ;;  %v7177_v36 = vadd.f32 %v7176_v40, %v7175_v45  ;;  %v8436_v50 = vld [vmem:[%s10150_s4 + $0x390] sm:$0xff]  }
 0x44f   : > { %v7178_v55 = vpop.f32.mrf.mxu0  ;;  %7784 = vmatpush3.bf16.msra.mxu1 %v8413_v39  ;;  %v8432_v39 = vld [vmem:[%s10150_s4 + $0x3b0] sm:$0xff]  }
 0x450   : > { %7785 = vmatprep.subr.bf16.mxu1 %v8414_v53 }
 0x451   : > { %v7179_v33 = vpop.f32.mrf.mxu0 }
 0x452   : > { %v7180_v62 = vadd.f32 %v7179_v33, %v7178_v55  ;;  %v8437_v55 = vld [vmem:[%s10150_s4 + $0x388] sm:$0xff]  }
 0x453   : > { %7786 = vmatpush3.bf16.msra.mxu1 %v8414_v53 }
 0x454   : > { %v2976_v8 = vpack.c.bf16 %v7180_v62, %v7177_v36  ;;  %7791 = vmatprep.subr.bf16.mxu1 %v8415_v58 }
 0x456   : > { %v7669_v9 = vpop.f32.mrf.mxu1  ;;  %7788 = vmatmul.mubr.bf16.vlgmr.msra.gmra.mxu1 %v2976_v8 }
 0x457   : > { %v9573_v11 = vadd.f32 %v7669_v9, %v1735_v47  ;;  %7792 = vmatpush3.bf16.msra.mxu1 %v8415_v58 }
 0x458   : > { %v1912_v6 = vpop.f32.mrf.mxu1  ;;  %7793 = vmatprep.subr.bf16.mxu1 %v8416_v59 }
 0x459   : > { %v9578_v13 = vadd.f32 %v1912_v6, %v1733_v35 }
 0x45b   : > { %7794 = vmatpush3.bf16.msra.mxu1 %v8416_v59  ;;  %v8438_v59 = vld [vmem:[%s10150_s4 + $0x380] sm:$0xff]  }
 0x45c   : > { %7795 = vmatprep.subr.bf16.mxu1 %v8417_v12 }
 0x45f   : > { %7796 = vmatpush3.bf16.msra.mxu1 %v8417_v12  ;;  %v8439_v12 = vld [vmem:[%s10150_s4 + $0x3f8] sm:$0xff]  }
 0x460   : > { %7797 = vmatprep.subr.bf16.mxu1 %v8418_v15 }
 0x463   : > { %v7207_v17 = vpop.f32.mrf.mxu0  ;;  %7798 = vmatpush3.bf16.msra.mxu1 %v8418_v15 }
 0x464   : > { %7799 = vmatprep.subr.bf16.mxu1 %v8419_v57 }
 0x465   : > { %v7208_v4 = vpop.f32.mrf.mxu0 }
 0x466   : > { %v7209_v23 = vadd.f32 %v7208_v4, %v7207_v17  ;;  %v8440_v4 = vld [vmem:[%s10150_s4 + $0x3f0] sm:$0xff]  }
 0x467   : > { %v7210_v19 = vpop.f32.mrf.mxu0  ;;  %7800 = vmatpush3.bf16.msra.mxu1 %v8419_v57 }
 0x468   : > { %7801 = vmatprep.subr.bf16.mxu1 %v8420_v18 }
 0x469   : > { %v7211_v21 = vpop.f32.mrf.mxu0 }
 0x46a   : > { %v7212_v7 = vadd.f32 %v7211_v21, %v7210_v19  ;;  %v8441_v19 = vld [vmem:[%s10150_s4 + $0x3e8] sm:$0xff]   ;;  %v8443_v21 = vld [vmem:[%s10150_s4 + $0x3d8] sm:$0xff]  }
 0x46b   : > { %v7213_v49 = vpop.f32.mrf.mxu0  ;;  %7802 = vmatpush3.bf16.msra.mxu1 %v8420_v18 }
 0x46c   : > { %v3169_v52 = vpack.c.bf16 %v7212_v7, %v7209_v23  ;;  %7803 = vmatprep.subr.bf16.mxu1 %v8421_v20  ;;  %v8444_v7 = vld [vmem:[%s10150_s4 + $0x3d0] sm:$0xff]  }
 0x46d   : > { %v7214_v24 = vpop.f32.mrf.mxu0 }
 0x46e   : > { %7807 = vmatprep.mubr.bf16.mxu1 %v3169_v52  ;;  %v7215_v27 = vadd.f32 %v7214_v24, %v7213_v49 }
 0x46f   : > { %v7216_v60 = vpop.f32.mrf.mxu0  ;;  %7804 = vmatpush3.bf16.msra.mxu1 %v8421_v20  ;;  %v8442_v20 = vld [vmem:[%s10150_s4 + $0x3e0] sm:$0xff]  }
 0x470   : > { %7805 = vmatprep.subr.bf16.mxu1 %v8422_v48 }
 0x471   : > { %v7217_v26 = vpop.f32.mrf.mxu0 }
 0x472   : > { %v7218_v28 = vadd.f32 %v7217_v26, %v7216_v60 }
 0x473   : > { %7806 = vmatpush3.bf16.msra.mxu1 %v8422_v48  ;;  %v8445_v48 = vld [vmem:[%s10150_s4 + $0x3c8] sm:$0xff]  }
 0x474   : > { %v3170_v10 = vpack.c.bf16 %v7218_v28, %v7215_v27  ;;  %7811 = vmatprep.subr.bf16.mxu1 %v8423_v22  ;;  %v8446_v28 = vld [vmem:[%s10150_s4 + $0x3c0] sm:$0xff]  }
 0x476   : > { %7808 = vmatmul.mubr.bf16.vlgmr.msra.gmra.mxu1 %v3170_v10 }
 0x477   : > { %7812 = vmatpush3.bf16.msra.mxu1 %v8423_v22 }
 0x478   : > { %7813 = vmatprep.subr.bf16.mxu1 %v8424_v5 }
 0x47b   : > { %7814 = vmatpush3.bf16.msra.mxu1 %v8424_v5 }
 0x47c   : > { %7815 = vmatprep.subr.bf16.mxu1 %v8425_v16 }
 0x47f   : > { %7816 = vmatpush3.bf16.msra.mxu1 %v8425_v16 }
 0x480   : > { %7817 = vmatprep.subr.bf16.mxu1 %v8426_v29 }
 0x483   : > { %v7245_v30 = vpop.f32.mrf.mxu0  ;;  %7818 = vmatpush3.bf16.msra.mxu1 %v8426_v29 }
 0x484   : > { %7819 = vmatprep.subr.bf16.mxu1 %v8427_v14 }
 0x485   : > { %v7246_v2 = vpop.f32.mrf.mxu0 }
 0x486   : > { %v7247_v47 = vadd.f32 %v7246_v2, %v7245_v30  ;;  %v8448_v2 = vld [vmem:[%s10152_s6 + $0x78] sm:$0xff]  }
 0x487   : > { %v7248_v25 = vpop.f32.mrf.mxu0  ;;  %7820 = vmatpush3.bf16.msra.mxu1 %v8427_v14 }
 0x488   : > { %7821 = vmatprep.subr.bf16.mxu1 %v8428_v31 }
 0x489   : > { %v7249_v34 = vpop.f32.mrf.mxu0 }
 0x48a   : > { %v7250_v32 = vadd.f32 %v7249_v34, %v7248_v25  ;;  %v8449_v25 = vld [vmem:[%s10152_s6 + $0x30] sm:$0xff]   ;;  %v8451_v34 = vld [vmem:[%s10152_s6 + $0x28] sm:$0xff]  }
 0x48b   : > { %v7251_v56 = vpop.f32.mrf.mxu0  ;;  %7822 = vmatpush3.bf16.msra.mxu1 %v8428_v31  ;;  %v8447_v31 = vld [vmem:[%s10152_s6 + $0x38] sm:$0xff]  }
 0x48c   : > { %v3363_v35 = vpack.c.bf16 %v7250_v32, %v7247_v47  ;;  %7823 = vmatprep.subr.bf16.mxu1 %v8429_v51  ;;  %7871 = vmatprep.subr.bf16.mxu0 %v8447_v31  ;;  %v8452_v47 = vld [vmem:[%s10152_s6 + $0x68] sm:$0xff]   ;;  %v8453_v32 = vld [vmem:[%s10152_s6 + $0x20] sm:$0xff]  }
 0x48d   : > { %v7252_v1 = vpop.f32.mrf.mxu0  ;;  %7872 = vmatpush3.bf16.msra.mxu0 %v8447_v31 }
 0x48e   : > { %7827 = vmatprep.mubr.bf16.mxu1 %v3363_v35  ;;  %v7253_v61 = vadd.f32 %v7252_v1, %v7251_v56  ;;  %7873 = vmatprep.subr.bf16.mxu0 %v8449_v25  ;;  %v8454_v56 = vld [vmem:[%s10152_s6 + $0x60] sm:$0xff]   ;;  %v9691_v35 = vpop.f32.mrf.mxu1  ;;  %v8456_v1 = vld [vmem:[%s10152_s6 + $0x58] sm:$0xff]  }
 0x48f   : > { %v7254_v37 = vpop.f32.mrf.mxu0  ;;  %7824 = vmatpush3.bf16.msra.mxu1 %v8429_v51  ;;  %v8450_v51 = vld [vmem:[%s10152_s6 + $0x70] sm:$0xff]  }
 0x490   : > { %7825 = vmatprep.subr.bf16.mxu1 %v8430_v0 }
 0x491   : > { %v7255_v38 = vpop.f32.mrf.mxu0  ;;  %7874 = vmatpush3.bf16.msra.mxu0 %v8449_v25 }
 0x492   : > { %v7256_v3 = vadd.f32 %v7255_v38, %v7254_v37  ;;  %7875 = vmatprep.subr.bf16.mxu0 %v8451_v34  ;;  %v9699_v37 = vpop.f32.mrf.mxu1  ;;  %v8457_v38 = vld [vmem:[%s10152_s6 + $0x10] sm:$0xff]  }
 0x493   : > { %7826 = vmatpush3.bf16.msra.mxu1 %v8430_v0  ;;  %v8455_v0 = vld [vmem:[%s10152_s6 + $0x18] sm:$0xff]   ;;  %v1928_v31 = vadd.f32 %v9699_v37, %v9553_v54 }
 0x494   : > { %v3364_v63 = vpack.c.bf16 %v7256_v3, %v7253_v61  ;;  %7831 = vmatprep.subr.bf16.mxu1 %v8431_v46  ;;  %v8458_v61 = vld [vmem:[%s10152_s6 + $0x50] sm:$0xff]  }
 0x495   : > { %7876 = vmatpush3.bf16.msra.mxu0 %v8451_v34 }
 0x496   : > { %7828 = vmatmul.mubr.bf16.vlgmr.msra.gmra.mxu1 %v3364_v63  ;;  %7877 = vmatprep.subr.bf16.mxu0 %v8453_v32  ;;  %v8459_v63 = vld [vmem:[%s10152_s6 + $0x8] sm:$0xff]  }
 0x497   : > { %7832 = vmatpush3.bf16.msra.mxu1 %v8431_v46  ;;  %v7689_v46 = vpop.f32.mrf.mxu1 }
 0x498   : > { %7833 = vmatprep.subr.bf16.mxu1 %v8432_v39 }
 0x499   : > { %7878 = vmatpush3.bf16.msra.mxu0 %v8453_v32  ;;  %v2106_v3 = vpop.f32.mrf.mxu1 }
 0x49a   : > { %7879 = vmatprep.subr.bf16.mxu0 %v8455_v0 }
 0x49b   : > { %7834 = vmatpush3.bf16.msra.mxu1 %v8432_v39  ;;  %v8460_v39 = vld [vmem:[%s10152_s6 + $0x48] sm:$0xff]  }
 0x49c   : > { %7835 = vmatprep.subr.bf16.mxu1 %v8433_v41 }
 0x49d   : > { %7880 = vmatpush3.bf16.msra.mxu0 %v8455_v0 }
 0x49e   : > { %7881 = vmatprep.subr.bf16.mxu0 %v8457_v38 }
 0x49f   : > { %7836 = vmatpush3.bf16.msra.mxu1 %v8433_v41  ;;  %v7690_v41 = vpop.f32.mrf.mxu1 }
 0x4a0   : > { %7837 = vmatprep.subr.bf16.mxu1 %v8434_v42 }
 0x4a1   : > { %7882 = vmatpush3.bf16.msra.mxu0 %v8457_v38 }
 0x4a2   : > { %7883 = vmatprep.subr.bf16.mxu0 %v8459_v63 }
 0x4a3   : > { %v7283_v45 = vpop.f32.mrf.mxu0  ;;  %7838 = vmatpush3.bf16.msra.mxu1 %v8434_v42  ;;  %v8461_v42 = vld [vmem:[%s10152_s6] sm:$0xff]  }
 0x4a4   : > { %7839 = vmatprep.subr.bf16.mxu1 %v8435_v44 }
 0x4a5   : > { %v7284_v53 = vpop.f32.mrf.mxu0  ;;  %7884 = vmatpush3.bf16.msra.mxu0 %v8459_v63 }
 0x4a6   : > { %v7285_v33 = vadd.f32 %v7284_v53, %v7283_v45  ;;  %7885 = vmatprep.subr.bf16.mxu0 %v8461_v42  ;;  %v2109_v45 = vpop.f32.mrf.mxu1  ;;  %v9727_v53 = vld [vmem:[%s10152_s6 + $0xf8] sm:$0xff]  }
 0x4a7   : > { %v7286_v40 = vpop.f32.mrf.mxu0  ;;  %7840 = vmatpush3.bf16.msra.mxu1 %v8435_v44  ;;  %v8462_v44 = vld [vmem:[%s10152_s6 + $0x40] sm:$0xff]   ;;  %v2122_v34 = vadd.f32 %v2109_v45, %v1928_v31  ;;  %v8472_v31 = vld [vmem:[%s10152_s6 + $0xd8] sm:$0xff]  }
 0x4a8   : > { %7841 = vmatprep.subr.bf16.mxu1 %v8436_v50 }
 0x4a9   : > { %v7287_v58 = vpop.f32.mrf.mxu0  ;;  %7886 = vmatpush3.bf16.msra.mxu0 %v8461_v42 }
 0x4aa   : > { %v7288_v36 = vadd.f32 %v7287_v58, %v7286_v40  ;;  %v7709_v40 = vpop.f32.mrf.mxu1 }
 0x4ab   : > { %v7289_v62 = vpop.f32.mrf.mxu0  ;;  %7842 = vmatpush3.bf16.msra.mxu1 %v8436_v50  ;;  %v9722_v50 = vld [vmem:[%s10152_s6 + $0xb8] sm:$0xff]  }
 0x4ac   : > { %v3557_v8 = vpack.c.bf16 %v7288_v36, %v7285_v33  ;;  %7843 = vmatprep.subr.bf16.mxu1 %v8437_v55  ;;  %7911 = vmatprep.subr.bf16.mxu0 %v9722_v50 }
 0x4ad   : > { %v7290_v9 = vpop.f32.mrf.mxu0 }
 0x4ae   : > { %7847 = vmatprep.mubr.bf16.mxu1 %v3557_v8  ;;  %v7291_v57 = vadd.f32 %v7290_v9, %v7289_v62 }
 0x4af   : > { %v7292_v6 = vpop.f32.mrf.mxu0  ;;  %7844 = vmatpush3.bf16.msra.mxu1 %v8437_v55  ;;  %v2300_v55 = vpop.f32.mrf.mxu1 }
 0x4b0   : > { %7845 = vmatprep.subr.bf16.mxu1 %v8438_v59 }
 0x4b1   : > { %v7293_v15 = vpop.f32.mrf.mxu0  ;;  %v7710_v58 = vpop.f32.mrf.mxu1 }
 0x4b2   : > { %v7294_v17 = vadd.f32 %v7293_v15, %v7292_v6 }
 0x4b3   : > { %7846 = vmatpush3.bf16.msra.mxu1 %v8438_v59  ;;  %v2303_v33 = vpop.f32.mrf.mxu1 }
 0x4b4   : > { %v3558_v18 = vpack.c.bf16 %v7294_v17, %v7291_v57  ;;  %7851 = vmatprep.subr.bf16.mxu1 %v8439_v12  ;;  %v2316_v0 = vadd.f32 %v2303_v33, %v2122_v34  ;;  %v6338_v33 = vld [vmem:[%s10151_s5] ss:$0 sm:$0xff]  ;;  %v8476_v34 = vld [vmem:[%s10152_s6 + $0xc8] sm:$0xff]  }
 0x4b6   : > { %7848 = vmatmul.mubr.bf16.vlgmr.msra.gmra.mxu1 %v3558_v18  ;;  %v7729_v36 = vpop.f32.mrf.mxu1 }
 0x4b7   : > { %7852 = vmatpush3.bf16.msra.mxu1 %v8439_v12 }
 0x4b8   : > { %7853 = vmatprep.subr.bf16.mxu1 %v8440_v4  ;;  %v2494_v62 = vpop.f32.mrf.mxu1 }
 0x4ba   : > { %v7730_v8 = vpop.f32.mrf.mxu1 }
 0x4bb   : > { %7854 = vmatpush3.bf16.msra.mxu1 %v8440_v4 }
 0x4bc   : > { %7855 = vmatprep.subr.bf16.mxu1 %v8441_v19  ;;  %v2497_v59 = vpop.f32.mrf.mxu1 }
 0x4bf   : > { %7856 = vmatpush3.bf16.msra.mxu1 %v8441_v19 }
 0x4c0   : > { %7857 = vmatprep.subr.bf16.mxu1 %v8442_v20 }
 0x4c3   : > { %v7321_v23 = vpop.f32.mrf.mxu0  ;;  %7858 = vmatpush3.bf16.msra.mxu1 %v8442_v20 }
 0x4c4   : > { %7859 = vmatprep.subr.bf16.mxu1 %v8443_v21 }
 0x4c5   : > { %v7322_v49 = vpop.f32.mrf.mxu0 }
 0x4c6   : > { %v7323_v60 = vadd.f32 %v7322_v49, %v7321_v23 }
 0x4c7   : > { %v7324_v52 = vpop.f32.mrf.mxu0  ;;  %7860 = vmatpush3.bf16.msra.mxu1 %v8443_v21 }
 0x4c8   : > { %7861 = vmatprep.subr.bf16.mxu1 %v8444_v7 }
 0x4c9   : > { %v7325_v24 = vpop.f32.mrf.mxu0 }
 0x4ca   : > { %v7326_v22 = vadd.f32 %v7325_v24, %v7324_v52 }
 0x4cb   : > { %v7327_v26 = vpop.f32.mrf.mxu0  ;;  %7862 = vmatpush3.bf16.msra.mxu1 %v8444_v7 }
 0x4cc   : > { %v3751_v27 = vpack.c.bf16 %v7326_v22, %v7323_v60  ;;  %7863 = vmatprep.subr.bf16.mxu1 %v8445_v48 }
 0x4cd   : > { %v7328_v10 = vpop.f32.mrf.mxu0 }
 0x4ce   : > { %7867 = vmatprep.mubr.bf16.mxu1 %v3751_v27  ;;  %v7329_v29 = vadd.f32 %v7328_v10, %v7327_v26  ;;  %v2123_v26 = vadd.f32 %v7689_v46, %v9573_v11  ;;  %v2121_v10 = vadd.f32 %v2106_v3, %v9578_v13 }
 0x4cf   : > { %v7330_v5 = vpop.f32.mrf.mxu0  ;;  %7864 = vmatpush3.bf16.msra.mxu1 %v8445_v48 }
 0x4d0   : > { %7865 = vmatprep.subr.bf16.mxu1 %v8446_v28 }
 0x4d1   : > { %v7331_v16 = vpop.f32.mrf.mxu0 }
 0x4d2   : > { %v7332_v14 = vadd.f32 %v7331_v16, %v7330_v5  ;;  %v2317_v5 = vadd.f32 %v7709_v40, %v2123_v26 }
 0x4d3   : > { %7866 = vmatpush3.bf16.msra.mxu1 %v8446_v28  ;;  %v1930_v28 = vadd.f32 %v9691_v35, %v9548_v43 }
 0x4d4   : > { %v3752_v30 = vpack.c.bf16 %v7332_v14, %v7329_v29  ;;  %7891 = vmatprep.subr.bf16.mxu1 %v8448_v2  ;;  %v2315_v14 = vadd.f32 %v2300_v55, %v2121_v10 }
 0x4d5   : > { %v2124_v29 = vadd.f32 %v7690_v41, %v1930_v28 }
 0x4d6   : > { %7868 = vmatmul.mubr.bf16.vlgmr.msra.gmra.mxu1 %v3752_v30  ;;  %v7749_v9 = vpop.f32.mrf.mxu1  ;;  %v2511_v30 = vadd.f32 %v7729_v36, %v2317_v5  ;;  %v2509_v25 = vadd.f32 %v2494_v62, %v2315_v14  ;;  %v8465_v5 = vld [vmem:[%s10152_s6 + $0xb0] sm:$0xff]   ;;  %v8468_v14 = vld [vmem:[%s10152_s6 + $0xe8] sm:$0xff]  }
 0x4d7   : > { %7892 = vmatpush3.bf16.msra.mxu1 %v8448_v2  ;;  %v2318_v2 = vadd.f32 %v7710_v58, %v2124_v29  ;;  %v8467_v29 = vld [vmem:[%s10152_s6 + $0xa8] sm:$0xff]  }
 0x4d8   : > { %7893 = vmatprep.subr.bf16.mxu1 %v8450_v51  ;;  %v2688_v6 = vpop.f32.mrf.mxu1 }
 0x4d9   : > { %v2512_v11 = vadd.f32 %v7730_v8, %v2318_v2  ;;  %v2703_v32 = vadd.f32 %v2688_v6, %v2509_v25  ;;  %v8473_v2 = vld [vmem:[%s10152_s6 + $0x90] sm:$0xff]  }
 0x4da   : > { %v7750_v12 = vpop.f32.mrf.mxu1  ;;  %v8474_v25 = vld [vmem:[%s10152_s6 + $0xd0] sm:$0xff]  }
 0x4db   : > { %7894 = vmatpush3.bf16.msra.mxu1 %v8450_v51  ;;  %v2705_v51 = vadd.f32 %v7749_v9, %v2511_v30  ;;  %v2706_v43 = vadd.f32 %v7750_v12, %v2512_v11  ;;  %v8471_v30 = vld [vmem:[%s10152_s6 + $0x98] sm:$0xff]   ;;  %v8478_v11 = vld [vmem:[%s10152_s6 + $0xc0] sm:$0xff]  }
 0x4dc   : > { %7895 = vmatprep.subr.bf16.mxu1 %v8452_v47  ;;  %v2691_v15 = vpop.f32.mrf.mxu1 }
 0x4df   : > { %7896 = vmatpush3.bf16.msra.mxu1 %v8452_v47 }
 0x4e0   : > { %7897 = vmatprep.subr.bf16.mxu1 %v8454_v56 }
 0x4e3   : > { %7898 = vmatpush3.bf16.msra.mxu1 %v8454_v56 }
 0x4e4   : > { %7899 = vmatprep.subr.bf16.mxu1 %v8456_v1 }
 0x4e7   : > { %7900 = vmatpush3.bf16.msra.mxu1 %v8456_v1  ;;  %v2510_v1 = vadd.f32 %v2497_v59, %v2316_v0  ;;  %v8481_v0 = vld [vmem:[%s10152_s6 + $0x130] sm:$0xff]  }
 0x4e8   : > { %7901 = vmatprep.subr.bf16.mxu1 %v8458_v61 }
 0x4e9   : > { %v2704_v63 = vadd.f32 %v2691_v15, %v2510_v1  ;;  %v8485_v1 = vld [vmem:[%s10152_s6 + $0x120] sm:$0xff]  }
 0x4eb   : > { %7902 = vmatpush3.bf16.msra.mxu1 %v8458_v61 }
 0x4ec   : > { %7903 = vmatprep.subr.bf16.mxu1 %v8460_v39 }
 0x4ef   : > { %7904 = vmatpush3.bf16.msra.mxu1 %v8460_v39 }
 0x4f0   : > { %7905 = vmatprep.subr.bf16.mxu1 %v8462_v44 }
 0x4f3   : > { %7906 = vmatpush3.bf16.msra.mxu1 %v8462_v44 }
 0x4f4   : > { %7931 = vmatprep.subr.bf16.mxu1 %v9727_v53 }
 0x4f6   : > { %v7769_v57 = vpop.f32.mrf.mxu1 }
 0x4f7   : > { %v2899_v56 = vadd.f32 %v7769_v57, %v2705_v51  ;;  %v8475_v51 = vld [vmem:[%s10152_s6 + $0x88] sm:$0xff]  }
 0x4f8   : > { %v2882_v17 = vpop.f32.mrf.mxu1 }
 0x4f9   : > { %v2897_v35 = vadd.f32 %v2882_v17, %v2703_v32  ;;  %v8479_v32 = vld [vmem:[%s10152_s6 + $0x138] sm:$0xff]  }
 0x4fa   : > { %v7770_v18 = vpop.f32.mrf.mxu1 }
 0x4fb   : > { %v2900_v38 = vadd.f32 %v7770_v18, %v2706_v43  ;;  %v8482_v43 = vld [vmem:[%s10152_s6 + $0x170] sm:$0xff]  }
 0x4fc   : > { %v2885_v4 = vpop.f32.mrf.mxu1 }
 0x4fd   : > { %v2898_v41 = vadd.f32 %v2885_v4, %v2704_v63  ;;  %v8490_v63 = vld [vmem:[%s10152_s6 + $0x150] sm:$0xff]  }
 0x516   : > { %v7789_v19 = vpop.f32.mrf.mxu1 }
 0x517   : > { %v3093_v13 = vadd.f32 %v7789_v19, %v2899_v56  ;;  %v8480_v56 = vld [vmem:[%s10152_s6 + $0x178] sm:$0xff]  }
 0x518   : > { %v3076_v20 = vpop.f32.mrf.mxu1 }
 0x519   : > { %v3091_v61 = vadd.f32 %v3076_v20, %v2897_v35  ;;  %v8483_v35 = vld [vmem:[%s10152_s6 + $0x128] sm:$0xff]  }
 0x51a   : > { %v7790_v21 = vpop.f32.mrf.mxu1 }
 0x51b   : > { %v3094_v39 = vadd.f32 %v7790_v21, %v2900_v38  ;;  %v8487_v38 = vld [vmem:[%s10152_s6 + $0x118] sm:$0xff]  }
 0x51c   : > { %v3079_v23 = vpop.f32.mrf.mxu1 }
 0x51d   : > { %v3092_v55 = vadd.f32 %v3079_v23, %v2898_v41  ;;  %v8494_v41 = vld [vmem:[%s10152_s6 + $0x140] sm:$0xff]  }
 0x536   : > { %v7809_v7 = vpop.f32.mrf.mxu1 }
 0x537   : > { %v3287_v3 = vadd.f32 %v7809_v7, %v3093_v13  ;;  %v8484_v13 = vld [vmem:[%s10152_s6 + $0x168] sm:$0xff]  }
 0x538   : > { %v3270_v49 = vpop.f32.mrf.mxu1 }
 0x539   : > { %v3285_v54 = vadd.f32 %v3270_v49, %v3091_v61  ;;  %v8488_v61 = vld [vmem:[%s10152_s6 + $0x158] sm:$0xff]  }
 0x53a   : > { %v7810_v52 = vpop.f32.mrf.mxu1 }
 0x53b   : > { %v3288_v44 = vadd.f32 %v7810_v52, %v3094_v39  ;;  %v8491_v39 = vld [vmem:[%s10152_s6 + $0x108] sm:$0xff]  }
 0x53c   : > { %v3273_v48 = vpop.f32.mrf.mxu1 }
 0x53d   : > { %v3286_v59 = vadd.f32 %v3273_v48, %v3092_v55  ;;  %v8499_v55 = vld [vmem:[%s10152_s6 + $0x1a8] sm:$0xff]  }
 0x556   : > { %v7829_v24 = vpop.f32.mrf.mxu1 }
 0x557   : > { %v3481_v37 = vadd.f32 %v7829_v24, %v3287_v3  ;;  %v8489_v3 = vld [vmem:[%s10152_s6 + $0x110] sm:$0xff]  }
 0x558   : > { %v3464_v60 = vpop.f32.mrf.mxu1 }
 0x559   : > { %v3479_v45 = vadd.f32 %v3464_v60, %v3285_v54  ;;  %v8492_v54 = vld [vmem:[%s10152_s6 + $0x148] sm:$0xff]  }
 0x55a   : > { %v7830_v22 = vpop.f32.mrf.mxu1 }
 0x55b   : > { %v3482_v36 = vadd.f32 %v7830_v22, %v3288_v44  ;;  %v8496_v44 = vld [vmem:[%s10152_s6 + $0x1f8] sm:$0xff]  }
 0x55c   : > { %v3467_v27 = vpop.f32.mrf.mxu1 }
 0x55d   : > { %v3480_v57 = vadd.f32 %v3467_v27, %v3286_v59  ;;  %v8505_v59 = vld [vmem:[%s10152_s6 + $0x190] sm:$0xff]  }
 0x576   : > { %v7849_v16 = vpop.f32.mrf.mxu1 }
 0x577   : > { %v3675_v40 = vadd.f32 %v7849_v16, %v3481_v37  ;;  %v8466_v16 = vld [vmem:[%s10152_s6 + $0xf0] sm:$0xff]   ;;  %v8493_v37 = vld [vmem:[%s10152_s6 + $0x100] sm:$0xff]  }
 0x578   : > { %v3658_v47 = vpop.f32.mrf.mxu1 }
 0x579   : > { %v3673_v62 = vadd.f32 %v3658_v47, %v3479_v45  ;;  %v8477_v47 = vld [vmem:[%s10152_s6 + $0x80] sm:$0xff]   ;;  %v8497_v45 = vld [vmem:[%s10152_s6 + $0x1b0] sm:$0xff]  }
 0x57a   : > { %v7850_v46 = vpop.f32.mrf.mxu1 }
 0x57b   : > { %v3676_v6 = vadd.f32 %v7850_v46, %v3482_v36  ;;  %v8486_v46 = vld [vmem:[%s10152_s6 + $0x160] sm:$0xff]  }
 0x57c   : > { %v3661_v42 = vpop.f32.mrf.mxu1  ;;  %v8502_v36 = vld [vmem:[%s10152_s6 + $0x1e0] sm:$0xff]  }
 0x57d   : > { %v3674_v4 = vadd.f32 %v3661_v42, %v3480_v57  ;;  %v8495_v42 = vld [vmem:[%s10152_s6 + $0x1b8] sm:$0xff]   ;;  %v8510_v57 = vld [vmem:[%s10152_s6 + $0x1c0] sm:$0xff]  }
 0x596   : > { %v7869_v58 = vpop.f32.mrf.mxu1 }
 0x597   : > { %v3869_v8 = vadd.f32 %v7869_v58, %v3675_v40  ;;  %v8498_v40 = vld [vmem:[%s10152_s6 + $0x1f0] sm:$0xff]   ;;  %v8500_v58 = vld [vmem:[%s10152_s6 + $0x1e8] sm:$0xff]  }
 0x598   : > { %v3852_v9 = vpop.f32.mrf.mxu1 }
 0x599   : > { %v3880_v12 = vadd.f32 %v6338_v33, %v3869_v8  ;;  %v3867_v15 = vadd.f32 %v3852_v9, %v3673_v62  ;;  %v8503_v62 = vld [vmem:[%s10152_s6 + $0x198] sm:$0xff]   ;;  %v8506_v9 = vld [vmem:[%s10152_s6 + $0x1d0] sm:$0xff]  }
 0x59a   : > { %v7870_v17 = vpop.f32.mrf.mxu1  ;;  %v8504_v8 = vld [vmem:[%s10152_s6 + $0x1d8] sm:$0xff]  }
 0x59b   : > { %v3870_v18 = vadd.f32 %v7870_v17, %v3676_v6  ;;  %v3878_v19 = vadd.f32 %v6338_v33, %v3867_v15  ;;  %v3888_v21 = vmul.f32 0.2, %v3880_v12  ;;  %vm3884_vm0 = vcmp.ge.f32.partialorder %v3880_v12, 0.0  ;;  %v8507_v6 = vld [vmem:[%s10152_s6 + $0x188] sm:$0xff]   ;;  %v8509_v15 = vld [vmem:[%s10152_s6 + $0x180] sm:$0xff]   ;;  %v8511_v17 = vld [vmem:[%s10152_s6 + $0x238] sm:$0xff]  }
 0x59c   : > { %v3855_v20 = vpop.f32.mrf.mxu1 }
 0x59d   : > { %v3881_v23 = vadd.f32 %v6338_v33, %v3870_v18  ;;  %v3868_v7 = vadd.f32 %v3855_v20, %v3674_v4  ;;  %v3886_v52 = vmul.f32 0.2, %v3878_v19  ;;  %v3892_v60 = vsel %vm3884_vm0, %v3880_v12, %v3888_v21  ;;  %v8508_v12 = vld [vmem:[%s10152_s6 + $0x1c8] sm:$0xff]   ;;  %v8512_v18 = vld [vmem:[%s10152_s6 + $0x278] sm:$0xff]   ;;  %v8513_v4 = vld [vmem:[%s10152_s6 + $0x230] sm:$0xff]  }
 0x59e   : > { %vm3882_vm2 = vcmp.ge.f32.partialorder %v3878_v19, 0.0  ;;  %v8515_v20 = vld [vmem:[%s10152_s6 + $0x228] sm:$0xff]  }
 0x59f   : > { %vm3885_vm1 = vcmp.ge.f32.partialorder %v3881_v23, 0.0  ;;  %v3889_v49 = vmul.f32 0.2, %v3881_v23  ;;  %v3879_v24 = vadd.f32 %v6338_v33, %v3868_v7  ;;  %v3890_v27 = vsel %vm3882_vm2, %v3878_v19, %v3886_v52  ;;  %v8501_v33 = vld [vmem:[%s10152_s6 + $0x1a0] sm:$0xff]   ;;  %v8514_v19 = vld [vmem:[%s10152_s6 + $0x270] sm:$0xff]   ;;  %v8516_v21 = vld [vmem:[%s10152_s6 + $0x268] sm:$0xff]  }
 0x5a0   : > { %v8518_v7 = vld [vmem:[%s10152_s6 + $0x260] sm:$0xff]   ;;  %v8520_v52 = vld [vmem:[%s10152_s6 + $0x258] sm:$0xff]  }
 0x5a1   : > { %v3893_v48 = vsel %vm3885_vm1, %v3881_v23, %v3889_v49  ;;  %vm3883_vm3 = vcmp.ge.f32.partialorder %v3879_v24, 0.0  ;;  %v3887_v26 = vmul.f32 0.2, %v3879_v24  ;;  %v8517_v23 = vld [vmem:[%s10152_s6 + $0x220] sm:$0xff]   ;;  %v8519_v49 = vld [vmem:[%s10152_s6 + $0x218] sm:$0xff]  }
 0x5a2   : > { %v9740_v22 = vpack.c.bf16 %v3893_v48, %v3892_v60  ;;  %v8522_v60 = vld [vmem:[%s10152_s6 + $0x250] sm:$0xff]   ;;  %v8523_v48 = vld [vmem:[%s10152_s6 + $0x208] sm:$0xff]  }
 0x5a3   : > { %v3891_v28 = vsel %vm3883_vm3, %v3879_v24, %v3887_v26  ;;  %v8521_v24 = vld [vmem:[%s10152_s6 + $0x210] sm:$0xff]   ;;  %v8524_v26 = vld [vmem:[%s10152_s6 + $0x248] sm:$0xff]  }
 0x5a4   : > { %v9742_v10 = vpack.c.bf16 %v3891_v28, %v3890_v27  ;;  %v8525_v27 = vld [vmem:[%s10152_s6 + $0x200] sm:$0xff]  }
 0x5a5   : > { %v8526_v28 = vld [vmem:[%s10152_s6 + $0x240] sm:$0xff]  }
 0x5a6   : > { %7887 = vmatprep.mubr.bf16.mxu0 %v9742_v10  ;;  %7907 = vmatprep.mubr.bf16.mxu1 %v9742_v10 }
 0x5a7   : > { %7888 = vmatmul.mubr.bf16.vlgmr.msra.gmra.mxu0 %v9740_v22  ;;  %7908 = vmatmul.mubr.bf16.vlgmr.msra.gmra.mxu1 %v9740_v22 }
 0x5a8   : > { %7912 = vmatpush3.bf16.msra.mxu0 %v9722_v50  ;;  %7932 = vmatpush3.bf16.msra.mxu1 %v9727_v53  ;;  %v8469_v50 = vld [vmem:[%s10152_s6 + $0xa0] sm:$0xff]  }
 0x5a9   : > { %7927 = vmatprep.mubr.bf16.mxu0 %v9742_v10  ;;  %7947 = vmatprep.mubr.bf16.mxu1 %v9742_v10  ;;  %v8470_v53 = vld [vmem:[%s10152_s6 + $0xe0] sm:$0xff]  }
 0x5aa   : > { %7913 = vmatprep.subr.bf16.mxu0 %v8465_v5  ;;  %7933 = vmatprep.subr.bf16.mxu1 %v8466_v16 }
 0x5ac   : > { %7914 = vmatpush3.bf16.msra.mxu0 %v8465_v5  ;;  %7934 = vmatpush3.bf16.msra.mxu1 %v8466_v16  ;;  %v8527_v5 = vld [vmem:[%s10152_s6 + $0x2b8] sm:$0xff]  }
 0x5ad   : > { %7915 = vmatprep.subr.bf16.mxu0 %v8467_v29  ;;  %7935 = vmatprep.subr.bf16.mxu1 %v8468_v14  ;;  %v8528_v16 = vld [vmem:[%s10152_s6 + $0x2f8] sm:$0xff]  }
 0x5b0   : > { %7916 = vmatpush3.bf16.msra.mxu0 %v8467_v29  ;;  %7936 = vmatpush3.bf16.msra.mxu1 %v8468_v14  ;;  %v8529_v29 = vld [vmem:[%s10152_s6 + $0x2b0] sm:$0xff]  }
 0x5b1   : > { %7917 = vmatprep.subr.bf16.mxu0 %v8469_v50  ;;  %7937 = vmatprep.subr.bf16.mxu1 %v8470_v53  ;;  %v8530_v14 = vld [vmem:[%s10152_s6 + $0x2f0] sm:$0xff]  }
 0x5b4   : > { %7918 = vmatpush3.bf16.msra.mxu0 %v8469_v50  ;;  %7938 = vmatpush3.bf16.msra.mxu1 %v8470_v53  ;;  %v8531_v50 = vld [vmem:[%s10152_s6 + $0x2a8] sm:$0xff]  }
 0x5b5   : > { %7919 = vmatprep.subr.bf16.mxu0 %v8471_v30  ;;  %7939 = vmatprep.subr.bf16.mxu1 %v8472_v31  ;;  %v8532_v53 = vld [vmem:[%s10152_s6 + $0x2e8] sm:$0xff]  }
 0x5b8   : > { %7920 = vmatpush3.bf16.msra.mxu0 %v8471_v30  ;;  %7940 = vmatpush3.bf16.msra.mxu1 %v8472_v31  ;;  %v8533_v30 = vld [vmem:[%s10152_s6 + $0x2a0] sm:$0xff]  }
 0x5b9   : > { %7921 = vmatprep.subr.bf16.mxu0 %v8473_v2  ;;  %7941 = vmatprep.subr.bf16.mxu1 %v8474_v25  ;;  %v8534_v31 = vld [vmem:[%s10152_s6 + $0x2e0] sm:$0xff]  }
 0x5bc   : > { %7922 = vmatpush3.bf16.msra.mxu0 %v8473_v2  ;;  %7942 = vmatpush3.bf16.msra.mxu1 %v8474_v25  ;;  %v8535_v2 = vld [vmem:[%s10152_s6 + $0x298] sm:$0xff]  }
 0x5bd   : > { %7923 = vmatprep.subr.bf16.mxu0 %v8475_v51  ;;  %7943 = vmatprep.subr.bf16.mxu1 %v8476_v34  ;;  %v8536_v25 = vld [vmem:[%s10152_s6 + $0x2d8] sm:$0xff]  }
 0x5c0   : > { %7924 = vmatpush3.bf16.msra.mxu0 %v8475_v51  ;;  %7944 = vmatpush3.bf16.msra.mxu1 %v8476_v34  ;;  %v8537_v51 = vld [vmem:[%s10152_s6 + $0x290] sm:$0xff]  }
 0x5c1   : > { %7925 = vmatprep.subr.bf16.mxu0 %v8477_v47  ;;  %7945 = vmatprep.subr.bf16.mxu1 %v8478_v11  ;;  %v8538_v34 = vld [vmem:[%s10152_s6 + $0x2d0] sm:$0xff]  }
 0x5c4   : > { %7926 = vmatpush3.bf16.msra.mxu0 %v8477_v47  ;;  %7946 = vmatpush3.bf16.msra.mxu1 %v8478_v11  ;;  %v8539_v47 = vld [vmem:[%s10152_s6 + $0x288] sm:$0xff]  }
 0x5c5   : > { %7951 = vmatprep.subr.bf16.mxu0 %v8479_v32  ;;  %7971 = vmatprep.subr.bf16.mxu1 %v8480_v56  ;;  %v8540_v11 = vld [vmem:[%s10152_s6 + $0x2c8] sm:$0xff]  }
 0x5c7   : > { %7928 = vmatmul.mubr.bf16.vlgmr.msra.gmra.mxu0 %v9740_v22  ;;  %7948 = vmatmul.mubr.bf16.vlgmr.msra.gmra.mxu1 %v9740_v22 }
 0x5c8   : > { %7952 = vmatpush3.bf16.msra.mxu0 %v8479_v32  ;;  %7967 = vmatprep.mubr.bf16.mxu0 %v9742_v10  ;;  %v8541_v32 = vld [vmem:[%s10152_s6 + $0x280] sm:$0xff]  }
 0x5c9   : > { %7972 = vmatpush3.bf16.msra.mxu1 %v8480_v56  ;;  %7987 = vmatprep.mubr.bf16.mxu1 %v9742_v10  ;;  %v8542_v56 = vld [vmem:[%s10152_s6 + $0x2c0] sm:$0xff]  }
 0x5ca   : > { %7953 = vmatprep.subr.bf16.mxu0 %v8481_v0  ;;  %7973 = vmatprep.subr.bf16.mxu1 %v8482_v43 }
 0x5cc   : > { %7954 = vmatpush3.bf16.msra.mxu0 %v8481_v0  ;;  %v8543_v0 = vld [vmem:[%s10152_s6 + $0x338] sm:$0xff]  }
 0x5cd   : > { %7974 = vmatpush3.bf16.msra.mxu1 %v8482_v43  ;;  %7955 = vmatprep.subr.bf16.mxu0 %v8483_v35  ;;  %v8544_v43 = vld [vmem:[%s10152_s6 + $0x378] sm:$0xff]  }
 0x5ce   : > { %7975 = vmatprep.subr.bf16.mxu1 %v8484_v13 }
 0x5d0   : > { %7956 = vmatpush3.bf16.msra.mxu0 %v8483_v35  ;;  %v8545_v35 = vld [vmem:[%s10152_s6 + $0x330] sm:$0xff]  }
 0x5d1   : > { %7976 = vmatpush3.bf16.msra.mxu1 %v8484_v13  ;;  %7957 = vmatprep.subr.bf16.mxu0 %v8485_v1  ;;  %v8546_v13 = vld [vmem:[%s10152_s6 + $0x370] sm:$0xff]  }
 0x5d2   : > { %7977 = vmatprep.subr.bf16.mxu1 %v8486_v46 }
 0x5d4   : > { %7958 = vmatpush3.bf16.msra.mxu0 %v8485_v1  ;;  %v8547_v1 = vld [vmem:[%s10152_s6 + $0x328] sm:$0xff]  }
 0x5d5   : > { %7978 = vmatpush3.bf16.msra.mxu1 %v8486_v46  ;;  %7959 = vmatprep.subr.bf16.mxu0 %v8487_v38  ;;  %v8548_v46 = vld [vmem:[%s10152_s6 + $0x368] sm:$0xff]  }
 0x5d6   : > { %7979 = vmatprep.subr.bf16.mxu1 %v8488_v61 }
 0x5d8   : > { %7960 = vmatpush3.bf16.msra.mxu0 %v8487_v38  ;;  %v8549_v38 = vld [vmem:[%s10152_s6 + $0x320] sm:$0xff]  }
 0x5d9   : > { %7980 = vmatpush3.bf16.msra.mxu1 %v8488_v61  ;;  %7961 = vmatprep.subr.bf16.mxu0 %v8489_v3  ;;  %v8550_v61 = vld [vmem:[%s10152_s6 + $0x360] sm:$0xff]  }
 0x5da   : > { %7981 = vmatprep.subr.bf16.mxu1 %v8490_v63 }
 0x5dc   : > { %7962 = vmatpush3.bf16.msra.mxu0 %v8489_v3  ;;  %v8551_v3 = vld [vmem:[%s10152_s6 + $0x318] sm:$0xff]  }
 0x5dd   : > { %7982 = vmatpush3.bf16.msra.mxu1 %v8490_v63  ;;  %7963 = vmatprep.subr.bf16.mxu0 %v8491_v39  ;;  %v8552_v63 = vld [vmem:[%s10152_s6 + $0x358] sm:$0xff]  }
 0x5de   : > { %7983 = vmatprep.subr.bf16.mxu1 %v8492_v54 }
 0x5e0   : > { %7964 = vmatpush3.bf16.msra.mxu0 %v8491_v39  ;;  %v8553_v39 = vld [vmem:[%s10152_s6 + $0x310] sm:$0xff]  }
 0x5e1   : > { %7984 = vmatpush3.bf16.msra.mxu1 %v8492_v54  ;;  %7965 = vmatprep.subr.bf16.mxu0 %v8493_v37  ;;  %v8554_v54 = vld [vmem:[%s10152_s6 + $0x350] sm:$0xff]  }
 0x5e2   : > { %7985 = vmatprep.subr.bf16.mxu1 %v8494_v41 }
 0x5e4   : > { %7966 = vmatpush3.bf16.msra.mxu0 %v8493_v37  ;;  %v8555_v37 = vld [vmem:[%s10152_s6 + $0x308] sm:$0xff]  }
 0x5e5   : > { %7986 = vmatpush3.bf16.msra.mxu1 %v8494_v41  ;;  %7991 = vmatprep.subr.bf16.mxu0 %v8495_v42  ;;  %v8556_v41 = vld [vmem:[%s10152_s6 + $0x348] sm:$0xff]  }
 0x5e6   : > { %8011 = vmatprep.subr.bf16.mxu1 %v8496_v44 }
 0x5e7   : > { %7968 = vmatmul.mubr.bf16.vlgmr.msra.gmra.mxu0 %v9740_v22 }
 0x5e8   : > { %7988 = vmatmul.mubr.bf16.vlgmr.msra.gmra.mxu1 %v9740_v22  ;;  %7992 = vmatpush3.bf16.msra.mxu0 %v8495_v42  ;;  %v8557_v42 = vld [vmem:[%s10152_s6 + $0x300] sm:$0xff]  }
 0x5e9   : > { %8007 = vmatprep.mubr.bf16.mxu0 %v9742_v10  ;;  %8012 = vmatpush3.bf16.msra.mxu1 %v8496_v44  ;;  %v8558_v44 = vld [vmem:[%s10152_s6 + $0x340] sm:$0xff]  }
 0x5ea   : > { %8027 = vmatprep.mubr.bf16.mxu1 %v9742_v10  ;;  %7993 = vmatprep.subr.bf16.mxu0 %v8497_v45 }
 0x5eb   : > { %8013 = vmatprep.subr.bf16.mxu1 %v8498_v40 }
 0x5ec   : > { %7994 = vmatpush3.bf16.msra.mxu0 %v8497_v45  ;;  %v4006_v45 = vlaneseq }
 0x5ed   : > { %8014 = vmatpush3.bf16.msra.mxu1 %v8498_v40  ;;  %7995 = vmatprep.subr.bf16.mxu0 %v8499_v55  ;;  %v8559_v40 = vld [vmem:[%s10152_s6 + $0x3b8] sm:$0xff]  }
 0x5ee   : > { %8015 = vmatprep.subr.bf16.mxu1 %v8500_v58 }
 0x5f0   : > { %7996 = vmatpush3.bf16.msra.mxu0 %v8499_v55  ;;  %v8560_v55 = vld [vmem:[%s10152_s6 + $0x3f8] sm:$0xff]  }
 0x5f1   : > { %8016 = vmatpush3.bf16.msra.mxu1 %v8500_v58  ;;  %7997 = vmatprep.subr.bf16.mxu0 %v8501_v33  ;;  %v10060_v58 = vshrl.u32 %v4006_v45, 7 }
 0x5f2   : > { %8017 = vmatprep.subr.bf16.mxu1 %v8502_v36 }
 0x5f4   : > { %7998 = vmatpush3.bf16.msra.mxu0 %v8501_v33  ;;  %v10063_v33 = vsub.s32 0, %v10060_v58 }
 0x5f5   : > { %8018 = vmatpush3.bf16.msra.mxu1 %v8502_v36  ;;  %7999 = vmatprep.subr.bf16.mxu0 %v8503_v62  ;;  %v4124_v36 = vsub.s32 1, %v10060_v58 }
 0x5f6   : > { %8019 = vmatprep.subr.bf16.mxu1 %v8504_v8 }
 0x5f8   : > { %8000 = vmatpush3.bf16.msra.mxu0 %v8503_v62  ;;  %v8561_v62 = vld [vmem:[%s10152_s6 + $0x3b0] sm:$0xff]  }
 0x5f9   : > { %8020 = vmatpush3.bf16.msra.mxu1 %v8504_v8  ;;  %8001 = vmatprep.subr.bf16.mxu0 %v8505_v59 }
 0x5fa   : > { %8021 = vmatprep.subr.bf16.mxu1 %v8506_v9 }
 0x5fc   : > { %8002 = vmatpush3.bf16.msra.mxu0 %v8505_v59 }
 0x5fd   : > { %8022 = vmatpush3.bf16.msra.mxu1 %v8506_v9  ;;  %8003 = vmatprep.subr.bf16.mxu0 %v8507_v6  ;;  %v8562_v9 = vld [vmem:[%s10152_s6 + $0x3f0] sm:$0xff]  }
 0x5fe   : > { %8023 = vmatprep.subr.bf16.mxu1 %v8508_v12 }
 0x600   : > { %8004 = vmatpush3.bf16.msra.mxu0 %v8507_v6 }
 0x601   : > { %8024 = vmatpush3.bf16.msra.mxu1 %v8508_v12  ;;  %8005 = vmatprep.subr.bf16.mxu0 %v8509_v15 }
 0x602   : > { %8025 = vmatprep.subr.bf16.mxu1 %v8510_v57 }
 0x604   : > { %8006 = vmatpush3.bf16.msra.mxu0 %v8509_v15  ;;  %v8563_v15 = vld [vmem:[%s10152_s6 + $0x3a8] sm:$0xff]  }
 0x605   : > { %8026 = vmatpush3.bf16.msra.mxu1 %v8510_v57  ;;  %8031 = vmatprep.subr.bf16.mxu0 %v8511_v17 }
 0x606   : > { %8051 = vmatprep.subr.bf16.mxu1 %v8512_v18 }
 0x607   : > { %8008 = vmatmul.mubr.bf16.vlgmr.msra.gmra.mxu0 %v9740_v22 }
 0x608   : > { %8028 = vmatmul.mubr.bf16.vlgmr.msra.gmra.mxu1 %v9740_v22  ;;  %8032 = vmatpush3.bf16.msra.mxu0 %v8511_v17 }
 0x609   : > { %8047 = vmatprep.mubr.bf16.mxu0 %v9742_v10  ;;  %8052 = vmatpush3.bf16.msra.mxu1 %v8512_v18  ;;  %v8564_v18 = vld [vmem:[%s10152_s6 + $0x3e8] sm:$0xff]  }
 0x60a   : > { %8067 = vmatprep.mubr.bf16.mxu1 %v9742_v10  ;;  %8033 = vmatprep.subr.bf16.mxu0 %v8513_v4 }
 0x60b   : > { %8053 = vmatprep.subr.bf16.mxu1 %v8514_v19 }
 0x60c   : > { %8034 = vmatpush3.bf16.msra.mxu0 %v8513_v4 }
 0x60d   : > { %8054 = vmatpush3.bf16.msra.mxu1 %v8514_v19  ;;  %8035 = vmatprep.subr.bf16.mxu0 %v8515_v20 }
 0x60e   : > { %8055 = vmatprep.subr.bf16.mxu1 %v8516_v21 }
 0x610   : > { %8036 = vmatpush3.bf16.msra.mxu0 %v8515_v20 }
 0x611   : > { %8056 = vmatpush3.bf16.msra.mxu1 %v8516_v21  ;;  %8037 = vmatprep.subr.bf16.mxu0 %v8517_v23 }
 0x612   : > { %8057 = vmatprep.subr.bf16.mxu1 %v8518_v7 }
 0x614   : > { %8038 = vmatpush3.bf16.msra.mxu0 %v8517_v23 }
 0x615   : > { %8058 = vmatpush3.bf16.msra.mxu1 %v8518_v7  ;;  %8039 = vmatprep.subr.bf16.mxu0 %v8519_v49  ;;  %v8566_v7 = vld [vmem:[%s10152_s6 + $0x3e0] sm:$0xff]  }
 0x616   : > { %8059 = vmatprep.subr.bf16.mxu1 %v8520_v52 }
 0x618   : > { %8040 = vmatpush3.bf16.msra.mxu0 %v8519_v49  ;;  %v8567_v49 = vld [vmem:[%s10152_s6 + $0x398] sm:$0xff]  }
 0x619   : > { %8060 = vmatpush3.bf16.msra.mxu1 %v8520_v52  ;;  %8041 = vmatprep.subr.bf16.mxu0 %v8521_v24  ;;  %v8568_v52 = vld [vmem:[%s10152_s6 + $0x3d8] sm:$0xff]  }
 0x61a   : > { %8061 = vmatprep.subr.bf16.mxu1 %v8522_v60 }
 0x61c   : > { %8042 = vmatpush3.bf16.msra.mxu0 %v8521_v24  ;;  %v8569_v24 = vld [vmem:[%s10152_s6 + $0x390] sm:$0xff]  }
 0x61d   : > { %8062 = vmatpush3.bf16.msra.mxu1 %v8522_v60  ;;  %8043 = vmatprep.subr.bf16.mxu0 %v8523_v48  ;;  %v8570_v60 = vld [vmem:[%s10152_s6 + $0x3d0] sm:$0xff]  }
 0x61e   : > { %8063 = vmatprep.subr.bf16.mxu1 %v8524_v26 }
 0x620   : > { %8044 = vmatpush3.bf16.msra.mxu0 %v8523_v48  ;;  %v8571_v48 = vld [vmem:[%s10152_s6 + $0x388] sm:$0xff]  }
 0x621   : > { %8064 = vmatpush3.bf16.msra.mxu1 %v8524_v26  ;;  %8045 = vmatprep.subr.bf16.mxu0 %v8525_v27  ;;  %v8572_v26 = vld [vmem:[%s10152_s6 + $0x3c8] sm:$0xff]  }
 0x622   : > { %8065 = vmatprep.subr.bf16.mxu1 %v8526_v28 }
 0x624   : > { %8046 = vmatpush3.bf16.msra.mxu0 %v8525_v27  ;;  %v8573_v27 = vld [vmem:[%s10152_s6 + $0x380] sm:$0xff]  }
 0x625   : > { %8066 = vmatpush3.bf16.msra.mxu1 %v8526_v28  ;;  %8071 = vmatprep.subr.bf16.mxu0 %v8527_v5  ;;  %v8574_v28 = vld [vmem:[%s10152_s6 + $0x3c0] sm:$0xff]  }
 0x626   : > { %8091 = vmatprep.subr.bf16.mxu1 %v8528_v16 }
 0x627   : > { %8048 = vmatmul.mubr.bf16.vlgmr.msra.gmra.mxu0 %v9740_v22 }
 0x628   : > { %8068 = vmatmul.mubr.bf16.vlgmr.msra.gmra.mxu1 %v9740_v22  ;;  %8072 = vmatpush3.bf16.msra.mxu0 %v8527_v5  ;;  %v10116_v5 = vsub.s32 2, %v10060_v58 }
 0x629   : > { %8087 = vmatprep.mubr.bf16.mxu0 %v9742_v10  ;;  %8092 = vmatpush3.bf16.msra.mxu1 %v8528_v16 }
 0x62a   : > { %8107 = vmatprep.mubr.bf16.mxu1 %v9742_v10  ;;  %8073 = vmatprep.subr.bf16.mxu0 %v8529_v29 }
 0x62b   : > { %8093 = vmatprep.subr.bf16.mxu1 %v8530_v14 }
 0x62c   : > { %8074 = vmatpush3.bf16.msra.mxu0 %v8529_v29 }
 0x62d   : > { %8094 = vmatpush3.bf16.msra.mxu1 %v8530_v14  ;;  %8075 = vmatprep.subr.bf16.mxu0 %v8531_v50  ;;  %v4356_v14 = vsub.s32 3, %v10060_v58 }
 0x62e   : > { %8095 = vmatprep.subr.bf16.mxu1 %v8532_v53 }
 0x630   : > { %8076 = vmatpush3.bf16.msra.mxu0 %v8531_v50 }
 0x631   : > { %8096 = vmatpush3.bf16.msra.mxu1 %v8532_v53  ;;  %8077 = vmatprep.subr.bf16.mxu0 %v8533_v30 }
 0x632   : > { %8097 = vmatprep.subr.bf16.mxu1 %v8534_v31 }
 0x634   : > { %8078 = vmatpush3.bf16.msra.mxu0 %v8533_v30 }
 0x635   : > { %8098 = vmatpush3.bf16.msra.mxu1 %v8534_v31  ;;  %8079 = vmatprep.subr.bf16.mxu0 %v8535_v2 }
 0x636   : > { %8099 = vmatprep.subr.bf16.mxu1 %v8536_v25 }
 0x638   : > { %8080 = vmatpush3.bf16.msra.mxu0 %v8535_v2 }
 0x639   : > { %8100 = vmatpush3.bf16.msra.mxu1 %v8536_v25  ;;  %8081 = vmatprep.subr.bf16.mxu0 %v8537_v51 }
 0x63a   : > { %8101 = vmatprep.subr.bf16.mxu1 %v8538_v34 }
 0x63c   : > { %8082 = vmatpush3.bf16.msra.mxu0 %v8537_v51 }
 0x63d   : > { %8102 = vmatpush3.bf16.msra.mxu1 %v8538_v34  ;;  %8083 = vmatprep.subr.bf16.mxu0 %v8539_v47 }
 0x63e   : > { %8103 = vmatprep.subr.bf16.mxu1 %v8540_v11 }
 0x640   : > { %8084 = vmatpush3.bf16.msra.mxu0 %v8539_v47 }
 0x641   : > { %8104 = vmatpush3.bf16.msra.mxu1 %v8540_v11  ;;  %8085 = vmatprep.subr.bf16.mxu0 %v8541_v32 }
 0x642   : > { %8105 = vmatprep.subr.bf16.mxu1 %v8542_v56 }
 0x644   : > { %8086 = vmatpush3.bf16.msra.mxu0 %v8541_v32  ;;  %v4472_v32 = vsub.s32 5, %v10060_v58 }
 0x645   : > { %8106 = vmatpush3.bf16.msra.mxu1 %v8542_v56  ;;  %8111 = vmatprep.subr.bf16.mxu0 %v8543_v0 }
 0x646   : > { %8131 = vmatprep.subr.bf16.mxu1 %v8544_v43 }
 0x647   : > { %8088 = vmatmul.mubr.bf16.vlgmr.msra.gmra.mxu0 %v9740_v22 }
 0x648   : > { %8108 = vmatmul.mubr.bf16.vlgmr.msra.gmra.mxu1 %v9740_v22  ;;  %8112 = vmatpush3.bf16.msra.mxu0 %v8543_v0 }
 0x649   : > { %8127 = vmatprep.mubr.bf16.mxu0 %v9742_v10  ;;  %8132 = vmatpush3.bf16.msra.mxu1 %v8544_v43 }
 0x64a   : > { %8147 = vmatprep.mubr.bf16.mxu1 %v9742_v10  ;;  %8113 = vmatprep.subr.bf16.mxu0 %v8545_v35 }
 0x64b   : > { %8133 = vmatprep.subr.bf16.mxu1 %v8546_v13 }
 0x64c   : > { %8114 = vmatpush3.bf16.msra.mxu0 %v8545_v35 }
 0x64d   : > { %8134 = vmatpush3.bf16.msra.mxu1 %v8546_v13  ;;  %8115 = vmatprep.subr.bf16.mxu0 %v8547_v1 }
 0x64e   : > { %8135 = vmatprep.subr.bf16.mxu1 %v8548_v46 }
 0x650   : > { %8116 = vmatpush3.bf16.msra.mxu0 %v8547_v1 }
 0x651   : > { %8136 = vmatpush3.bf16.msra.mxu1 %v8548_v46  ;;  %8117 = vmatprep.subr.bf16.mxu0 %v8549_v38 }
 0x652   : > { %8137 = vmatprep.subr.bf16.mxu1 %v8550_v61 }
 0x654   : > { %8118 = vmatpush3.bf16.msra.mxu0 %v8549_v38 }
 0x655   : > { %8138 = vmatpush3.bf16.msra.mxu1 %v8550_v61  ;;  %8119 = vmatprep.subr.bf16.mxu0 %v8551_v3 }
 0x656   : > { %8139 = vmatprep.subr.bf16.mxu1 %v8552_v63 }
 0x658   : > { %8120 = vmatpush3.bf16.msra.mxu0 %v8551_v3 }
 0x659   : > { %8140 = vmatpush3.bf16.msra.mxu1 %v8552_v63  ;;  %8121 = vmatprep.subr.bf16.mxu0 %v8553_v39 }
 0x65a   : > { %8141 = vmatprep.subr.bf16.mxu1 %v8554_v54 }
 0x65c   : > { %8122 = vmatpush3.bf16.msra.mxu0 %v8553_v39 }
 0x65d   : > { %8142 = vmatpush3.bf16.msra.mxu1 %v8554_v54  ;;  %8123 = vmatprep.subr.bf16.mxu0 %v8555_v37  ;;  %v4704_v54 = vsub.s32 7, %v10060_v58 }
 0x65e   : > { %8143 = vmatprep.subr.bf16.mxu1 %v8556_v41 }
 0x660   : > { %8124 = vmatpush3.bf16.msra.mxu0 %v8555_v37 }
 0x661   : > { %8144 = vmatpush3.bf16.msra.mxu1 %v8556_v41  ;;  %8125 = vmatprep.subr.bf16.mxu0 %v8557_v42 }
 0x662   : > { %8145 = vmatprep.subr.bf16.mxu1 %v8558_v44 }
 0x664   : > { %8126 = vmatpush3.bf16.msra.mxu0 %v8557_v42 }
 0x665   : > { %8146 = vmatpush3.bf16.msra.mxu1 %v8558_v44  ;;  %8151 = vmatprep.subr.bf16.mxu0 %v8559_v40 }
 0x666   : > { %8171 = vmatprep.subr.bf16.mxu1 %v8560_v55 }
 0x667   : > { %8128 = vmatmul.mubr.bf16.vlgmr.msra.gmra.mxu0 %v9740_v22  ;;  %v7889_v8 = vpop.f32.mrf.mxu0  ;;  %v7909_v59 = vpop.f32.mrf.mxu1 }
 0x668   : > { %8148 = vmatmul.mubr.bf16.vlgmr.msra.gmra.mxu1 %v9740_v22  ;;  %8152 = vmatpush3.bf16.msra.mxu0 %v8559_v40 }
 0x669   : > { %8167 = vmatprep.mubr.bf16.mxu0 %v9742_v10  ;;  %8172 = vmatpush3.bf16.msra.mxu1 %v8560_v55  ;;  %v3994_v6 = vpop.f32.mrf.mxu0  ;;  %v4110_v12 = vpop.f32.mrf.mxu1 }
 0x66a   : > { %8187 = vmatprep.mubr.bf16.mxu1 %v9742_v10  ;;  %v4009_v57 = vrot.slane %v3994_v6, %v10063_v33  ;;  %v4125_v17 = vrot.slane %v4110_v12, %v4124_v36  ;;  %8153 = vmatprep.subr.bf16.mxu0 %v8561_v62  ;;  %v8565_v10 = vld [vmem:[%s10152_s6 + $0x3a0] sm:$0xff]  }
 0x66b   : > { %8173 = vmatprep.subr.bf16.mxu1 %v8562_v9  ;;  %v7890_v4 = vpop.f32.mrf.mxu0  ;;  %v7910_v19 = vpop.f32.mrf.mxu1 }
 0x66c   : > { %v4126_v20 = vadd.f32 %v4125_v17, %v4009_v57  ;;  %8154 = vmatpush3.bf16.msra.mxu0 %v8561_v62 }
 0x66d   : > { %8174 = vmatpush3.bf16.msra.mxu1 %v8562_v9  ;;  %v3997_v21 = vpop.f32.mrf.mxu0  ;;  %v4113_v23 = vpop.f32.mrf.mxu1  ;;  %8155 = vmatprep.subr.bf16.mxu0 %v8563_v15 }
 0x66e   : > { %8175 = vmatprep.subr.bf16.mxu1 %v8564_v18 }
 0x670   : > { %8156 = vmatpush3.bf16.msra.mxu0 %v8563_v15 }
 0x671   : > { %8176 = vmatpush3.bf16.msra.mxu1 %v8564_v18  ;;  %8157 = vmatprep.subr.bf16.mxu0 %v8565_v10 }
 0x672   : > { %8177 = vmatprep.subr.bf16.mxu1 %v8566_v7 }
 0x674   : > { %8158 = vmatpush3.bf16.msra.mxu0 %v8565_v10 }
 0x675   : > { %8178 = vmatpush3.bf16.msra.mxu1 %v8566_v7  ;;  %8159 = vmatprep.subr.bf16.mxu0 %v8567_v49 }
 0x676   : > { %8179 = vmatprep.subr.bf16.mxu1 %v8568_v52 }
 0x678   : > { %8160 = vmatpush3.bf16.msra.mxu0 %v8567_v49 }
 0x679   : > { %8180 = vmatpush3.bf16.msra.mxu1 %v8568_v52  ;;  %8161 = vmatprep.subr.bf16.mxu0 %v8569_v24 }
 0x67a   : > { %8181 = vmatprep.subr.bf16.mxu1 %v8570_v60 }
 0x67c   : > { %8162 = vmatpush3.bf16.msra.mxu0 %v8569_v24 }
 0x67d   : > { %8182 = vmatpush3.bf16.msra.mxu1 %v8570_v60  ;;  %8163 = vmatprep.subr.bf16.mxu0 %v8571_v48 }
 0x67e   : > { %8183 = vmatprep.subr.bf16.mxu1 %v8572_v26 }
 0x680   : > { %8164 = vmatpush3.bf16.msra.mxu0 %v8571_v48 }
 0x681   : > { %8184 = vmatpush3.bf16.msra.mxu1 %v8572_v26  ;;  %8165 = vmatprep.subr.bf16.mxu0 %v8573_v27 }
 0x682   : > { %8185 = vmatprep.subr.bf16.mxu1 %v8574_v28 }
 0x684   : > { %8166 = vmatpush3.bf16.msra.mxu0 %v8573_v27 }
 0x685   : > { %8186 = vmatpush3.bf16.msra.mxu1 %v8574_v28 }
 0x687   : > { %v7929_v16 = vpop.f32.mrf.mxu0  ;;  %v7949_v29 = vpop.f32.mrf.mxu1  ;;  %8168 = vmatmul.mubr.bf16.vlgmr.msra.gmra.mxu0 %v9740_v22 }
 0x688   : > { %8188 = vmatmul.mubr.bf16.vlgmr.msra.gmra.mxu1 %v9740_v22  ;;  %v4588_v22 = vsub.s32 6, %v10060_v58 }
 0x689   : > { %v4226_v50 = vpop.f32.mrf.mxu0  ;;  %v4342_v53 = vpop.f32.mrf.mxu1 }
 0x68a   : > { %v4241_v30 = vrot.slane %v4226_v50, %v10116_v5  ;;  %v4357_v51 = vrot.slane %v4342_v53, %v4356_v14 }
 0x68b   : > { %v7930_v31 = vpop.f32.mrf.mxu0  ;;  %v7950_v2 = vpop.f32.mrf.mxu1 }
 0x68c   : > { %v4242_v25 = vadd.f32 %v4241_v30, %v4126_v20  ;;  %v5168_v30 = vsub.s32 4, %v10060_v58 }
 0x68d   : > { %v4229_v34 = vpop.f32.mrf.mxu0  ;;  %v4345_v47 = vpop.f32.mrf.mxu1 }
 0x68e   : > { %v4358_v11 = vadd.f32 %v4357_v51, %v4242_v25 }
 0x6a7   : > { %v7969_v56 = vpop.f32.mrf.mxu0 }
 0x6a8   : > { %v7989_v0 = vpop.f32.mrf.mxu1 }
 0x6a9   : > { %v4458_v43 = vpop.f32.mrf.mxu0 }
 0x6aa   : > { %v4473_v35 = vrot.slane %v4458_v43, %v4472_v32  ;;  %v4574_v13 = vpop.f32.mrf.mxu1 }
 0x6ab   : > { %v7970_v1 = vpop.f32.mrf.mxu0  ;;  %v4589_v38 = vrot.slane %v4574_v13, %v4588_v22 }
 0x6ac   : > { %v4474_v46 = vadd.f32 %v4473_v35, %v4358_v11  ;;  %v7990_v61 = vpop.f32.mrf.mxu1 }
 0x6ad   : > { %v4461_v3 = vpop.f32.mrf.mxu0 }
 0x6ae   : > { %v4590_v63 = vadd.f32 %v4589_v38, %v4474_v46  ;;  %v4577_v39 = vpop.f32.mrf.mxu1 }
 0x6c7   : > { %v8009_v37 = vpop.f32.mrf.mxu0 }
 0x6c8   : > { %v8029_v41 = vpop.f32.mrf.mxu1 }
 0x6c9   : > { %v4690_v42 = vpop.f32.mrf.mxu0 }
 0x6ca   : > { %v4705_v44 = vrot.slane %v4690_v42, %v4704_v54  ;;  %v4806_v45 = vpop.f32.mrf.mxu1 }
 0x6cb   : > { %v8010_v40 = vpop.f32.mrf.mxu0 }
 0x6cc   : > { %v4706_v55 = vadd.f32 %v4705_v44, %v4590_v63  ;;  %v8030_v62 = vpop.f32.mrf.mxu1 }
 0x6cd   : > { %v4693_v8 = vpop.f32.mrf.mxu0 }
 0x6ce   : > { %v4808_v59 = vpop.f32.mrf.mxu1 }
 0x6cf   : > { %v4821_v9 = vrot.slane %v4808_v59, %v10063_v33 }
 0x6d1   : > { %v4822_v6 = vadd.f32 %v4821_v9, %v4706_v55 }
 0x6e7   : > { %v8049_v12 = vpop.f32.mrf.mxu0 }
 0x6e8   : > { %v8069_v15 = vpop.f32.mrf.mxu1 }
 0x6e9   : > { %v4922_v57 = vpop.f32.mrf.mxu0 }
 0x6ea   : > { %v5038_v17 = vpop.f32.mrf.mxu1 }
 0x6eb   : > { %v8050_v18 = vpop.f32.mrf.mxu0 }
 0x6ec   : > { %v8070_v4 = vpop.f32.mrf.mxu1 }
 0x6ed   : > { %v4924_v19 = vpop.f32.mrf.mxu0 }
 0x6ee   : > { %v5040_v20 = vpop.f32.mrf.mxu1  ;;  %v4937_v53 = vrot.slane %v4924_v19, %v10116_v5 }
 0x6ef   : > { %v5053_v2 = vrot.slane %v5040_v20, %v4356_v14 }
 0x6f0   : > { %v4938_v31 = vadd.f32 %v4937_v53, %v4822_v6 }
 0x6f2   : > { %v5054_v51 = vadd.f32 %v5053_v2, %v4938_v31 }
 0x707   : > { %v8089_v21 = vpop.f32.mrf.mxu0 }
 0x708   : > { %v8109_v23 = vpop.f32.mrf.mxu1 }
 0x709   : > { %v5154_v10 = vpop.f32.mrf.mxu0 }
 0x70a   : > { %v5270_v7 = vpop.f32.mrf.mxu1 }
 0x70b   : > { %v8090_v49 = vpop.f32.mrf.mxu0 }
 0x70c   : > { %v8110_v52 = vpop.f32.mrf.mxu1 }
 0x70d   : > { %v5156_v24 = vpop.f32.mrf.mxu0 }
 0x70e   : > { %v5272_v60 = vpop.f32.mrf.mxu1  ;;  %v5169_v25 = vrot.slane %v5156_v24, %v5168_v30 }
 0x70f   : > { %v5285_v11 = vrot.slane %v5272_v60, %v4472_v32  ;;  %v6707_v32 = vld [vmem:[%s10153_s7] ss:$0 sm:$0xff] }
 0x710   : > { %v5170_v47 = vadd.f32 %v5169_v25, %v5054_v51 }
 0x712   : > { %v5286_v0 = vadd.f32 %v5285_v11, %v5170_v47 }
 0x727   : > { %v8129_v48 = vpop.f32.mrf.mxu0 }
 0x728   : > { %v8149_v26 = vpop.f32.mrf.mxu1 }
 0x729   : > { %v5386_v27 = vpop.f32.mrf.mxu0  ;;  %v5517_v43 = vrot.slane %v8149_v26, %v10063_v33 }
 0x72a   : > { %v5502_v28 = vpop.f32.mrf.mxu1 }
 0x72b   : > { %v8130_v16 = vpop.f32.mrf.mxu0 }
 0x72c   : > { %v8150_v29 = vpop.f32.mrf.mxu1 }
 0x72d   : > { %v5388_v34 = vpop.f32.mrf.mxu0 }
 0x72e   : > { %v5504_v50 = vpop.f32.mrf.mxu1  ;;  %v5401_v56 = vrot.slane %v5388_v34, %v4704_v54 }
 0x730   : > { %v5402_v22 = vadd.f32 %v5401_v56, %v5286_v0 }
 0x732   : > { %v5518_v13 = vadd.f32 %v5517_v43, %v5402_v22 }
 0x747   : > { %v8169_v35 = vpop.f32.mrf.mxu0 }
 0x748   : > { %v5633_v1 = vrot.slane %v8169_v35, %v4124_v36  ;;  %v8189_v46 = vpop.f32.mrf.mxu1 }
 0x749   : > { %v5618_v38 = vpop.f32.mrf.mxu0  ;;  %v5749_v14 = vrot.slane %v8189_v46, %v10116_v5 }
 0x74a   : > { %v5634_v61 = vadd.f32 %v5633_v1, %v5518_v13  ;;  %v5734_v3 = vpop.f32.mrf.mxu1 }
 0x74b   : > { %v8170_v63 = vpop.f32.mrf.mxu0 }
 0x74c   : > { %v5750_v39 = vadd.f32 %v5749_v14, %v5634_v61  ;;  %v8190_v54 = vpop.f32.mrf.mxu1 }
 0x74d   : > { %v5620_v58 = vpop.f32.mrf.mxu0 }
 0x74e   : > { %v5758_v33 = vadd.f32 %v6707_v32, %v5750_v39  ;;  %v5736_v36 = vpop.f32.mrf.mxu1 }
 0x750   : > { %5759 = vst [vmem:[%s303_s16] sm:$0xff] %v5758_v33 }
 0x751 PF: > { %s18_s27 = sadd.s32 1, %s8581_s27  }
 0x752   : > { %p15_p4 = scmp.ge.s32.totalorder %s18_s27, 4  }
 0x754   :  { %17 = sbr.rel (!%p15_p4) target bundleno = 1 (0x1), region = 127 }

</bundles_post_ra>
